<compile_context>
chip_gen: v7x
topology: tpu7x:2x2x1
jax: 0.10.0
libtpu: 0.0.40
codegen_flags: <defaults>
</compile_context>

<pallas_src>
import jax
import jax.numpy as jnp
from jax.experimental import pallas as pl
from jax.experimental.pallas import tpu as pltpu

T = 42            # seq len: two ctx-3 TDNNs shrink it to 38; AvgPool kernel (38,1) -> 1
D = 32            # input feature dim
CTX = 3           # TDNN context size
HID = 32          # TDNN output dim
NCLS = 11         # classifier output dim
NCLS_PAD = 128    # lane-dense padded classifier width (sliced back to 11 in wrapper)
B_TILE = 8        # batch elements per grid step (M = B_TILE*(T-2) = 320 per matmul)
BN_EPS = 1e-5
# eval-mode BatchNorm1d with default running stats (mean=0, var=1, gamma=1, beta=0)
BN_SCALE = 1.0 / (1.0 + BN_EPS) ** 0.5


def decoder_kernel(x_ref, w1_ref, b1_ref, w2_ref, b2_ref, w3_ref, b3_ref, o_ref):
    bt = x_ref.shape[0]                 # static block batch size
    x = x_ref[...]                      # (bt, T, D) float32

    # ---- TDNN 1: unfold(ctx=3) -> single (bt*40, 96) @ (96, 32) matmul ----
    u1 = jnp.concatenate([x[:, 0:T - 2, :], x[:, 1:T - 1, :], x[:, 2:T, :]], axis=-1)
    u1 = u1.reshape(bt * (T - 2), CTX * D).astype(jnp.bfloat16)
    h1 = jnp.dot(u1, w1_ref[...], preferred_element_type=jnp.float32) + b1_ref[...]
    h1 = jnp.maximum(h1, 0.0)           # BN1 scale folded into w2
    h1 = h1.reshape(bt, T - 2, HID)

    # ---- TDNN 2 ----
    T1 = T - 2
    u2 = jnp.concatenate([h1[:, 0:T1 - 2, :], h1[:, 1:T1 - 1, :], h1[:, 2:T1, :]], axis=-1)
    u2 = u2.reshape(bt * (T1 - 2), CTX * HID).astype(jnp.bfloat16)
    h2 = jnp.dot(u2, w2_ref[...], preferred_element_type=jnp.float32) + b2_ref[...]
    h2 = jnp.maximum(h2, 0.0)           # BN2 scale + avg-pool divisor folded into w3
    h2 = h2.reshape(bt, T1 - 2, HID)

    # ---- AvgPool2d((38,1)) over time + Linear(32 -> 11, zero-padded to 128 lanes) ----
    pooled = jnp.sum(h2, axis=1)        # (bt, HID) f32; 1/38 folded into w3
    logits = (jnp.dot(pooled.astype(jnp.bfloat16), w3_ref[...],
                      preferred_element_type=jnp.float32) + b3_ref[...])
    o_ref[...] = logits                 # (bt, NCLS_PAD) lane-dense store


def fold_params(params):
    """One-time param prep: fold eval-mode BN scales and the avg-pool divisor into
    the weights, pad the classifier to 128 output lanes, cast MXU operands to bf16.
    (If real trained per-channel BN running stats are used, fold them here instead.)"""
    w1, b1, w2, b2, w3, b3 = params
    s = BN_SCALE
    w1f = w1.astype(jnp.bfloat16)                                   # (96, 32)
    w2f = (w2 * s).astype(jnp.bfloat16)                             # BN1 scale folded
    w3f = (w3 * (s / float(T - 4))).astype(jnp.bfloat16)            # BN2 scale + 1/38 folded
    w3p = jnp.zeros((HID, NCLS_PAD), jnp.bfloat16).at[:, :NCLS].set(w3f)
    b3p = jnp.zeros((1, NCLS_PAD), jnp.float32).at[:, :NCLS].set(b3)
    return (w1f, b1.astype(jnp.float32), w2f, b2.astype(jnp.float32), w3p, b3p)


def decoder_forward(x, folded_params, b_tile=B_TILE):
    B = x.shape[0]
    nb = pl.cdiv(B, b_tile)
    b_pad = nb * b_tile
    if b_pad != B:
        x = jnp.pad(x, ((0, b_pad - B), (0, 0), (0, 0)))
    w1, b1, w2, b2, w3p, b3p = folded_params

    out = pl.pallas_call(
        decoder_kernel,
        out_shape=jax.ShapeDtypeStruct((b_pad, NCLS_PAD), jnp.float32),
        grid=(nb,),
        in_specs=[
            pl.BlockSpec((b_tile, T, D), lambda b: (b, 0, 0)),      # x: B_TILE batch elems
            pl.BlockSpec((CTX * D, HID), lambda b: (0, 0)),         # W1 (96, 32) bf16
            pl.BlockSpec((1, HID), lambda b: (0, 0)),               # b1
            pl.BlockSpec((CTX * HID, HID), lambda b: (0, 0)),       # W2 (96, 32) bf16
            pl.BlockSpec((1, HID), lambda b: (0, 0)),               # b2
            pl.BlockSpec((HID, NCLS_PAD), lambda b: (0, 0)),        # W3 padded (32, 128) bf16
            pl.BlockSpec((1, NCLS_PAD), lambda b: (0, 0)),          # b3 padded
        ],
        out_specs=pl.BlockSpec((b_tile, NCLS_PAD), lambda b: (b, 0)),
        compiler_params=pltpu.CompilerParams(dimension_semantics=("parallel",)),
    )(x, w1, b1, w2, b2, w3p, b3p)
    return out[:B, :NCLS]


def init_params(key):
    """Deterministic init mimicking nn.Linear defaults: U(-1/sqrt(fan_in), +1/sqrt(fan_in))."""
    ks = jax.random.split(key, 6)

    def lin(kw, kb, fan_in, fan_out):
        bound = 1.0 / (fan_in ** 0.5)
        w = jax.random.uniform(kw, (fan_in, fan_out), jnp.float32, -bound, bound)
        b = jax.random.uniform(kb, (1, fan_out), jnp.float32, -bound, bound)
        return w, b

    w1, b1 = lin(ks[0], ks[1], CTX * D, HID)
    w2, b2 = lin(ks[2], ks[3], CTX * HID, HID)
    w3, b3 = lin(ks[4], ks[5], HID, NCLS)
    return (w1, b1, w2, b2, w3, b3)


def decoder_reference(x, params):
    """Plain-JAX f32 reference of the same forward (for sanity checking the kernel)."""
    w1, b1, w2, b2, w3, b3 = params

    def tdnn(h, w, b, t_in):
        unf = jnp.concatenate([h[:, 0:t_in - 2, :], h[:, 1:t_in - 1, :], h[:, 2:t_in, :]], axis=-1)
        out = unf @ w + b[0]
        return jnp.maximum(out, 0.0) * BN_SCALE

    h1 = tdnn(x, w1, b1, T)
    h2 = tdnn(h1, w2, b2, T - 2)
    pooled = jnp.mean(h2, axis=1, keepdims=True)     # AvgPool2d((38,1))
    out = pooled @ w3 + b3[0]                        # (B, 1, 11)
    return out[:, 0, :]                              # squeeze(1)


if __name__ == "__main__":
    key = jax.random.PRNGKey(0)
    k_x, k_p = jax.random.split(key)
    B = 10   # not a multiple of B_TILE: exercises batch padding; grid = 2 parallel steps
    x = jax.random.normal(k_x, (B, T, D), dtype=jnp.float32)
    params = init_params(k_p)
    folded = fold_params(params)

    out = decoder_forward(x, folded)
    out = jax.block_until_ready(out)

    ref = decoder_reference(x, params)
    assert out.shape == (B, NCLS), out.shape
    # bf16 MXU operands with f32 accumulation -> loose tolerance vs f32 reference.
    assert jnp.allclose(out, ref, atol=5e-2, rtol=5e-2), (jnp.max(jnp.abs(out - ref)), out, ref)

    print("KERNEL_OK")
</pallas_src>

<mosaic_0001>
module attributes {stable_mosaic.version = 11 : i64} {
  func.func @decoder_kernel(%arg0: i32, %arg1: memref<8x42x32xf32, #tpu.memory_space<vmem>>, %arg2: memref<96x32xbf16, #tpu.memory_space<vmem>>, %arg3: memref<1x32xf32, #tpu.memory_space<vmem>>, %arg4: memref<96x32xbf16, #tpu.memory_space<vmem>>, %arg5: memref<1x32xf32, #tpu.memory_space<vmem>>, %arg6: memref<32x128xbf16, #tpu.memory_space<vmem>>, %arg7: memref<1x128xf32, #tpu.memory_space<vmem>>, %arg8: memref<8x128xf32, #tpu.memory_space<vmem>>) attributes {dimension_semantics = [#tpu.dimension_semantics<parallel>], iteration_bounds = array<i64: 2>, scalar_prefetch = 0 : i64, scratch_operands = 0 : i64, tpu.core_type = #tpu.core_type<tc>, window_params = [{transform_indices = @transform_0, window_bounds = array<i64: 8, 42, 32>}, {pipeline_mode = #tpu.pipeline_mode<synchronous>, transform_indices = @transform_1, window_bounds = array<i64: 96, 32>}, {pipeline_mode = #tpu.pipeline_mode<synchronous>, transform_indices = @transform_2, window_bounds = array<i64: 1, 32>}, {pipeline_mode = #tpu.pipeline_mode<synchronous>, transform_indices = @transform_3, window_bounds = array<i64: 96, 32>}, {pipeline_mode = #tpu.pipeline_mode<synchronous>, transform_indices = @transform_4, window_bounds = array<i64: 1, 32>}, {pipeline_mode = #tpu.pipeline_mode<synchronous>, transform_indices = @transform_5, window_bounds = array<i64: 32, 128>}, {pipeline_mode = #tpu.pipeline_mode<synchronous>, transform_indices = @transform_6, window_bounds = array<i64: 1, 128>}, {transform_indices = @transform_7, window_bounds = array<i64: 8, 128>}]} {
    %c0 = arith.constant 0 : index
    %c0_0 = arith.constant 0 : index
    %c0_1 = arith.constant 0 : index
    %0 = vector.load %arg1[%c0, %c0_0, %c0_1] : memref<8x42x32xf32, #tpu.memory_space<vmem>>, vector<8x42x32xf32>
    %1 = vector.extract_strided_slice %0 {offsets = [0, 0, 0], sizes = [8, 40, 32], strides = [1, 1, 1]} : vector<8x42x32xf32> to vector<8x40x32xf32>
    %2 = vector.extract_strided_slice %0 {offsets = [0, 1, 0], sizes = [8, 40, 32], strides = [1, 1, 1]} : vector<8x42x32xf32> to vector<8x40x32xf32>
    %3 = vector.extract_strided_slice %0 {offsets = [0, 2, 0], sizes = [8, 40, 32], strides = [1, 1, 1]} : vector<8x42x32xf32> to vector<8x40x32xf32>
    %4 = tpu.concatenate %1, %2, %3 in 2 : vector<8x40x32xf32>, vector<8x40x32xf32>, vector<8x40x32xf32> -> vector<8x40x96xf32>
    %5 = vector.shape_cast %4 : vector<8x40x96xf32> to vector<320x96xf32>
    %6 = arith.truncf %5 : vector<320x96xf32> to vector<320x96xbf16>
    %c0_2 = arith.constant 0 : index
    %c0_3 = arith.constant 0 : index
    %7 = vector.load %arg2[%c0_2, %c0_3] : memref<96x32xbf16, #tpu.memory_space<vmem>>, vector<96x32xbf16>
    %cst = arith.constant dense<0.000000e+00> : vector<320x32xf32>
    %8 = tpu.matmul %6, %7, %cst {dimension_numbers = #tpu.dot_dimension_numbers<[1], [0], [0], [1], [0, 0, 1, 1], [], []>} : vector<320x96xbf16>, vector<96x32xbf16>, vector<320x32xf32> -> vector<320x32xf32>
    %c0_4 = arith.constant 0 : index
    %c0_5 = arith.constant 0 : index
    %9 = vector.load %arg3[%c0_4, %c0_5] : memref<1x32xf32, #tpu.memory_space<vmem>>, vector<1x32xf32>
    %10 = vector.broadcast %9 : vector<1x32xf32> to vector<320x32xf32>
    %11 = arith.addf %8, %10 : vector<320x32xf32>
    %cst_6 = arith.constant 0.000000e+00 : f32
    %12 = vector.broadcast %cst_6 : f32 to vector<320x32xf32>
    %13 = arith.maximumf %11, %12 : vector<320x32xf32>
    %14 = vector.shape_cast %13 : vector<320x32xf32> to vector<8x40x32xf32>
    %15 = vector.extract_strided_slice %14 {offsets = [0, 0, 0], sizes = [8, 38, 32], strides = [1, 1, 1]} : vector<8x40x32xf32> to vector<8x38x32xf32>
    %16 = vector.extract_strided_slice %14 {offsets = [0, 1, 0], sizes = [8, 38, 32], strides = [1, 1, 1]} : vector<8x40x32xf32> to vector<8x38x32xf32>
    %17 = vector.extract_strided_slice %14 {offsets = [0, 2, 0], sizes = [8, 38, 32], strides = [1, 1, 1]} : vector<8x40x32xf32> to vector<8x38x32xf32>
    %18 = tpu.concatenate %15, %16, %17 in 2 : vector<8x38x32xf32>, vector<8x38x32xf32>, vector<8x38x32xf32> -> vector<8x38x96xf32>
    %19 = vector.shape_cast %18 : vector<8x38x96xf32> to vector<304x96xf32>
    %20 = arith.truncf %19 : vector<304x96xf32> to vector<304x96xbf16>
    %c0_7 = arith.constant 0 : index
    %c0_8 = arith.constant 0 : index
    %21 = vector.load %arg4[%c0_7, %c0_8] : memref<96x32xbf16, #tpu.memory_space<vmem>>, vector<96x32xbf16>
    %cst_9 = arith.constant dense<0.000000e+00> : vector<304x32xf32>
    %22 = tpu.matmul %20, %21, %cst_9 {dimension_numbers = #tpu.dot_dimension_numbers<[1], [0], [0], [1], [0, 0, 1, 1], [], []>} : vector<304x96xbf16>, vector<96x32xbf16>, vector<304x32xf32> -> vector<304x32xf32>
    %c0_10 = arith.constant 0 : index
    %c0_11 = arith.constant 0 : index
    %23 = vector.load %arg5[%c0_10, %c0_11] : memref<1x32xf32, #tpu.memory_space<vmem>>, vector<1x32xf32>
    %24 = vector.broadcast %23 : vector<1x32xf32> to vector<304x32xf32>
    %25 = arith.addf %22, %24 : vector<304x32xf32>
    %cst_12 = arith.constant 0.000000e+00 : f32
    %26 = vector.broadcast %cst_12 : f32 to vector<304x32xf32>
    %27 = arith.maximumf %25, %26 : vector<304x32xf32>
    %28 = vector.shape_cast %27 : vector<304x32xf32> to vector<8x38x32xf32>
    %cst_13 = arith.constant dense<0.000000e+00> : vector<8x32xf32>
    %29 = vector.multi_reduction <add>, %28, %cst_13 [1] : vector<8x38x32xf32> to vector<8x32xf32>
    %30 = arith.truncf %29 : vector<8x32xf32> to vector<8x32xbf16>
    %c0_14 = arith.constant 0 : index
    %c0_15 = arith.constant 0 : index
    %31 = vector.load %arg6[%c0_14, %c0_15] : memref<32x128xbf16, #tpu.memory_space<vmem>>, vector<32x128xbf16>
    %cst_16 = arith.constant dense<0.000000e+00> : vector<8x128xf32>
    %32 = tpu.matmul %30, %31, %cst_16 {dimension_numbers = #tpu.dot_dimension_numbers<[1], [0], [0], [1], [0, 0, 1, 1], [], []>} : vector<8x32xbf16>, vector<32x128xbf16>, vector<8x128xf32> -> vector<8x128xf32>
    %c0_17 = arith.constant 0 : index
    %c0_18 = arith.constant 0 : index
    %33 = vector.load %arg7[%c0_17, %c0_18] : memref<1x128xf32, #tpu.memory_space<vmem>>, vector<1x128xf32>
    %34 = vector.broadcast %33 : vector<1x128xf32> to vector<8x128xf32>
    %35 = arith.addf %32, %34 : vector<8x128xf32>
    %c0_19 = arith.constant 0 : index
    %c0_20 = arith.constant 0 : index
    %36 = vector.load %arg8[%c0_19, %c0_20] : memref<8x128xf32, #tpu.memory_space<vmem>>, vector<8x128xf32>
    tpu.vector_store %arg8[%c0_19, %c0_20], %35 {strides = array<i32>} : memref<8x128xf32, #tpu.memory_space<vmem>>, vector<8x128xf32>,
    return
  }
  func.func @transform_0(%arg0: i32) -> (i32, i32, i32) {
    %c0_i32 = arith.constant 0 : i32
    %c0_i32_0 = arith.constant 0 : i32
    %c0_i32_1 = arith.constant 0 : i32
    return %arg0, %c0_i32, %c0_i32_0 : i32, i32, i32
  }
  func.func @transform_1(%arg0: i32) -> (i32, i32) {
    %c0_i32 = arith.constant 0 : i32
    %c0_i32_0 = arith.constant 0 : i32
    %c0_i32_1 = arith.constant 0 : i32
    return %c0_i32, %c0_i32_0 : i32, i32
  }
  func.func @transform_2(%arg0: i32) -> (i32, i32) {
    %c0_i32 = arith.constant 0 : i32
    %c0_i32_0 = arith.constant 0 : i32
    %c0_i32_1 = arith.constant 0 : i32
    return %c0_i32, %c0_i32_0 : i32, i32
  }
  func.func @transform_3(%arg0: i32) -> (i32, i32) {
    %c0_i32 = arith.constant 0 : i32
    %c0_i32_0 = arith.constant 0 : i32
    %c0_i32_1 = arith.constant 0 : i32
    return %c0_i32, %c0_i32_0 : i32, i32
  }
  func.func @transform_4(%arg0: i32) -> (i32, i32) {
    %c0_i32 = arith.constant 0 : i32
    %c0_i32_0 = arith.constant 0 : i32
    %c0_i32_1 = arith.constant 0 : i32
    return %c0_i32, %c0_i32_0 : i32, i32
  }
  func.func @transform_5(%arg0: i32) -> (i32, i32) {
    %c0_i32 = arith.constant 0 : i32
    %c0_i32_0 = arith.constant 0 : i32
    %c0_i32_1 = arith.constant 0 : i32
    return %c0_i32, %c0_i32_0 : i32, i32
  }
  func.func @transform_6(%arg0: i32) -> (i32, i32) {
    %c0_i32 = arith.constant 0 : i32
    %c0_i32_0 = arith.constant 0 : i32
    %c0_i32_1 = arith.constant 0 : i32
    return %c0_i32, %c0_i32_0 : i32, i32
  }
  func.func @transform_7(%arg0: i32) -> (i32, i32) {
    %c0_i32 = arith.constant 0 : i32
    %c0_i32_0 = arith.constant 0 : i32
    return %arg0, %c0_i32 : i32, i32
  }
}

</mosaic_0001>

<bundles_post_ra>
// kernel: tpu_custom_call.1
= control target key start
LH: loop header
LB: loop body
LE: loop exit
PB: predicated region body
PF: predicated region fallthrough
CT: control target
= control target key end

     0   :  { %12 = vsyncpa [#allocation3], 0  ;;  %s7631_s0 = inlined_call_operand.vmem [shape: f32[16,42,32], index: 0, kind: input, shape index: {}]   ;;  %s7632_s1 = inlined_call_operand.vmem [shape: bf16[96,32], index: 1, kind: input, shape index: {}]   ;;  %s7633_s2 = inlined_call_operand.vmem [shape: f32[1,32], index: 2, kind: input, shape index: {}]   ;;  %s7634_s3 = inlined_call_operand.vmem [shape: bf16[96,32], index: 3, kind: input, shape index: {}]   ;;  %s7635_s4 = inlined_call_operand.vmem [shape: f32[1,32], index: 4, kind: input, shape index: {}]   ;;  %s7636_s5 = inlined_call_operand.vmem [shape: bf16[32,128], index: 5, kind: input, shape index: {}]   ;;  %s7637_s6 = inlined_call_operand.vmem [shape: f32[1,128], index: 6, kind: input, shape index: {}]   ;;  %s7638_s7 = inlined_call_operand.hbm [shape: f32[16,128], index: 7, kind: output, shape index: {}]  }
   0x1   :  { %14 = vsyncpa [#allocation3 + $0x1], 0  ;;  %s5850_s24 = smov 0   ;;  %s5852_s25 = smov 0  }
   0x2   :  { %s5854_s26 = smov 0   ;;  %s5856_s27 = smov 0  }
   0x3 LB: > { %s5871_s28 = sadd.s32 4294967295, %s5802_s27   ;;  %s5198_s29 = sadd.s32 4294967294, %s5802_s27   ;;  %s5802_s27 = sphi %s5856_s27, %s7665_s27   ;;  %s5798_s26 = sphi %s5854_s26, %s7664_s26   ;;  %s5794_s25 = sphi %s5852_s25, %s7663_s25   ;;  %s5790_s24 = sphi %s5850_s24, %s7662_s24  }
   0x4   : > { %s5875_s30 = sadd.s32 1, %s5802_s27   ;;  %s179_s8 = sadd.s32 1, %s5798_s26 }
   0x5   : > { %s176_s9 = ssub.s32 %s5802_s27, %s5875_s30  ;;  %p189_p0 = scmp.ne.s32.totalorder %s5798_s26, %s5794_s25 }
   0x6   : > { %p177_p1 = scmp.eq.s32.totalorder %s176_s9, 0  ;;  %p190_p2 = scmp.eq.s32.totalorder %s5871_s28, 1 }
   0x7   : > { %p195_p3 = scmp.ne.s32.totalorder %s5794_s25, %s5790_s24  ;;  %p196_p4 = scmp.eq.s32.totalorder %s5198_s29, 1 }
   0x8   : > { %s5886_s10 = scalar_select %p177_p1, %s5798_s26, %s179_s8  }
   0x9   : > { %p5888_p5 = por %p190_p2, %p189_p0  ;;  %p5892_p6 = por %p196_p4, %p195_p3 }
   0xa   : > { %p5201_p7 = scmp.ge.s32.totalorder %s5802_s27, 1  ;;  %p242_p8 = scmp.lt.s32.totalorder %s5802_s27, 3 }
   0xc   : > { %p243_p9 = pnand %p5201_p7, %p242_p8 }
   0xe   : > { %246 = sbr.rel (%p243_p9) target bundleno = 1159 (0x487), region = 48 }
  0x15   : > { %s5203_s13 = sshll.u32 %s5871_s28, 3  ;;  %v5725_v0 = vld [vmem:[%s7632_s1] sm:$0xff]   ;;  %v5726_v1 = vld [vmem:[%s7632_s1 + $0x8] sm:$0xff]   ;;  %v5727_v2 = vld [vmem:[%s7632_s1 + $0x10] sm:$0xff]   ;;  %vm379_vm0 = vcmask 1046528   ;;  %vm588_vm1 = vcmask 1045504  }
  0x16   : > { %p276_p10 = scmp.lt.s32.totalorder %s5203_s13, 15  ;;  %5320 = vmatprep.subr.bf16.mxu0 %v5725_v0  ;;  %v5728_v3 = vld [vmem:[%s7632_s1 + $0x18] sm:$0xff]   ;;  %v5729_v34 = vld [vmem:[%s7632_s1 + $0x20] sm:$0xff]   ;;  %s5804_s14 = smov 32   ;;  %v5730_v43 = vld [vmem:[%s7632_s1 + $0x28] sm:$0xff]   ;;  %vm797_vm2 = vcmask 261120  }
  0x17   : > { %5321 = vmatpush3.bf16.msra.mxu0 %v5725_v0  ;;  %s5805_s15 = smov 64   ;;  %vm838_vm3 = vcmask 523264   ;;  %vm954_vm4 = vcmask 785408   ;;  %vm5807_vm5 = vmmov 0   ;;  %vm4905_vm6 = vcmask 259072   ;;  %s272_s9 = sand.u32 1, %s5794_s25  }
  0x18   : > { %s7667_s13 = smov (!%p276_p10, %s5203_s13), 15  ;;  %5322 = vmatprep.subr.bf16.mxu0 %v5726_v1  ;;  %vm5054_vm7 = vcmask 1041409   ;;  %vm5056_vm8 = vcmask 1042434   ;;  %vm5058_vm9 = vcmask 1043459   ;;  %vm5060_vm10 = vcmask 1044484   ;;  %s5126_s22 = scalar_lea.sflag [#allocation3], %s272_s9 }
  0x19   : > { %s5480_s18 = smul.u32 48, %s7667_s13  ;;  %vm5062_vm11 = vcmask 1045509   ;;  %vm5064_vm12 = vcmask 1046534   ;;  %vm5066_vm13 = vcmask 1047559   ;;  %s5202_s13 = sshll.u32 %s272_s9, 3 }
  0x1a   : > { %s274_s19 = scalar_lea.vmem [#allocation2], %s5202_s13 }
  0x1b   : > { %s5911_s23 = scalar_lea.vmem %s7631_s0, %s5480_s18  ;;  %5323 = vmatpush3.bf16.msra.mxu0 %v5726_v1  ;;  %s5263_s18 = sshll.u32 %s5871_s28, 7 }
  0x1c   : > { %v5917_v4 = vld [vmem:[%s5911_s23] sm:$0xff]  ;;  %v5920_v5 = vld [vmem:[%s5911_s23 + $0x8] sm:$0xff]  ;;  %v5923_v6 = vld [vmem:[%s5911_s23 + $0x10] sm:$0xff]  ;;  %5324 = vmatprep.subr.bf16.mxu0 %v5727_v2  ;;  %s7589_s21 = scalar_lea.hbm %s7638_s7, %s5263_s18 }
  0x1d   : > { %v380_v7 = vrot.slane %v5917_v4, 1  ;;  %v381_v8 = vrot.slane %v5920_v5, 1  ;;  %v383_v9 = vrot.slane %v5923_v6, 1  ;;  %v589_v10 = vrot.slane %v5917_v4, 2  ;;  %v5930_v11 = vld [vmem:[%s5911_s23 + $0x18] sm:$0xff]  ;;  %v5933_v12 = vld [vmem:[%s5911_s23 + $0x20] sm:$0xff] }
  0x1e   : > { %v590_v13 = vrot.slane %v5920_v5, 2  ;;  %v592_v14 = vrot.slane %v5923_v6, 2  ;;  %v385_v15 = vrot.slane %v5930_v11, 1  ;;  %v387_v16 = vrot.slane %v5933_v12, 1  ;;  %v288_v21 = vld [vmem:[%s5911_s23 + $0x28] sm:$0x3] }
  0x1f   : > { %v382_v17 = vsel %vm379_vm0, %v380_v7, %v381_v8  ;;  %v384_v18 = vsel %vm379_vm0, %v381_v8, %v383_v9  ;;  %v594_v19 = vrot.slane %v5930_v11, 2  ;;  %v596_v20 = vrot.slane %v5933_v12, 2  ;;  %v5945_v22 = vld [vmem:[%s5911_s23 + $0x30] sm:$0xff]  ;;  %v5951_v27 = vld [vmem:[%s5911_s23 + $0x38] sm:$0xff]  ;;  %v5954_v28 = vld [vmem:[%s5911_s23 + $0x40] sm:$0xff]  ;;  %5325 = vmatpush3.bf16.msra.mxu0 %v5727_v2 }
  0x20   : > { %v5525_v23 = vpack.i.bf16 %v384_v18, %v382_v17  ;;  %v591_v24 = vsel %vm588_vm1, %v589_v10, %v590_v13  ;;  %v593_v25 = vsel %vm588_vm1, %v590_v13, %v592_v14  ;;  %v386_v26 = vsel %vm379_vm0, %v383_v9, %v385_v15  ;;  %v5957_v29 = vld [vmem:[%s5911_s23 + $0x48] sm:$0xff]  ;;  %5326 = vmatprep.subr.bf16.mxu0 %v5728_v3  ;;  %v5979_v48 = vld [vmem:[%s5911_s23 + $0x50] sm:$0xff]  ;;  %v294_v49 = vld [vmem:[%s5911_s23 + $0x58] sm:$0x3] }
  0x21   : > { %v5535_v30 = vpack.i.bf16 %v593_v25, %v591_v24  ;;  %v388_v31 = vsel %vm379_vm0, %v385_v15, %v387_v16  ;;  %v595_v32 = vsel %vm588_vm1, %v592_v14, %v594_v19  ;;  %v597_v33 = vsel %vm588_vm1, %v594_v19, %v596_v20  ;;  %v5986_v53 = vld [vmem:[%s5911_s23 + $0x60] sm:$0xff]  ;;  %v5989_v54 = vld [vmem:[%s5911_s23 + $0x68] sm:$0xff]  ;;  %v5992_v55 = vld [vmem:[%s5911_s23 + $0x70] sm:$0xff] }
  0x22   : > { %5526 = vrot.lane.b32.xlu0 %v5525_v23, %s5804_s14  ;;  %v5530_v35 = vpack.i.bf16 %v388_v31, %v386_v26  ;;  %v5540_v36 = vpack.i.bf16 %v597_v33, %v595_v32  ;;  %v389_v37 = vrot.slane %v288_v21, 1  ;;  %v391_v38 = vrot.slane %v5945_v22, 1  ;;  %v6010_v14 = vld [vmem:[%s5911_s23 + $0x78] sm:$0xff]  ;;  %v6013_v15 = vld [vmem:[%s5911_s23 + $0x80] sm:$0xff]  ;;  %v300_v18 = vld [vmem:[%s5911_s23 + $0x88] sm:$0x3] }
  0x23   : > { %5536 = vrot.lane.b32.xlu1 %v5535_v30, %s5805_s15  ;;  %v392_v39 = vrot.slane %v5951_v27, 1  ;;  %v394_v40 = vrot.slane %v5954_v28, 1  ;;  %v396_v41 = vrot.slane %v5957_v29, 1  ;;  %v598_v42 = vrot.slane %v288_v21, 2  ;;  %5327 = vmatpush3.bf16.msra.mxu0 %v5728_v3  ;;  %v6019_v19 = vld [vmem:[%s5911_s23 + $0x90] sm:$0xff] }
  0x24   : > { %v390_v44 = vsel %vm379_vm0, %v387_v16, %v389_v37  ;;  %v600_v45 = vrot.slane %v5945_v22, 2  ;;  %v601_v46 = vrot.slane %v5951_v27, 2  ;;  %v603_v47 = vrot.slane %v5954_v28, 2  ;;  %5328 = vmatprep.subr.bf16.mxu0 %v5729_v34 }
  0x25   : > { %v393_v50 = vsel %vm379_vm0, %v391_v38, %v392_v39  ;;  %v395_v51 = vsel %vm379_vm0, %v392_v39, %v394_v40  ;;  %v397_v52 = vsel %vm379_vm0, %v394_v40, %v396_v41  ;;  %v599_v58 = vsel %vm588_vm1, %v596_v20, %v598_v42  ;;  %v6022_v20 = vld [vmem:[%s5911_s23 + $0x98] sm:$0xff] }
  0x26   : > { %5531 = vrot.lane.b32.xlu0 %v5530_v35, %s5804_s14  ;;  %v5545_v56 = vpack.i.bf16 %v393_v50, %v390_v44  ;;  %v5550_v57 = vpack.i.bf16 %v397_v52, %v395_v51  ;;  %v602_v59 = vsel %vm588_vm1, %v600_v45, %v601_v46  ;;  %v605_v60 = vrot.slane %v5957_v29, 2  ;;  %v6043_v45 = vld [vmem:[%s5911_s23 + $0xa0] sm:$0xff] }
  0x27   : > { %5541 = vrot.lane.b32.xlu1 %v5540_v36, %s5805_s15  ;;  %v398_v61 = vrot.slane %v5979_v48, 1  ;;  %v400_v62 = vrot.slane %v294_v49, 1  ;;  %v604_v63 = vsel %vm588_vm1, %v601_v46, %v603_v47  ;;  %v402_v0 = vrot.slane %v5986_v53, 1  ;;  %5329 = vmatpush3.bf16.msra.mxu0 %v5729_v34  ;;  %v6046_v46 = vld [vmem:[%s5911_s23 + $0xa8] sm:$0xff] }
  0x28   : > { %v403_v1 = vrot.slane %v5989_v54, 1  ;;  %v405_v2 = vrot.slane %v5992_v55, 1  ;;  %v606_v3 = vsel %vm588_vm1, %v603_v47, %v605_v60  ;;  %v607_v7 = vrot.slane %v5979_v48, 2  ;;  %5330 = vmatprep.subr.bf16.mxu0 %v5730_v43 }
  0x29   : > { %v609_v8 = vrot.slane %v294_v49, 2  ;;  %v5555_v9 = vpack.i.bf16 %v602_v59, %v599_v58  ;;  %v399_v10 = vsel %vm379_vm0, %v396_v41, %v398_v61  ;;  %v401_v13 = vsel %vm379_vm0, %v398_v61, %v400_v62  ;;  %v306_v58 = vld [vmem:[%s5911_s23 + $0xb8] sm:$0x3] }
  0x2a   : > { %5546 = vrot.lane.b32.xlu0 %v5545_v56, %s5804_s14  ;;  %v5560_v16 = vpack.i.bf16 %v606_v3, %v604_v63  ;;  %v404_v17 = vsel %vm379_vm0, %v402_v0, %v403_v1  ;;  %v406_v21 = vsel %vm379_vm0, %v403_v1, %v405_v2  ;;  %v611_v23 = vrot.slane %v5986_v53, 2 }
  0x2b   : > { %5551 = vrot.lane.b32.xlu1 %v5550_v57, %s5804_s14  ;;  %v612_v24 = vrot.slane %v5989_v54, 2  ;;  %v614_v25 = vrot.slane %v5992_v55, 2  ;;  %5331 = vmatpush3.bf16.msra.mxu0 %v5730_v43  ;;  %v5565_v26 = vpack.i.bf16 %v401_v13, %v399_v10  ;;  %v608_v30 = vsel %vm588_vm1, %v605_v60, %v607_v7  ;;  %v6055_v57 = vld [vmem:[%s5911_s23 + $0xb0] sm:$0xff]  ;;  %v6071_v13 = vld [vmem:[%s5911_s23 + $0xc0] sm:$0xff] }
  0x2c   : > { %v610_v31 = vsel %vm588_vm1, %v607_v7, %v609_v8  ;;  %v407_v32 = vrot.slane %v6010_v14, 1  ;;  %v409_v33 = vrot.slane %v6013_v15, 1  ;;  %v411_v34 = vrot.slane %v300_v18, 1 }
  0x2d   : > { %v413_v35 = vrot.slane %v6019_v19, 1  ;;  %v414_v36 = vrot.slane %v6022_v20, 1  ;;  %v5570_v37 = vpack.i.bf16 %v406_v21, %v404_v17  ;;  %v613_v38 = vsel %vm588_vm1, %v611_v23, %v612_v24  ;;  %v6080_v23 = vld [vmem:[%s5911_s23 + $0xd0] sm:$0xff] }
  0x2e   : > { %5556 = vrot.lane.b32.xlu0 %v5555_v9, %s5805_s15  ;;  %v615_v39 = vsel %vm588_vm1, %v612_v24, %v614_v25  ;;  %v5575_v40 = vpack.i.bf16 %v610_v31, %v608_v30  ;;  %v408_v41 = vsel %vm379_vm0, %v405_v2, %v407_v32  ;;  %v616_v42 = vrot.slane %v6010_v14, 2  ;;  %v6086_v31 = vld [vmem:[%s5911_s23 + $0xd8] sm:$0xff] }
  0x2f   : > { %5561 = vrot.lane.b32.xlu1 %v5560_v16, %s5805_s15  ;;  %v618_v43 = vrot.slane %v6013_v15, 2  ;;  %v620_v44 = vrot.slane %v300_v18, 2  ;;  %v5580_v47 = vpack.i.bf16 %v615_v39, %v613_v38  ;;  %v410_v49 = vsel %vm379_vm0, %v407_v32, %v409_v33  ;;  %v6074_v16 = vld [vmem:[%s5911_s23 + $0xc8] sm:$0xff]  ;;  %v6089_v32 = vld [vmem:[%s5911_s23 + $0xe0] sm:$0xff] }
  0x30   : > { %v412_v50 = vsel %vm379_vm0, %v409_v33, %v411_v34  ;;  %v415_v51 = vsel %vm379_vm0, %v413_v35, %v414_v36  ;;  %v622_v52 = vrot.slane %v6019_v19, 2  ;;  %v623_v56 = vrot.slane %v6022_v20, 2 }
  0x31   : > { %v5585_v59 = vpack.i.bf16 %v410_v49, %v408_v41  ;;  %v5590_v60 = vpack.i.bf16 %v415_v51, %v412_v50  ;;  %v617_v61 = vsel %vm588_vm1, %v614_v25, %v616_v42  ;;  %v619_v62 = vsel %vm588_vm1, %v616_v42, %v618_v43 }
  0x32   : > { %5566 = vrot.lane.b32.xlu0 %v5565_v26, %s5804_s14  ;;  %v416_v63 = vrot.slane %v6043_v45, 1  ;;  %v418_v0 = vrot.slane %v6046_v46, 1  ;;  %v621_v1 = vsel %vm588_vm1, %v618_v43, %v620_v44  ;;  %v624_v2 = vsel %vm588_vm1, %v622_v52, %v623_v56 }
  0x33   : > { %5571 = vrot.lane.b32.xlu1 %v5570_v37, %s5804_s14  ;;  %v420_v3 = vrot.slane %v6055_v57, 1  ;;  %v422_v7 = vrot.slane %v306_v58, 1  ;;  %v5595_v8 = vpack.i.bf16 %v619_v62, %v617_v61  ;;  %v625_v9 = vrot.slane %v6043_v45, 2  ;;  %v6113_v61 = vld [vmem:[%s5911_s23 + $0xf0] sm:$0xff] }
  0x34   : > { %v627_v10 = vrot.slane %v6046_v46, 2  ;;  %v5600_v17 = vpack.i.bf16 %v624_v2, %v621_v1  ;;  %v417_v18 = vsel %vm379_vm0, %v414_v36, %v416_v63  ;;  %v419_v21 = vsel %vm379_vm0, %v416_v63, %v418_v0  ;;  %v6121_v1 = vld [vmem:[%s5911_s23 + $0x100] sm:$0xff]  ;;  %v6124_v2 = vld [vmem:[%s5911_s23 + $0x108] sm:$0xff] }
  0x35   : > { %v421_v24 = vsel %vm379_vm0, %v418_v0, %v420_v3  ;;  %v423_v25 = vsel %vm379_vm0, %v420_v3, %v422_v7  ;;  %v629_v26 = vrot.slane %v6055_v57, 2  ;;  %v631_v30 = vrot.slane %v306_v58, 2  ;;  %v6118_v0 = vld [vmem:[%s5911_s23 + $0xf8] sm:$0xff] }
  0x36   : > { %5576 = vrot.lane.b32.xlu0 %v5575_v40, %s5805_s15  ;;  %v424_v33 = vrot.slane %v6071_v13, 1  ;;  %v425_v34 = vrot.slane %v6074_v16, 1  ;;  %v5605_v35 = vpack.i.bf16 %v419_v21, %v417_v18  ;;  %v626_v36 = vsel %vm588_vm1, %v623_v56, %v625_v9 }
  0x37   : > { %5581 = vrot.lane.b32.xlu1 %v5580_v47, %s5805_s15  ;;  %v628_v37 = vsel %vm588_vm1, %v625_v9, %v627_v10  ;;  %v427_v38 = vrot.slane %v6080_v23, 1  ;;  %v5610_v39 = vpack.i.bf16 %v423_v25, %v421_v24  ;;  %v429_v40 = vrot.slane %v6086_v31, 1 }
  0x38   : > { %v431_v41 = vrot.slane %v6089_v32, 1  ;;  %v630_v42 = vsel %vm588_vm1, %v627_v10, %v629_v26  ;;  %v632_v43 = vsel %vm588_vm1, %v629_v26, %v631_v30  ;;  %v5615_v44 = vpack.i.bf16 %v628_v37, %v626_v36 }
  0x39   : > { %v426_v47 = vsel %vm379_vm0, %v424_v33, %v425_v34  ;;  %v428_v49 = vsel %vm379_vm0, %v425_v34, %v427_v38  ;;  %v633_v50 = vrot.slane %v6071_v13, 2  ;;  %v634_v51 = vrot.slane %v6074_v16, 2 }
  0x3a   : > { %5586 = vrot.lane.b32.xlu0 %v5585_v59, %s5804_s14  ;;  %v636_v52 = vrot.slane %v6080_v23, 2  ;;  %v5620_v56 = vpack.i.bf16 %v632_v43, %v630_v42  ;;  %v430_v58 = vsel %vm379_vm0, %v427_v38, %v429_v40  ;;  %v432_v59 = vsel %vm379_vm0, %v429_v40, %v431_v41  ;;  %v6145_v42 = vld [vmem:[%s5911_s23 + $0x110] sm:$0xff] }
  0x3b   : > { %5591 = vrot.lane.b32.xlu1 %v5590_v60, %s5804_s14  ;;  %v312_v60 = vld [vmem:[%s5911_s23 + $0xe8] sm:$0x3]  ;;  %v638_v62 = vrot.slane %v6086_v31, 2  ;;  %v640_v63 = vrot.slane %v6089_v32, 2  ;;  %v5625_v3 = vpack.i.bf16 %v428_v49, %v426_v47  ;;  %v5630_v7 = vpack.i.bf16 %v432_v59, %v430_v58  ;;  %v6151_v47 = vld [vmem:[%s5911_s23 + $0x120] sm:$0xff] }
  0x3c   : > { %v637_v9 = vsel %vm588_vm1, %v634_v51, %v636_v52  ;;  %v433_v10 = vrot.slane %v312_v60, 1  ;;  %v436_v18 = vrot.slane %v6118_v0, 1  ;;  %v438_v21 = vrot.slane %v6121_v1, 1  ;;  %v6154_v49 = vld [vmem:[%s5911_s23 + $0x128] sm:$0xff] }
  0x3d   : > { %v440_v24 = vrot.slane %v6124_v2, 1  ;;  %v639_v25 = vsel %vm588_vm1, %v636_v52, %v638_v62  ;;  %v641_v26 = vsel %vm588_vm1, %v638_v62, %v640_v63  ;;  %v642_v34 = vrot.slane %v312_v60, 2 }
  0x3e   : > { %5596 = vrot.lane.b32.xlu0 %v5595_v8, %s5805_s15  ;;  %v635_v8 = vsel %vm588_vm1, %v633_v50, %v634_v51  ;;  %v434_v33 = vsel %vm379_vm0, %v431_v41, %v433_v10  ;;  %v645_v36 = vrot.slane %v6118_v0, 2  ;;  %v5640_v37 = vpack.i.bf16 %v641_v26, %v639_v25  ;;  %v6157_v50 = vld [vmem:[%s5911_s23 + $0x130] sm:$0xff] }
  0x3f   : > { %5601 = vrot.lane.b32.xlu1 %v5600_v17, %s5805_s15  ;;  %v435_v17 = vrot.slane %v6113_v61, 1  ;;  %v5635_v30 = vpack.i.bf16 %v637_v9, %v635_v8  ;;  %v441_v40 = vsel %vm379_vm0, %v438_v21, %v440_v24  ;;  %v647_v43 = vrot.slane %v6121_v1, 2 }
  0x40   : > { %v649_v41 = vrot.slane %v6124_v2, 2  ;;  %v442_v59 = vrot.slane %v6145_v42, 1  ;;  %v446_v62 = vrot.slane %v6151_v47, 1  ;;  %v449_v9 = vrot.slane %v6157_v50, 1 }
  0x41   : > { %v437_v38 = vsel %vm379_vm0, %v435_v17, %v436_v18  ;;  %v651_v10 = vrot.slane %v6145_v42, 2 }
  0x42   : > { %5606 = vrot.lane.b32.xlu0 %v5605_v35, %s5804_s14  ;;  %v644_v35 = vrot.slane %v6113_v61, 2  ;;  %v5645_v51 = vpack.i.bf16 %v437_v38, %v434_v33  ;;  %v650_v8 = vsel %vm588_vm1, %v647_v43, %v649_v41  ;;  %v324_v38 = vld [vmem:[%s5911_s23 + $0x148] sm:$0x3] }
  0x43   : > { %5611 = vrot.lane.b32.xlu1 %v5610_v39, %s5804_s14  ;;  %v439_v39 = vsel %vm379_vm0, %v436_v18, %v438_v21  ;;  %v443_v21 = vsel %vm379_vm0, %v440_v24, %v442_v59  ;;  %v6190_v24 = vld [vmem:[%s5911_s23 + $0x158] sm:$0xff] }
  0x44   : > { %v5650_v52 = vpack.i.bf16 %v441_v40, %v439_v39  ;;  %v646_v58 = vsel %vm588_vm1, %v644_v35, %v645_v36  ;;  %v656_v35 = vrot.slane %v6154_v49, 2  ;;  %v6187_v39 = vld [vmem:[%s5911_s23 + $0x150] sm:$0xff] }
  0x46   : > { %5616 = vrot.lane.b32.xlu0 %v5615_v44, %s5805_s15  ;;  %v318_v44 = vld [vmem:[%s5911_s23 + $0x118] sm:$0x3] }
  0x47   : > { %5621 = vrot.lane.b32.xlu1 %v5620_v56, %s5805_s15  ;;  %v643_v56 = vsel %vm588_vm1, %v640_v63, %v642_v34  ;;  %v444_v60 = vrot.slane %v318_v44, 1  ;;  %v653_v17 = vrot.slane %v318_v44, 2  ;;  %v655_v34 = vrot.slane %v6151_v47, 2 }
  0x48   : > { %v5655_v63 = vpack.i.bf16 %v646_v58, %v643_v56  ;;  %v455_v58 = vrot.slane %v324_v38, 1 }
  0x49   : > { %v445_v25 = vsel %vm379_vm0, %v442_v59, %v444_v60  ;;  %v654_v44 = vsel %vm588_vm1, %v651_v10, %v653_v17  ;;  %v657_v59 = vsel %vm588_vm1, %v655_v34, %v656_v35  ;;  %v6213_v34 = vld [vmem:[%s5911_s23 + $0x160] sm:$0xff] }
  0x4a   : > { %5626 = vrot.lane.b32.xlu0 %v5625_v3, %s5804_s14  ;;  %v447_v3 = vrot.slane %v6154_v49, 1  ;;  %v5665_v40 = vpack.i.bf16 %v445_v25, %v443_v21  ;;  %v664_v25 = vrot.slane %v324_v38, 2 }
  0x4b   : > { %5631 = vrot.lane.b32.xlu1 %v5630_v7, %s5804_s14  ;;  %v648_v7 = vsel %vm588_vm1, %v645_v36, %v647_v43  ;;  %v658_v36 = vrot.slane %v6157_v50, 2  ;;  %v652_v43 = vsel %vm588_vm1, %v649_v41, %v651_v10  ;;  %v458_v41 = vrot.slane %v6190_v24, 1 }
  0x4c   : > { %v5660_v18 = vpack.i.bf16 %v650_v8, %v648_v7  ;;  %v448_v26 = vsel %vm379_vm0, %v446_v62, %v447_v3  ;;  %v450_v33 = vsel %vm379_vm0, %v447_v3, %v449_v9  ;;  %v457_v62 = vrot.slane %v6187_v39, 1 }
  0x4d   : > { %v659_v60 = vsel %vm588_vm1, %v656_v35, %v658_v36  ;;  %v5675_v3 = vpack.i.bf16 %v654_v44, %v652_v43  ;;  %v6216_v35 = vld [vmem:[%s5911_s23 + $0x168] sm:$0xff]  ;;  %v330_v43 = vld [vmem:[%s5911_s23 + $0x178] sm:$0x3] }
  0x4e   : > { %5636 = vrot.lane.b32.xlu0 %v5635_v30, %s5805_s15  ;;  %v6176_v30 = vld [vmem:[%s5911_s23 + $0x138] sm:$0xff]  ;;  %v459_v21 = vsel %vm379_vm0, %v457_v62, %v458_v41  ;;  %v466_v62 = vrot.slane %v330_v43, 1 }
  0x4f   : > { %5641 = vrot.lane.b32.xlu1 %v5640_v37, %s5805_s15  ;;  %v6183_v37 = vld [vmem:[%s5911_s23 + $0x140] sm:$0xff]  ;;  %v660_v7 = vrot.slane %v6176_v30, 2 }
  0x50   : > { %v453_v56 = vrot.slane %v6183_v37, 1  ;;  %v662_v8 = vrot.slane %v6183_v37, 2 }
  0x51   : > { %v661_v44 = vsel %vm588_vm1, %v658_v36, %v660_v7  ;;  %v669_v36 = vrot.slane %v6213_v34, 2 }
  0x52   : > { %5646 = vrot.lane.b32.xlu0 %v5645_v51, %s5804_s14  ;;  %v5670_v51 = vpack.i.bf16 %v450_v33, %v448_v26  ;;  %v666_v26 = vrot.slane %v6187_v39, 2  ;;  %v667_v33 = vrot.slane %v6190_v24, 2  ;;  %v663_v38 = vsel %vm588_vm1, %v660_v7, %v662_v8 }
  0x53   : > { %5651 = vrot.lane.b32.xlu1 %v5650_v52, %s5804_s14  ;;  %v451_v52 = vrot.slane %v6176_v30, 1 }
  0x55   : > { %v452_v10 = vsel %vm379_vm0, %v449_v9, %v451_v52  ;;  %v454_v17 = vsel %vm379_vm0, %v451_v52, %v453_v56  ;;  %v460_v52 = vrot.slane %v6213_v34, 1 }
  0x56   : > { %5656 = vrot.lane.b32.xlu0 %v5655_v63, %s5805_s15  ;;  %v5680_v63 = vpack.i.bf16 %v659_v60, %v657_v59  ;;  %v5685_v9 = vpack.i.bf16 %v454_v17, %v452_v10  ;;  %v668_v59 = vsel %vm588_vm1, %v666_v26, %v667_v33  ;;  %v671_v17 = vrot.slane %v6216_v35, 2 }
  0x57   : > { %5661 = vrot.lane.b32.xlu1 %v5660_v18, %s5805_s15  ;;  %v456_v18 = vsel %vm379_vm0, %v453_v56, %v455_v58  ;;  %v462_v56 = vrot.slane %v6216_v35, 1  ;;  %v665_v58 = vsel %vm588_vm1, %v662_v8, %v664_v25  ;;  %v461_v7 = vsel %vm379_vm0, %v458_v41, %v460_v52 }
  0x58   : > { %v675_v25 = vrot.slane %v330_v43, 2  ;;  %v672_v41 = vsel %vm588_vm1, %v669_v36, %v671_v17 }
  0x59   : > { %v463_v10 = vsel %vm379_vm0, %v460_v52, %v462_v56 }
  0x5a   : > { %5666 = vrot.lane.b32.xlu0 %v5665_v40, %s5804_s14  ;;  %v6219_v40 = vld [vmem:[%s5911_s23 + $0x170] sm:$0xff]  ;;  %v5705_v26 = vpack.i.bf16 %v463_v10, %v461_v7  ;;  %s5809_s23 = smov [#allocation2]  }
  0x5b   : > { %5671 = vrot.lane.b32.xlu1 %v5670_v51, %s5804_s14  ;;  %v5690_v51 = vpack.i.bf16 %v459_v21, %v456_v18  ;;  %v464_v60 = vrot.slane %v6219_v40, 1  ;;  %v673_v21 = vrot.slane %v6219_v40, 2  ;;  %s5744_s29 = sshll.u32 %s5809_s23, 4  ;;  %s5745_s29 = int_to_ptr.vmem [resolvable:$false] %s5744_s29 }
  0x5c   : > { %s5746_s8 = scalar_lea.vmem %s5745_s29, 256 }
  0x5d   : > { %v465_v8 = vsel %vm379_vm0, %v462_v56, %v464_v60  ;;  %v467_v18 = vsel %vm379_vm0, %v464_v60, %v466_v62 }
  0x5e   : > { %5676 = vrot.lane.b32.xlu0 %v5675_v3, %s5805_s15  ;;  %v5695_v3 = vpack.i.bf16 %v663_v38, %v661_v44  ;;  %v670_v44 = vsel %vm588_vm1, %v667_v33, %v669_v36  ;;  %v676_v38 = vsel %vm588_vm1, %v673_v21, %v675_v25 }
  0x5f   : > { %5681 = vrot.lane.b32.xlu1 %v5680_v63, %s5805_s15  ;;  %v5700_v63 = vpack.i.bf16 %v668_v59, %v665_v58  ;;  %v5715_v52 = vpack.i.bf16 %v672_v41, %v670_v44 }
  0x62   : > { %5686 = vrot.lane.b32.xlu0 %v5685_v9, %s5804_s14  ;;  %v5710_v9 = vpack.i.bf16 %v467_v18, %v465_v8 }
  0x63   : > { %5691 = vrot.lane.b32.xlu1 %v5690_v51, %s5804_s14  ;;  %v674_v51 = vsel %vm588_vm1, %v671_v17, %v673_v21 }
  0x64   : > { %v5720_v43 = vpack.i.bf16 %v676_v38, %v674_v51 }
  0x66   : > { %5696 = vrot.lane.b32.xlu0 %v5695_v3, %s5805_s15 }
  0x67   : > { %5701 = vrot.lane.b32.xlu1 %v5700_v63, %s5805_s15 }
  0x6a   : > { %5706 = vrot.lane.b32.xlu0 %v5705_v26, %s5804_s14 }
  0x6b   : > { %5711 = vrot.lane.b32.xlu1 %v5710_v9, %s5804_s14 }
  0x6e   : > { %5716 = vrot.lane.b32.xlu0 %v5715_v52, %s5805_s15 }
  0x6f   : > { %5721 = vrot.lane.b32.xlu1 %v5720_v43, %s5805_s15 }
  0x94   : > { %v5527_v56 = vpop.permute.xlu0 %5526 }
  0x95   : > { %v5529_v58 = vunpack.i.h.bf16 %v5527_v56  ;;  %v5528_v33 = vunpack.i.l.bf16 %v5527_v56  ;;  %v5537_v59 = vpop.permute.xlu1 %5536 }
  0x96   : > { %v5539_v60 = vunpack.i.h.bf16 %v5537_v59  ;;  %v5538_v62 = vunpack.i.l.bf16 %v5537_v59 }
  0x97   : > { %v798_v3 = vsel %vm797_vm2, %v5917_v4, %v5528_v33  ;;  %v799_v36 = vsel %vm797_vm2, %v5920_v5, %v5529_v58 }
  0x98   : > { %v5532_v63 = vpop.permute.xlu0 %5531  ;;  %v839_v7 = vsel %vm838_vm3, %v798_v3, %v5538_v62  ;;  %v840_v10 = vsel %vm838_vm3, %v799_v36, %v5539_v60 }
  0x99   : > { %v5534_v17 = vunpack.i.h.bf16 %v5532_v63  ;;  %v5533_v8 = vunpack.i.l.bf16 %v5532_v63  ;;  %v5542_v18 = vpop.permute.xlu1 %5541  ;;  %v879_v21 = vpack.c.bf16 %v840_v10, %v839_v7 }
  0x9a   : > { %v5544_v25 = vunpack.i.h.bf16 %v5542_v18  ;;  %v5543_v26 = vunpack.i.l.bf16 %v5542_v18 }
  0x9b   : > { %v801_v9 = vsel %vm797_vm2, %v5930_v11, %v5534_v17  ;;  %v800_v4 = vsel %vm797_vm2, %v5923_v6, %v5533_v8  ;;  %5332 = vmatprep.mubr.msk.bf16.mxu0 %vm954_vm4, %v879_v21 }
  0x9c   : > { %v841_v5 = vsel %vm838_vm3, %v800_v4, %v5543_v26  ;;  %v842_v44 = vsel %vm838_vm3, %v801_v9, %v5544_v25  ;;  %v5547_v41 = vpop.permute.xlu0 %5546 }
  0x9d   : > { %v5549_v51 = vunpack.i.h.bf16 %v5547_v41  ;;  %v5548_v38 = vunpack.i.l.bf16 %v5547_v41  ;;  %v5552_v52 = vpop.permute.xlu1 %5551  ;;  %v880_v43 = vpack.c.bf16 %v842_v44, %v841_v5 }
  0x9e   : > { %v5554_v56 = vunpack.i.h.bf16 %v5552_v52  ;;  %v5553_v58 = vunpack.i.l.bf16 %v5552_v52 }
  0x9f   : > { %5333 = vmatmul.mubr.msk.bf16.vlgmr.msra.gmra.mrb[0].mxu0 %vm954_vm4, %v880_v43  ;;  %v803_v11 = vsel %vm797_vm2, %v5945_v22, %v5549_v51  ;;  %v802_v6 = vsel %vm797_vm2, %v5933_v12, %v5548_v38 }
  0xa0   : > { %v5557_v33 = vpop.permute.xlu0 %5556  ;;  %v805_v59 = vsel %vm797_vm2, %v5954_v28, %v5554_v56  ;;  %v804_v60 = vsel %vm797_vm2, %v5951_v27, %v5553_v58 }
  0xa1   : > { %v5559_v62 = vunpack.i.h.bf16 %v5557_v33  ;;  %v5558_v3 = vunpack.i.l.bf16 %v5557_v33  ;;  %v5562_v36 = vpop.permute.xlu1 %5561 }
  0xa2   : > { %v5564_v63 = vunpack.i.h.bf16 %v5562_v36  ;;  %v5563_v7 = vunpack.i.l.bf16 %v5562_v36 }
  0xa3   : > { %v843_v10 = vsel %vm838_vm3, %v802_v6, %v5558_v3  ;;  %v844_v17 = vsel %vm838_vm3, %v803_v11, %v5559_v62 }
  0xa4   : > { %v845_v22 = vsel %vm838_vm3, %v804_v60, %v5563_v7  ;;  %v846_v12 = vsel %vm838_vm3, %v805_v59, %v5564_v63  ;;  %v5567_v8 = vpop.permute.xlu0 %5566  ;;  %v881_v18 = vpack.c.bf16 %v844_v17, %v843_v10 }
  0xa5   : > { %v5569_v21 = vunpack.i.h.bf16 %v5567_v8  ;;  %v5568_v28 = vunpack.i.l.bf16 %v5567_v8  ;;  %v5572_v25 = vpop.permute.xlu1 %5571  ;;  %v882_v26 = vpack.c.bf16 %v846_v12, %v845_v22 }
  0xa6   : > { %v5574_v27 = vunpack.i.h.bf16 %v5572_v25  ;;  %v5573_v9 = vunpack.i.l.bf16 %v5572_v25  ;;  %5336 = vmatprep.mubr.msk.bf16.mxu0 %vm954_vm4, %v881_v18 }
  0xa7   : > { %5337 = vmatmul.mubr.msk.bf16.gmra.mrb[4].mxu0 %vm954_vm4, %v882_v26  ;;  %v807_v4 = vsel %vm797_vm2, %v5979_v48, %v5569_v21  ;;  %v806_v5 = vsel %vm797_vm2, %v5957_v29, %v5568_v28 }
  0xa8   : > { %v5577_v44 = vpop.permute.xlu0 %5576  ;;  %v809_v41 = vsel %vm797_vm2, %v5989_v54, %v5574_v27  ;;  %v808_v51 = vsel %vm797_vm2, %v5986_v53, %v5573_v9 }
  0xa9   : > { %v5579_v38 = vunpack.i.h.bf16 %v5577_v44  ;;  %v5578_v52 = vunpack.i.l.bf16 %v5577_v44  ;;  %v5582_v43 = vpop.permute.xlu1 %5581 }
  0xaa   : > { %v5584_v56 = vunpack.i.h.bf16 %v5582_v43  ;;  %v5583_v58 = vunpack.i.l.bf16 %v5582_v43 }
  0xab   : > { %v847_v11 = vsel %vm838_vm3, %v806_v5, %v5578_v52  ;;  %v848_v6 = vsel %vm838_vm3, %v807_v4, %v5579_v38 }
  0xac   : > { %v849_v48 = vsel %vm838_vm3, %v808_v51, %v5583_v58  ;;  %v850_v29 = vsel %vm838_vm3, %v809_v41, %v5584_v56  ;;  %v5587_v33 = vpop.permute.xlu0 %5586  ;;  %v883_v59 = vpack.c.bf16 %v848_v6, %v847_v11 }
  0xad   : > { %v5589_v60 = vunpack.i.h.bf16 %v5587_v33  ;;  %v5588_v54 = vunpack.i.l.bf16 %v5587_v33  ;;  %v5592_v62 = vpop.permute.xlu1 %5591  ;;  %v884_v3 = vpack.c.bf16 %v850_v29, %v849_v48 }
  0xae   : > { %v5594_v53 = vunpack.i.h.bf16 %v5592_v62  ;;  %v5593_v36 = vunpack.i.l.bf16 %v5592_v62  ;;  %5340 = vmatprep.mubr.msk.bf16.mxu0 %vm954_vm4, %v883_v59 }
  0xaf   : > { %5341 = vmatmul.mubr.msk.bf16.gmra.mrb[8].mxu0 %vm954_vm4, %v884_v3  ;;  %v811_v63 = vsel %vm797_vm2, %v6010_v14, %v5589_v60  ;;  %v810_v7 = vsel %vm797_vm2, %v5992_v55, %v5588_v54 }
  0xb0   : > { %v5597_v10 = vpop.permute.xlu0 %5596  ;;  %v813_v17 = vsel %vm797_vm2, %v6019_v19, %v5594_v53  ;;  %v812_v22 = vsel %vm797_vm2, %v6013_v15, %v5593_v36 }
  0xb1   : > { %v5599_v12 = vunpack.i.h.bf16 %v5597_v10  ;;  %v5598_v8 = vunpack.i.l.bf16 %v5597_v10  ;;  %v5602_v18 = vpop.permute.xlu1 %5601 }
  0xb2   : > { %v5604_v21 = vunpack.i.h.bf16 %v5602_v18  ;;  %v5603_v28 = vunpack.i.l.bf16 %v5602_v18 }
  0xb3   : > { %v851_v25 = vsel %vm838_vm3, %v810_v7, %v5598_v8  ;;  %v852_v26 = vsel %vm838_vm3, %v811_v63, %v5599_v12 }
  0xb4   : > { %v853_v14 = vsel %vm838_vm3, %v812_v22, %v5603_v28  ;;  %v854_v55 = vsel %vm838_vm3, %v813_v17, %v5604_v21  ;;  %v885_v27 = vpack.c.bf16 %v852_v26, %v851_v25  ;;  %v5607_v9 = vpop.permute.xlu0 %5606 }
  0xb5   : > { %v5609_v4 = vunpack.i.h.bf16 %v5607_v9  ;;  %v5608_v19 = vunpack.i.l.bf16 %v5607_v9  ;;  %v886_v5 = vpack.c.bf16 %v854_v55, %v853_v14  ;;  %v5612_v44 = vpop.permute.xlu1 %5611 }
  0xb6   : > { %5344 = vmatprep.mubr.msk.bf16.mxu0 %vm954_vm4, %v885_v27  ;;  %v5614_v15 = vunpack.i.h.bf16 %v5612_v44  ;;  %v5613_v41 = vunpack.i.l.bf16 %v5612_v44 }
  0xb7   : > { %5345 = vmatmul.mubr.msk.bf16.gmra.mrb[12].mxu0 %vm954_vm4, %v886_v5  ;;  %v815_v51 = vsel %vm797_vm2, %v6043_v45, %v5609_v4  ;;  %v814_v38 = vsel %vm797_vm2, %v6022_v20, %v5608_v19 }
  0xb8   : > { %v5617_v52 = vpop.permute.xlu0 %5616  ;;  %v817_v43 = vsel %vm797_vm2, %v6055_v57, %v5614_v15  ;;  %v816_v56 = vsel %vm797_vm2, %v6046_v46, %v5613_v41 }
  0xb9   : > { %v5619_v58 = vunpack.i.h.bf16 %v5617_v52  ;;  %v5618_v11 = vunpack.i.l.bf16 %v5617_v52  ;;  %v5622_v6 = vpop.permute.xlu1 %5621 }
  0xba   : > { %v5624_v48 = vunpack.i.h.bf16 %v5622_v6  ;;  %v5623_v29 = vunpack.i.l.bf16 %v5622_v6 }
  0xbb   : > { %v855_v33 = vsel %vm838_vm3, %v814_v38, %v5618_v11  ;;  %v856_v59 = vsel %vm838_vm3, %v815_v51, %v5619_v58 }
  0xbc   : > { %v857_v45 = vsel %vm838_vm3, %v816_v56, %v5623_v29  ;;  %v858_v20 = vsel %vm838_vm3, %v817_v43, %v5624_v48  ;;  %v887_v60 = vpack.c.bf16 %v856_v59, %v855_v33  ;;  %v5627_v54 = vpop.permute.xlu0 %5626 }
  0xbd   : > { %v888_v62 = vpack.c.bf16 %v858_v20, %v857_v45  ;;  %v5629_v57 = vunpack.i.h.bf16 %v5627_v54  ;;  %v5628_v3 = vunpack.i.l.bf16 %v5627_v54  ;;  %v5632_v53 = vpop.permute.xlu1 %5631 }
  0xbe   : > { %5348 = vmatprep.mubr.msk.bf16.mxu0 %vm954_vm4, %v887_v60  ;;  %v5634_v46 = vunpack.i.h.bf16 %v5632_v53  ;;  %v5633_v36 = vunpack.i.l.bf16 %v5632_v53 }
  0xbf   : > { %5349 = vmatmul.mubr.msk.bf16.gmra.mrb[16].mxu0 %vm954_vm4, %v888_v62  ;;  %v819_v63 = vsel %vm797_vm2, %v6074_v16, %v5629_v57  ;;  %v818_v7 = vsel %vm797_vm2, %v6071_v13, %v5628_v3 }
  0xc0   : > { %v5637_v10 = vpop.permute.xlu0 %5636  ;;  %v821_v17 = vsel %vm797_vm2, %v6086_v31, %v5634_v46  ;;  %v820_v22 = vsel %vm797_vm2, %v6080_v23, %v5633_v36 }
  0xc1   : > { %v5639_v12 = vunpack.i.h.bf16 %v5637_v10  ;;  %v5638_v8 = vunpack.i.l.bf16 %v5637_v10  ;;  %v5642_v18 = vpop.permute.xlu1 %5641 }
  0xc2   : > { %v5644_v21 = vunpack.i.h.bf16 %v5642_v18  ;;  %v5643_v28 = vunpack.i.l.bf16 %v5642_v18 }
  0xc3   : > { %v859_v25 = vsel %vm838_vm3, %v818_v7, %v5638_v8  ;;  %v860_v26 = vsel %vm838_vm3, %v819_v63, %v5639_v12 }
  0xc4   : > { %v889_v16 = vpack.c.bf16 %v860_v26, %v859_v25  ;;  %v861_v14 = vsel %vm838_vm3, %v820_v22, %v5643_v28  ;;  %v862_v13 = vsel %vm838_vm3, %v821_v17, %v5644_v21  ;;  %v5647_v55 = vpop.permute.xlu0 %5646 }
  0xc5   : > { %v890_v27 = vpack.c.bf16 %v862_v13, %v861_v14  ;;  %v5649_v31 = vunpack.i.h.bf16 %v5647_v55  ;;  %v5648_v9 = vunpack.i.l.bf16 %v5647_v55  ;;  %v5652_v4 = vpop.permute.xlu1 %5651 }
  0xc6   : > { %v5654_v23 = vunpack.i.h.bf16 %v5652_v4  ;;  %v5653_v19 = vunpack.i.l.bf16 %v5652_v4  ;;  %5352 = vmatprep.mubr.msk.bf16.mxu0 %vm954_vm4, %v889_v16 }
  0xc7   : > { %5353 = vmatmul.mubr.msk.bf16.gmra.mrb[20].mxu0 %vm954_vm4, %v890_v27  ;;  %v823_v5 = vsel %vm797_vm2, %v6113_v61, %v5649_v31  ;;  %v822_v44 = vsel %vm797_vm2, %v6089_v32, %v5648_v9 }
  0xc8   : > { %v5657_v15 = vpop.permute.xlu0 %5656  ;;  %v825_v41 = vsel %vm797_vm2, %v6121_v1, %v5654_v23  ;;  %v824_v51 = vsel %vm797_vm2, %v6118_v0, %v5653_v19 }
  0xc9   : > { %v5659_v38 = vunpack.i.h.bf16 %v5657_v15  ;;  %v5658_v52 = vunpack.i.l.bf16 %v5657_v15  ;;  %v5662_v43 = vpop.permute.xlu1 %5661 }
  0xca   : > { %v5664_v56 = vunpack.i.h.bf16 %v5662_v43  ;;  %v5663_v58 = vunpack.i.l.bf16 %v5662_v43 }
  0xcb   : > { %v863_v11 = vsel %vm838_vm3, %v822_v44, %v5658_v52  ;;  %v864_v6 = vsel %vm838_vm3, %v823_v5, %v5659_v38 }
  0xcc   : > { %v891_v61 = vpack.c.bf16 %v864_v6, %v863_v11  ;;  %v865_v48 = vsel %vm838_vm3, %v824_v51, %v5663_v58  ;;  %v866_v32 = vsel %vm838_vm3, %v825_v41, %v5664_v56  ;;  %v5667_v29 = vpop.permute.xlu0 %5666 }
  0xcd   : > { %v892_v33 = vpack.c.bf16 %v866_v32, %v865_v48  ;;  %v5669_v1 = vunpack.i.h.bf16 %v5667_v29  ;;  %v5668_v59 = vunpack.i.l.bf16 %v5667_v29  ;;  %v5672_v45 = vpop.permute.xlu1 %5671 }
  0xce   : > { %5356 = vmatprep.mubr.msk.bf16.mxu0 %vm954_vm4, %v891_v61  ;;  %v5674_v0 = vunpack.i.h.bf16 %v5672_v45  ;;  %v5673_v20 = vunpack.i.l.bf16 %v5672_v45 }
  0xcf   : > { %5357 = vmatmul.mubr.msk.bf16.gmra.mrb[24].mxu0 %vm954_vm4, %v892_v33  ;;  %v827_v60 = vsel %vm797_vm2, %v6145_v42, %v5669_v1  ;;  %v826_v54 = vsel %vm797_vm2, %v6124_v2, %v5668_v59 }
  0xd0   : > { %v5677_v62 = vpop.permute.xlu0 %5676  ;;  %v829_v57 = vsel %vm797_vm2, %v6154_v49, %v5674_v0  ;;  %v828_v3 = vsel %vm797_vm2, %v6151_v47, %v5673_v20  ;;  %v6398_v0 = vld [vmem:[%s7633_s2] ss:$0 sm:$0xff] }
  0xd1   : > { %v5679_v53 = vunpack.i.h.bf16 %v5677_v62  ;;  %v5678_v46 = vunpack.i.l.bf16 %v5677_v62  ;;  %v5682_v36 = vpop.permute.xlu1 %5681 }
  0xd2   : > { %v5684_v63 = vunpack.i.h.bf16 %v5682_v36  ;;  %v5683_v7 = vunpack.i.l.bf16 %v5682_v36 }
  0xd3   : > { %v867_v10 = vsel %vm838_vm3, %v826_v54, %v5678_v46  ;;  %v868_v17 = vsel %vm838_vm3, %v827_v60, %v5679_v53  ;;  %v5732_v60 = vld [vmem:[%s7634_s3 + $0x8] sm:$0xff]  }
  0xd4   : > { %v893_v42 = vpack.c.bf16 %v868_v17, %v867_v10  ;;  %v869_v22 = vsel %vm838_vm3, %v828_v3, %v5683_v7  ;;  %v870_v2 = vsel %vm838_vm3, %v829_v57, %v5684_v63  ;;  %v5687_v12 = vpop.permute.xlu0 %5686  ;;  %v5733_v7 = vld [vmem:[%s7634_s3 + $0x10] sm:$0xff]  }
  0xd5   : > { %v894_v8 = vpack.c.bf16 %v870_v2, %v869_v22  ;;  %v5689_v49 = vunpack.i.h.bf16 %v5687_v12  ;;  %v5688_v18 = vunpack.i.l.bf16 %v5687_v12  ;;  %v5692_v21 = vpop.permute.xlu1 %5691 }
  0xd6   : > { %5360 = vmatprep.mubr.msk.bf16.mxu0 %vm954_vm4, %v893_v42  ;;  %v5694_v47 = vunpack.i.h.bf16 %v5692_v21  ;;  %v5693_v28 = vunpack.i.l.bf16 %v5692_v21 }
  0xd7   : > { %5361 = vmatmul.mubr.msk.bf16.gmra.mrb[28].mxu0 %vm954_vm4, %v894_v8  ;;  %v831_v25 = vsel %vm797_vm2, %v6176_v30, %v5689_v49  ;;  %v830_v26 = vsel %vm797_vm2, %v6157_v50, %v5688_v18 }
  0xd8   : > { %v5697_v16 = vpop.permute.xlu0 %5696  ;;  %v833_v14 = vsel %vm797_vm2, %v6187_v39, %v5694_v47  ;;  %v832_v13 = vsel %vm797_vm2, %v6183_v37, %v5693_v28 }
  0xd9   : > { %v5699_v55 = vunpack.i.h.bf16 %v5697_v16  ;;  %v5698_v27 = vunpack.i.l.bf16 %v5697_v16  ;;  %v5702_v31 = vpop.permute.xlu1 %5701 }
  0xda   : > { %v5704_v9 = vunpack.i.h.bf16 %v5702_v31  ;;  %v5703_v4 = vunpack.i.l.bf16 %v5702_v31 }
  0xdb   : > { %v871_v23 = vsel %vm838_vm3, %v830_v26, %v5698_v27  ;;  %v872_v19 = vsel %vm838_vm3, %v831_v25, %v5699_v55  ;;  %v5734_v25 = vld [vmem:[%s7634_s3 + $0x18] sm:$0xff]  }
  0xdc   : > { %v895_v30 = vpack.c.bf16 %v872_v19, %v871_v23  ;;  %v873_v5 = vsel %vm838_vm3, %v832_v13, %v5703_v4  ;;  %v874_v50 = vsel %vm838_vm3, %v833_v14, %v5704_v9  ;;  %v5707_v44 = vpop.permute.xlu0 %5706  ;;  %v5735_v9 = vld [vmem:[%s7634_s3 + $0x20] sm:$0xff]  }
  0xdd   : > { %v896_v15 = vpack.c.bf16 %v874_v50, %v873_v5  ;;  %v5709_v39 = vunpack.i.h.bf16 %v5707_v44  ;;  %v5708_v41 = vunpack.i.l.bf16 %v5707_v44  ;;  %v5712_v51 = vpop.permute.xlu1 %5711 }
  0xde   : > { %5364 = vmatprep.mubr.msk.bf16.mxu0 %vm954_vm4, %v895_v30  ;;  %v5714_v37 = vunpack.i.h.bf16 %v5712_v51  ;;  %v5713_v38 = vunpack.i.l.bf16 %v5712_v51 }
  0xdf   : > { %5365 = vmatmul.mubr.msk.bf16.gmra.mrb[32].mxu0 %vm954_vm4, %v896_v15  ;;  %v835_v52 = vsel %vm797_vm2, %v6213_v34, %v5709_v39  ;;  %v834_v43 = vsel %vm797_vm2, %v6190_v24, %v5708_v41  ;;  %v5736_v39 = vld [vmem:[%s7634_s3 + $0x28] sm:$0xff]  }
  0xe0   : > { %v5717_v56 = vpop.permute.xlu0 %5716  ;;  %v837_v58 = vsel %vm797_vm2, %v6219_v40, %v5714_v37  ;;  %v836_v11 = vsel %vm797_vm2, %v6216_v35, %v5713_v38  ;;  %v7641_v35 = vmov 0.0   ;;  %v5731_v40 = vld [vmem:[%s7634_s3] sm:$0xff]  }
  0xe1   : > { %v5719_v6 = vunpack.i.h.bf16 %v5717_v56  ;;  %v5718_v61 = vunpack.i.l.bf16 %v5717_v56  ;;  %v5722_v48 = vpop.permute.xlu1 %5721  ;;  %5372 = vmatprep.subr.bf16.mxu0 %v7641_v35  ;;  %5468 = vmatprep.subr.bf16.mxu1 %v7641_v35 }
  0xe2   : > { %v5724_v32 = vunpack.i.h.bf16 %v5722_v48  ;;  %v5723_v29 = vunpack.i.l.bf16 %v5722_v48  ;;  %5373 = vmatpush3.bf16.msra.mxu0 %v5731_v40  ;;  %5474 = vmatpush3.bf16.msra.mxu1 %v5731_v40 }
  0xe3   : > { %v875_v33 = vsel %vm838_vm3, %v834_v43, %v5718_v61  ;;  %v876_v1 = vsel %vm838_vm3, %v835_v52, %v5719_v6  ;;  %5374 = vmatprep.subr.bf16.mxu0 %v7641_v35  ;;  %5469 = vmatprep.subr.bf16.mxu1 %v7641_v35 }
  0xe4   : > { %v897_v34 = vpack.c.bf16 %v876_v1, %v875_v33  ;;  %v877_v59 = vsel %vm838_vm3, %v836_v11, %v5723_v29  ;;  %v878_v24 = vsel %vm838_vm3, %v837_v58, %v5724_v32  ;;  %5400 = vmatprep.mubr.msk.bf16.mxu1 %vm5807_vm5, %v7641_v35 }
  0xe5   : > { %v898_v45 = vpack.c.bf16 %v878_v24, %v877_v59 }
  0xe6   : > { %5368 = vmatprep.mubr.msk.bf16.mxu0 %vm954_vm4, %v897_v34  ;;  %5375 = vmatpush3.bf16.msra.mxu0 %v5732_v60 }
  0xe7   : > { %5369 = vmatmul.mubr.msk.bf16.gmra.mrb[36].mxu0 %vm954_vm4, %v898_v45  ;;  %5475 = vmatpush3.bf16.msra.mxu1 %v5732_v60 }
  0xe8   : > { %5376 = vmatprep.subr.bf16.mxu0 %v7641_v35  ;;  %5470 = vmatprep.subr.bf16.mxu1 %v7641_v35 }
  0xe9   : > { %5384 = vmatprep.mubr.msk.bf16.mxu0 %vm5807_vm5, %v7641_v35 }
  0xea   : > { %5377 = vmatpush3.bf16.msra.mxu0 %v5733_v7 }
  0xeb   : > { %5476 = vmatpush3.bf16.msra.mxu1 %v5733_v7  ;;  %5378 = vmatprep.subr.bf16.mxu0 %v7641_v35 }
  0xec   : > { %5471 = vmatprep.subr.bf16.mxu1 %v7641_v35 }
  0xee   : > { %5379 = vmatpush3.bf16.msra.mxu0 %v5734_v25 }
  0xef   : > { %5477 = vmatpush3.bf16.msra.mxu1 %v5734_v25  ;;  %5380 = vmatprep.subr.bf16.mxu0 %v7641_v35 }
  0xf0   : > { %5472 = vmatprep.subr.bf16.mxu1 %v7641_v35 }
  0xf2   : > { %5381 = vmatpush3.bf16.msra.mxu0 %v5735_v9 }
  0xf3   : > { %5478 = vmatpush3.bf16.msra.mxu1 %v5735_v9  ;;  %5382 = vmatprep.subr.bf16.mxu0 %v7641_v35 }
  0xf4   : > { %5473 = vmatprep.subr.bf16.mxu1 %v7641_v35 }
  0xf6   : > { %5383 = vmatpush3.bf16.msra.mxu0 %v5736_v39 }
  0xf7   : > { %5479 = vmatpush3.bf16.msra.mxu1 %v5736_v39  ;;  %5460 = vmatprep.subr.bf16.mxu0 %v7641_v35 }
 0x172   : > { %v5334_v20 = vpop.f32.mrb[0].mxu0 }
 0x173   : > { %v1058_v54 = vadd.f32 %v5334_v20, %v6398_v0  ;;  %v1049_v62 = vpop.f32.mrb[1].mxu0 }
 0x174   : > { %v1050_v57 = vadd.f32 %v6398_v0, %v1049_v62  ;;  %v5335_v3 = vpop.f32.mrb[2].mxu0 }
 0x175   : > { %v6407_v53 = vmax.f32 %v1058_v54, 0.0  ;;  %v1061_v46 = vadd.f32 %v5335_v3, %v6398_v0  ;;  %v1052_v36 = vpop.f32.mrb[3].mxu0 }
 0x176   : > { %v1053_v63 = vadd.f32 %v6398_v0, %v1052_v36  ;;  %v6418_v17 = vmax.f32 %v1050_v57, 0.0 }
 0x177   : > { %v6416_v10 = vmax.f32 %v1061_v46, 0.0  ;;  %v1291_v22 = vrot.slane %v6407_v53, 1  ;;  %v1483_v2 = vrot.slane %v6407_v53, 2 }
 0x178   : > { %v6420_v42 = vmax.f32 %v1053_v63, 0.0  ;;  %v1288_v16 = vrot.slane %v6418_v17, 1  ;;  %v1480_v4 = vrot.slane %v6418_v17, 2 }
 0x179   : > { %v1293_v12 = vrot.slane %v6416_v10, 1  ;;  %v1485_v8 = vrot.slane %v6416_v10, 2 }
 0x17a   : > { %v5338_v49 = vpop.f32.mrb[4].mxu0  ;;  %v1289_v18 = vrot.slane %v6420_v42, 1  ;;  %v1481_v55 = vrot.slane %v6420_v42, 2 }
 0x17b   : > { %v1065_v21 = vpop.f32.mrb[5].mxu0  ;;  %v1486_v47 = vsel %vm588_vm1, %v1483_v2, %v1485_v8  ;;  %v1294_v28 = vsel %vm379_vm0, %v1291_v22, %v1293_v12  ;;  %v1074_v23 = vadd.f32 %v5338_v49, %v6398_v0 }
 0x17c   : > { %1556 = vrot.lane.b32.xlu1 %v1486_v47, %s5805_s15  ;;  %1364 = vrot.lane.b32.xlu0 %v1294_v28, %s5804_s14  ;;  %v6440_v26 = vpop.f32.mrb[6].mxu0  ;;  %v1066_v13 = vadd.f32 %v6398_v0, %v1065_v21  ;;  %v1292_v27 = vsel %vm379_vm0, %v1289_v18, %v1291_v22  ;;  %v1290_v31 = vsel %vm379_vm0, %v1288_v16, %v1289_v18 }
 0x17d   : > { %v1068_v14 = vpop.f32.mrb[7].mxu0  ;;  %v1482_v44 = vsel %vm588_vm1, %v1480_v4, %v1481_v55  ;;  %v1484_v15 = vsel %vm588_vm1, %v1481_v55, %v1483_v2  ;;  %v6468_v51 = vmax.f32 %v1074_v23, 0.0 }
 0x17e   : > { %v6456_v19 = vmax.f32 %v1066_v13, 0.0  ;;  %v1069_v30 = vadd.f32 %v6398_v0, %v1068_v14 }
 0x17f   : > { %v1298_v11 = vrot.slane %v6468_v51, 1  ;;  %v1490_v6 = vrot.slane %v6468_v51, 2 }
 0x180   : > { %1362 = vrot.lane.b32.xlu1 %v1292_v27, %s5804_s14  ;;  %1360 = vrot.lane.b32.xlu0 %v1290_v31, %s5804_s14  ;;  %v6470_v38 = vmax.f32 %v1069_v30, 0.0  ;;  %v1487_v52 = vrot.slane %v6456_v19, 2  ;;  %v1295_v43 = vrot.slane %v6456_v19, 1 }
 0x182   : > { %v5342_v5 = vpop.f32.mrb[8].mxu0  ;;  %v1297_v61 = vrot.slane %v6470_v38, 1  ;;  %v1489_v48 = vrot.slane %v6470_v38, 2  ;;  %v1296_v59 = vsel %vm379_vm0, %v1293_v12, %v1295_v43  ;;  %v1488_v24 = vsel %vm588_vm1, %v1485_v8, %v1487_v52 }
 0x183   : > { %v1081_v50 = vpop.f32.mrb[9].mxu0  ;;  %v1090_v56 = vadd.f32 %v5342_v5, %v6398_v0 }
 0x184   : > { %1552 = vrot.lane.b32.xlu1 %v1482_v44, %s5805_s15  ;;  %1554 = vrot.lane.b32.xlu0 %v1484_v15, %s5805_s15  ;;  %v5343_v41 = vpop.f32.mrb[10].mxu0  ;;  %v1491_v62 = vsel %vm588_vm1, %v1489_v48, %v1490_v6  ;;  %v1299_v57 = vsel %vm379_vm0, %v1297_v61, %v1298_v11  ;;  %v1082_v3 = vadd.f32 %v6398_v0, %v1081_v50 }
 0x185   : > { %v1084_v37 = vpop.f32.mrb[11].mxu0  ;;  %v1093_v58 = vadd.f32 %v5343_v41, %v6398_v0  ;;  %v6488_v33 = vmax.f32 %v1090_v56, 0.0 }
 0x186   : > { %v1085_v32 = vadd.f32 %v6398_v0, %v1084_v37  ;;  %v6519_v8 = vmax.f32 %v1082_v3, 0.0 }
 0x187   : > { %v6490_v1 = vmax.f32 %v1093_v58, 0.0  ;;  %v1306_v60 = vrot.slane %v6488_v33, 1  ;;  %v1498_v63 = vrot.slane %v6488_v33, 2 }
 0x188   : > { %1560 = vrot.lane.b32.xlu1 %v1487_v52, %s5805_s15  ;;  %1368 = vrot.lane.b32.xlu0 %v1295_v43, %s5804_s14  ;;  %v6500_v20 = vmax.f32 %v1085_v32, 0.0  ;;  %v1302_v25 = vrot.slane %v6519_v8, 1  ;;  %v7640_v16 = vrot.slane %v6519_v8, 2 }
 0x189   : > { %v1307_v54 = vrot.slane %v6490_v1, 1  ;;  %v1499_v7 = vrot.slane %v6490_v1, 2 }
 0x18a   : > { %v5346_v29 = vpop.f32.mrb[12].mxu0  ;;  %v1304_v46 = vrot.slane %v6500_v20, 1  ;;  %v1496_v21 = vrot.slane %v6500_v20, 2 }
 0x18b   : > { %v1097_v34 = vpop.f32.mrb[13].mxu0  ;;  %v1308_v22 = vsel %vm379_vm0, %v1306_v60, %v1307_v54  ;;  %v1106_v18 = vadd.f32 %v5346_v29, %v6398_v0  ;;  %v1500_v28 = vsel %vm588_vm1, %v1498_v63, %v1499_v7 }
 0x18c   : > { %1366 = vrot.lane.b32.xlu1 %v1296_v59, %s5804_s14  ;;  %1558 = vrot.lane.b32.xlu0 %v1488_v24, %s5805_s15  ;;  %v5347_v45 = vpop.f32.mrb[14].mxu0  ;;  %v1098_v47 = vadd.f32 %v6398_v0, %v1097_v34  ;;  %v1497_v31 = vsel %vm588_vm1, %v7640_v16, %v1496_v21  ;;  %v1305_v9 = vsel %vm379_vm0, %v1302_v25, %v1304_v46 }
 0x18d   : > { %v1100_v40 = vpop.f32.mrb[15].mxu0  ;;  %v6529_v14 = vmax.f32 %v1106_v18, 0.0  ;;  %v1109_v41 = vadd.f32 %v5347_v45, %v6398_v0 }
 0x18e   : > { %v1101_v13 = vadd.f32 %v6398_v0, %v1100_v40  ;;  %v6534_v27 = vmax.f32 %v1098_v47, 0.0 }
 0x18f   : > { %v1505_v50 = vrot.slane %v6529_v14, 2  ;;  %v1313_v44 = vrot.slane %v6529_v14, 1  ;;  %v6574_v34 = vmax.f32 %v1109_v41, 0.0 }
 0x190   : > { %1562 = vrot.lane.b32.xlu1 %v1491_v62, %s5805_s15  ;;  %1370 = vrot.lane.b32.xlu0 %v1299_v57, %s5804_s14  ;;  %v6550_v5 = vmax.f32 %v1101_v13, 0.0  ;;  %v1309_v15 = vrot.slane %v6534_v27, 1  ;;  %v1501_v39 = vrot.slane %v6534_v27, 2 }
 0x191   : > { %v1315_v40 = vrot.slane %v6574_v34, 1  ;;  %v1507_v60 = vrot.slane %v6574_v34, 2 }
 0x192   : > { %v5350_v36 = vpop.f32.mrb[16].mxu0  ;;  %v1311_v37 = vrot.slane %v6550_v5, 1  ;;  %v1503_v43 = vrot.slane %v6550_v5, 2  ;;  %v1502_v58 = vsel %vm588_vm1, %v1499_v7, %v1501_v39  ;;  %v1310_v61 = vsel %vm379_vm0, %v1307_v54, %v1309_v15 }
 0x193   : > { %v1113_v2 = vpop.f32.mrb[17].mxu0  ;;  %v1122_v54 = vadd.f32 %v5350_v36, %v6398_v0 }
 0x194   : > { %1380 = vrot.lane.b32.xlu1 %v1308_v22, %s5804_s14  ;;  %1378 = vrot.lane.b32.xlu0 %v1304_v46, %s5804_s14  ;;  %v5351_v12 = vpop.f32.mrb[18].mxu0  ;;  %v1114_v56 = vadd.f32 %v6398_v0, %v1113_v2  ;;  %v1504_v24 = vsel %vm588_vm1, %v1501_v39, %v1503_v43  ;;  %v1312_v45 = vsel %vm379_vm0, %v1309_v15, %v1311_v37 }
 0x195   : > { %v1116_v49 = vpop.f32.mrb[19].mxu0  ;;  %v1125_v62 = vadd.f32 %v5351_v12, %v6398_v0  ;;  %v1506_v63 = vsel %vm588_vm1, %v1503_v43, %v1505_v50  ;;  %v1314_v7 = vsel %vm379_vm0, %v1311_v37, %v1313_v44  ;;  %v6600_v12 = vmax.f32 %v1122_v54, 0.0 }
 0x196   : > { %v6576_v59 = vmax.f32 %v1114_v56, 0.0 }
 0x197   : > { %v6602_v18 = vmax.f32 %v1125_v62, 0.0  ;;  %v1512_v13 = vrot.slane %v6600_v12, 2 }
 0x198   : > { %1572 = vrot.lane.b32.xlu1 %v1500_v28, %s5805_s15  ;;  %1570 = vrot.lane.b32.xlu0 %v1496_v21, %s5805_s15  ;;  %v1316_v3 = vrot.slane %v6576_v59, 1  ;;  %v1508_v46 = vrot.slane %v6576_v59, 2  ;;  %v1117_v21 = vadd.f32 %v6398_v0, %v1116_v49  ;;  %v1320_v49 = vrot.slane %v6600_v12, 1 }
 0x19a   : > { %v6532_v55 = vpop.f32.mrb[20].mxu0  ;;  %v1509_v47 = vsel %vm588_vm1, %v1507_v60, %v1508_v46  ;;  %v1317_v28 = vsel %vm379_vm0, %v1315_v40, %v1316_v3 }
 0x19b   : > { %v6542_v4 = vpop.f32.mrb[21].mxu0  ;;  %v1138_v56 = vadd.f32 %v6532_v55, %v6398_v0 }
 0x19c   : > { %1568 = vrot.lane.b32.xlu1 %v1497_v31, %s5805_s15  ;;  %1376 = vrot.lane.b32.xlu0 %v1305_v9, %s5804_s14  ;;  %v6546_v23 = vpop.f32.mrb[22].mxu0  ;;  %v6610_v31 = vmax.f32 %v1117_v21, 0.0  ;;  %v1514_v9 = vrot.slane %v6602_v18, 2 }
 0x19d   : > { %v6548_v30 = vpop.f32.mrb[23].mxu0  ;;  %v6643_v62 = vmax.f32 %v1138_v56, 0.0 }
 0x19e   : > { %v1318_v37 = vrot.slane %v6610_v31, 1  ;;  %v1510_v43 = vrot.slane %v6610_v31, 2 }
 0x19f   : > { %v1519_v56 = vrot.slane %v6643_v62, 2 }
 0x1a0   : > { %1580 = vrot.lane.b32.xlu1 %v1505_v50, %s5805_s15  ;;  %1388 = vrot.lane.b32.xlu0 %v1313_v44, %s5804_s14  ;;  %v1322_v50 = vrot.slane %v6602_v18, 1  ;;  %v1511_v60 = vsel %vm588_vm1, %v1508_v46, %v1510_v43  ;;  %v1319_v55 = vsel %vm379_vm0, %v1316_v3, %v1318_v37  ;;  %v1513_v3 = vsel %vm588_vm1, %v1510_v43, %v1512_v13 }
 0x1a1   : > { %v1321_v21 = vsel %vm379_vm0, %v1318_v37, %v1320_v49 }
 0x1a2   : > { %v6560_v52 = vpop.f32.mrb[24].mxu0  ;;  %v1323_v40 = vsel %vm379_vm0, %v1320_v49, %v1322_v50 }
 0x1a3   : > { %v6566_v48 = vpop.f32.mrb[25].mxu0 }
 0x1a4   : > { %1574 = vrot.lane.b32.xlu1 %v1502_v58, %s5805_s15  ;;  %1382 = vrot.lane.b32.xlu0 %v1310_v61, %s5804_s14  ;;  %v6570_v32 = vpop.f32.mrb[26].mxu0  ;;  %v1515_v58 = vsel %vm588_vm1, %v1512_v13, %v1514_v9  ;;  %v1130_v61 = vadd.f32 %v6398_v0, %v6542_v4  ;;  %v1146_v37 = vadd.f32 %v6398_v0, %v6566_v48 }
 0x1a5   : > { %v6572_v29 = vpop.f32.mrb[27].mxu0  ;;  %v1157_v48 = vadd.f32 %v6570_v32, %v6398_v0 }
 0x1a6   : > { %v6645_v4 = vmax.f32 %v1130_v61, 0.0 }
 0x1a8   : > { %1576 = vrot.lane.b32.xlu1 %v1504_v24, %s5805_s15  ;;  %1384 = vrot.lane.b32.xlu0 %v1312_v45, %s5804_s14  ;;  %v1141_v24 = vadd.f32 %v6546_v23, %v6398_v0  ;;  %v1133_v45 = vadd.f32 %v6398_v0, %v6548_v30  ;;  %v1516_v43 = vrot.slane %v6645_v4, 2 }
 0x1aa   : > { %v6586_v57 = vpop.f32.mrb[28].mxu0  ;;  %v6647_v23 = vmax.f32 %v1141_v24, 0.0 }
 0x1ab   : > { %v6592_v22 = vpop.f32.mrb[29].mxu0 }
 0x1ac   : > { %1578 = vrot.lane.b32.xlu1 %v1506_v63, %s5805_s15  ;;  %1386 = vrot.lane.b32.xlu0 %v1314_v7, %s5804_s14  ;;  %v6596_v2 = vpop.f32.mrb[30].mxu0  ;;  %v6649_v63 = vmax.f32 %v1133_v45, 0.0 }
 0x1ad   : > { %v6598_v36 = vpop.f32.mrb[31].mxu0 }
 0x1ae   : > { %v1517_v61 = vrot.slane %v6649_v63, 2 }
 0x1b0   : > { %1582 = vrot.lane.b32.xlu1 %v1509_v47, %s5805_s15  ;;  %1390 = vrot.lane.b32.xlu0 %v1317_v28, %s5804_s14  ;;  %v1327_v47 = vrot.slane %v6643_v62, 1  ;;  %v1324_v28 = vrot.slane %v6645_v4, 1 }
 0x1b2   : > { %v6614_v44 = vpop.f32.mrb[32].mxu0 }
 0x1b3   : > { %v6617_v15 = vpop.f32.mrb[33].mxu0 }
 0x1b4   : > { %1590 = vrot.lane.b32.xlu1 %v1514_v9, %s5805_s15  ;;  %1398 = vrot.lane.b32.xlu0 %v1322_v50, %s5804_s14  ;;  %v6621_v39 = vpop.f32.mrb[34].mxu0  ;;  %v1329_v9 = vrot.slane %v6647_v23, 1  ;;  %v1325_v50 = vrot.slane %v6649_v63, 1 }
 0x1b5   : > { %v6623_v41 = vpop.f32.mrb[35].mxu0 }
 0x1b6   : > { %v1330_v13 = vsel %vm379_vm0, %v1327_v47, %v1329_v9  ;;  %v1326_v49 = vsel %vm379_vm0, %v1324_v28, %v1325_v50  ;;  %v1328_v45 = vsel %vm379_vm0, %v1325_v50, %v1327_v47  ;;  %v6693_v47 = vmax.f32 %v1157_v48, 0.0 }
 0x1b8   : > { %1588 = vrot.lane.b32.xlu1 %v1515_v58, %s5805_s15  ;;  %1396 = vrot.lane.b32.xlu0 %v1323_v40, %s5804_s14  ;;  %v1521_v58 = vrot.slane %v6647_v23, 2  ;;  %v1154_v40 = vadd.f32 %v6560_v52, %v6398_v0  ;;  %v1149_v52 = vadd.f32 %v6398_v0, %v6572_v29  ;;  %v1162_v29 = vadd.f32 %v6398_v0, %v6592_v22 }
 0x1b9   : > { %v1170_v22 = vadd.f32 %v6586_v57, %v6398_v0 }
 0x1ba   : > { %v6641_v54 = vpop.f32.mrb[36].mxu0  ;;  %v1522_v24 = vsel %vm588_vm1, %v1519_v56, %v1521_v58 }
 0x1bb   : > { %v6651_v30 = vpop.f32.mrb[37].mxu0  ;;  %v6735_v57 = vmax.f32 %v1170_v22, 0.0  ;;  %v1186_v22 = vadd.f32 %v6614_v44, %v6398_v0 }
 0x1bc   : > { %1584 = vrot.lane.b32.xlu1 %v1511_v60, %s5805_s15  ;;  %1392 = vrot.lane.b32.xlu0 %v1319_v55, %s5804_s14  ;;  %v6655_v7 = vpop.f32.mrb[38].mxu0  ;;  %v6683_v60 = vmax.f32 %v1146_v37, 0.0  ;;  %v1518_v55 = vsel %vm588_vm1, %v1516_v43, %v1517_v61  ;;  %v1528_v37 = vrot.slane %v6693_v47, 2 }
 0x1bd   : > { %v6657_v46 = vpop.f32.mrb[39].mxu0 }
 0x1be   : > { %v1523_v28 = vrot.slane %v6683_v60, 2  ;;  %v1331_v50 = vrot.slane %v6683_v60, 1 }
 0x1c0   : > { %1586 = vrot.lane.b32.xlu1 %v1513_v3, %s5805_s15  ;;  %1394 = vrot.lane.b32.xlu0 %v1321_v21, %s5804_s14  ;;  %v1520_v3 = vsel %vm588_vm1, %v1517_v61, %v1519_v56  ;;  %v6691_v21 = vmax.f32 %v1154_v40, 0.0  ;;  %v1524_v43 = vsel %vm588_vm1, %v1521_v58, %v1523_v28  ;;  %v1332_v61 = vsel %vm379_vm0, %v1329_v9, %v1331_v50 }
 0x1c1   : > { %v6715_v40 = vmax.f32 %v1162_v29, 0.0  ;;  %v1165_v9 = vadd.f32 %v6398_v0, %v6598_v36 }
 0x1c2   : > { %v1334_v32 = vrot.slane %v6691_v21, 1  ;;  %v1526_v56 = vrot.slane %v6691_v21, 2 }
 0x1c3   : > { %v6733_v29 = vmax.f32 %v1165_v9, 0.0  ;;  %v1178_v9 = vadd.f32 %v6398_v0, %v6617_v15  ;;  %v1181_v15 = vadd.f32 %v6398_v0, %v6623_v41 }
 0x1c4   : > { %1404 = vrot.lane.b32.xlu1 %v1330_v13, %s5804_s14  ;;  %1400 = vrot.lane.b32.xlu0 %v1326_v49, %s5804_s14  ;;  %v1336_v13 = vrot.slane %v6693_v47, 1  ;;  %v6704_v49 = vmax.f32 %v1149_v52, 0.0  ;;  %v1529_v48 = vsel %vm588_vm1, %v1526_v56, %v1528_v37  ;;  %v1530_v52 = vrot.slane %v6715_v40, 2 }
 0x1c8   : > { %1596 = vrot.lane.b32.xlu1 %v1522_v24, %s5805_s15  ;;  %1402 = vrot.lane.b32.xlu0 %v1328_v45, %s5804_s14  ;;  %v1525_v24 = vrot.slane %v6704_v49, 2  ;;  %v1333_v45 = vrot.slane %v6704_v49, 1 }
 0x1ca   : > { %v1527_v58 = vsel %vm588_vm1, %v1525_v24, %v1526_v56  ;;  %v1531_v56 = vsel %vm588_vm1, %v1528_v37, %v1530_v52  ;;  %v1342_v24 = vrot.slane %v6735_v57, 1 }
 0x1cc   : > { %1592 = vrot.lane.b32.xlu1 %v1518_v55, %s5805_s15  ;;  %1594 = vrot.lane.b32.xlu0 %v1520_v3, %s5805_s15  ;;  %v1337_v55 = vsel %vm379_vm0, %v1334_v32, %v1336_v13  ;;  %v1338_v3 = vrot.slane %v6715_v40, 1 }
 0x1d0   : > { %1600 = vrot.lane.b32.xlu1 %v1523_v28, %s5805_s15  ;;  %1408 = vrot.lane.b32.xlu0 %v1331_v50, %s5804_s14  ;;  %v1173_v28 = vadd.f32 %v6596_v2, %v6398_v0  ;;  %v1335_v50 = vsel %vm379_vm0, %v1333_v45, %v1334_v32  ;;  %v1077_v2 = vadd.f32 %v6440_v26, %v6398_v0  ;;  %v1532_v32 = vrot.slane %v6733_v29, 2 }
 0x1d1   : > { %v1534_v45 = vrot.slane %v6735_v57, 2 }
 0x1d2   : > { %v6737_v36 = vmax.f32 %v1173_v28, 0.0 }
 0x1d4   : > { %1598 = vrot.lane.b32.xlu1 %v1524_v43, %s5805_s15  ;;  %1406 = vrot.lane.b32.xlu0 %v1332_v61, %s5804_s14  ;;  %7649 = vst [vmem:[#allocation5_spill] sm:$0xff] %v6737_v36  ;;  %v1339_v43 = vsel %vm379_vm0, %v1336_v13, %v1338_v3  ;;  %v1340_v61 = vrot.slane %v6733_v29, 1  ;;  %v1535_v37 = vrot.slane %v6737_v36, 2  ;;  %v6753_v13 = vmax.f32 %v1077_v2, 0.0 }
 0x1d5   : > { %v5808_v2 = vmov 1983009808  }
 0x1d6   : > { %v1536_v26 = vsel %vm588_vm1, %v1534_v45, %v1535_v37  ;;  %v7639_v28 = vrot.slane %v6753_v13, 2  ;;  %v1794_v44 = vunpack.c.l.s4 %v5808_v2  ;;  %v6773_v45 = vmax.f32 %v1186_v22, 0.0 }
 0x1d8   : > { %1604 = vrot.lane.b32.xlu1 %v1529_v48, %s5805_s15  ;;  %1412 = vrot.lane.b32.xlu0 %v1337_v55, %s5804_s14  ;;  %v1343_v48 = vrot.slane %v6737_v36, 1  ;;  %7650 = vst [vmem:[#allocation6_spill] sm:$0xff] %v6773_v45 }
 0x1da   : > { %v1344_v55 = vsel %vm379_vm0, %v1342_v24, %v1343_v48  ;;  %v1796_v24 = vlaneseq }
 0x1dc   : > { %1602 = vrot.lane.b32.xlu1 %v1527_v58, %s5805_s15  ;;  %1410 = vrot.lane.b32.xlu0 %v1335_v50, %s5804_s14  ;;  %v1300_v58 = vrot.slane %v6753_v13, 1  ;;  %v1533_v50 = vsel %vm588_vm1, %v1530_v52, %v1532_v32  ;;  %v1797_v22 = vshrl.u32 %v1796_v24, 7 }
 0x1e0   : > { %1606 = vrot.lane.b32.xlu1 %v1531_v56, %s5805_s15  ;;  %1414 = vrot.lane.b32.xlu0 %v1339_v43, %s5804_s14  ;;  %v1341_v56 = vsel %vm379_vm0, %v1338_v3, %v1340_v61  ;;  %v1189_v43 = vadd.f32 %v6621_v39, %v6398_v0  ;;  %v1493_v39 = vsel %vm588_vm1, %v1490_v6, %v7639_v28 }
 0x1e2   : > { %v6787_v41 = vmax.f32 %v1189_v43, 0.0 }
 0x1e4   : > { %1610 = vrot.lane.b32.xlu1 %v1532_v32, %s5805_s15  ;;  %1418 = vrot.lane.b32.xlu0 %v1340_v61, %s5804_s14  ;;  %v1301_v61 = vsel %vm379_vm0, %v1298_v11, %v1300_v58 }
 0x1e8   : > { %1612 = vrot.lane.b32.xlu1 %v1536_v26, %s5805_s15  ;;  %1420 = vrot.lane.b32.xlu0 %v1344_v55, %s5804_s14  ;;  %v6775_v26 = vmax.f32 %v1178_v9, 0.0  ;;  %v1795_v55 = vunpack.c.0.s8 %v1794_v44  ;;  %v6791_v9 = vmax.f32 %v1181_v15, 0.0  ;;  %v6806_v15 = vsel %vm379_vm0, %v1300_v58, %v1302_v25 }
 0x1e9   : > { %v1202_v58 = vadd.f32 %v6641_v54, %v6398_v0  ;;  %v1197_v54 = vadd.f32 %v6398_v0, %v6657_v46 }
 0x1ea   : > { %7651 = vst [vmem:[#allocation7_spill] sm:$0xff] %v6775_v26  ;;  %7652 = vst [vmem:[#allocation8_spill] sm:$0xff] %v6791_v9  ;;  %v1537_v6 = vrot.slane %v6775_v26, 2  ;;  %v1345_v43 = vrot.slane %v6775_v26, 1  ;;  %v6799_v24 = vsub.s32 %v1795_v55, %v1797_v22 }
 0x1ec   : > { %1608 = vrot.lane.b32.xlu1 %v1533_v50, %s5805_s15  ;;  %1416 = vrot.lane.b32.xlu0 %v1341_v56, %s5804_s14  ;;  %v1541_v50 = vrot.slane %v6773_v45, 2  ;;  %v1538_v25 = vsel %vm588_vm1, %v1535_v37, %v1537_v6  ;;  %v1346_v35 = vsel %vm379_vm0, %v1343_v48, %v1345_v43 }
 0x1ee   : > { %v1557_v52 = vpop.permute.xlu1 %1556  ;;  %v1365_v32 = vpop.permute.xlu0 %1364 }
 0x1ef   : > { %v1674_v3 = vsel %vm797_vm2, %v6407_v53, %v1365_v32  ;;  %v1349_v53 = vrot.slane %v6773_v45, 1 }
 0x1f0   : > { %1564 = vrot.lane.b32.xlu1 %v1493_v39, %s5805_s15  ;;  %1372 = vrot.lane.b32.xlu0 %v1301_v61, %s5804_s14  ;;  %v1714_v56 = vsel %vm838_vm3, %v1674_v3, %v1557_v52  ;;  %v1539_v52 = vrot.slane %v6791_v9, 2  ;;  %v1194_v3 = vadd.f32 %v6398_v0, %v6651_v30  ;;  %v1347_v61 = vrot.slane %v6791_v9, 1 }
 0x1f1   : > { %v1826_v39 = vcombine.high %v1714_v56, %v1714_v56 }
 0x1f2   : > { %v1363_v2 = vpop.permute.xlu1 %1362  ;;  %v1361_v11 = vpop.permute.xlu0 %1360 }
 0x1f3   : > { %v1673_v55 = vsel %vm797_vm2, %v6420_v42, %v1363_v2  ;;  %v1672_v22 = vsel %vm797_vm2, %v6418_v17, %v1361_v11  ;;  %v6826_v17 = vmax.f32 %v1194_v3, 0.0  ;;  %v1840_v37 = vrot.slane %v1826_v39, %v6799_v24 }
 0x1f4   : > { %1428 = vrot.lane.b32.xlu1 %v1349_v53, %s5804_s14  ;;  %1620 = vrot.lane.b32.xlu0 %v1541_v50, %s5805_s15  ;;  %v1833_v3 = vrot.slane %v1714_v56, %v6799_v24  ;;  %v1348_v39 = vsel %vm379_vm0, %v1345_v43, %v1347_v61  ;;  %v1542_v56 = vsel %vm588_vm1, %v1539_v52, %v1541_v50 }
 0x1f5   : > { %v1842_v36 = vcombine.high %v1840_v37, %v1840_v37 }
 0x1f6   : > { %v1553_v28 = vpop.permute.xlu1 %1552  ;;  %v1555_v16 = vpop.permute.xlu0 %1554 }
 0x1f7   : > { %v1712_v44 = vsel %vm838_vm3, %v1672_v22, %v1553_v28  ;;  %v1713_v30 = vsel %vm838_vm3, %v1673_v55, %v1555_v16  ;;  %v1540_v16 = vsel %vm588_vm1, %v1537_v6, %v1539_v52 }
 0x1f8   : > { %v1792_v32 = vcombine.high %v1712_v44, %v1712_v44  ;;  %v1799_v9 = vrot.slane %v1712_v44, %v6799_v24  ;;  %v1809_v42 = vcombine.high %v1713_v30, %v1713_v30  ;;  %v1816_v2 = vrot.slane %v1713_v30, %v6799_v24  ;;  %1614 = vrot.lane.b32.xlu1 %v1538_v25, %s5805_s15 }
 0x1f9   : > { %1422 = vrot.lane.b32.xlu0 %v1346_v35, %s5804_s14  ;;  %v6835_v25 = vmax.f32 %v1202_v58, 0.0 }
 0x1fa   : > { %v1806_v48 = vrot.slane %v1792_v32, %v6799_v24  ;;  %v1807_v28 = vcombine.high %v1799_v9, %v1799_v9  ;;  %v1823_v11 = vrot.slane %v1809_v42, %v6799_v24  ;;  %v1824_v44 = vcombine.high %v1816_v2, %v1816_v2  ;;  %v1561_v55 = vpop.permute.xlu1 %1560  ;;  %v1369_v22 = vpop.permute.xlu0 %1368 }
 0x1fb   : > { %v1676_v35 = vsel %vm797_vm2, %v6456_v19, %v1369_v22  ;;  %v1544_v32 = vrot.slane %v6826_v17, 2  ;;  %v6843_v42 = vmax.f32 %v1197_v54, 0.0 }
 0x1fc   : > { %v1808_v46 = vcombine.high %v1806_v48, %v1806_v48  ;;  %v2464_v30 = vcombine.low %v1799_v9, %v1807_v28  ;;  %v1825_v6 = vcombine.high %v1823_v11, %v1823_v11  ;;  %v2481_v26 = vcombine.low %v1816_v2, %v1824_v44  ;;  %1616 = vrot.lane.b32.xlu1 %v1540_v16, %s5805_s15 }
 0x1fd   : > { %v1716_v58 = vsel %vm838_vm3, %v1676_v35, %v1561_v55  ;;  %1424 = vrot.lane.b32.xlu0 %v1348_v39, %s5804_s14  ;;  %v1350_v9 = vsel %vm379_vm0, %v1347_v61, %v1349_v53  ;;  %v1841_v2 = vcombine.high %v1833_v3, %v1833_v3  ;;  %v1354_v53 = vrot.slane %v6843_v42, 1 }
 0x1fe   : > { %v2465_v19 = vcombine.low %v1806_v48, %v1808_v46  ;;  %v2482_v22 = vcombine.low %v1823_v11, %v1825_v6  ;;  %v1367_v43 = vpop.permute.xlu1 %1366  ;;  %v1559_v45 = vpop.permute.xlu0 %1558  ;;  %v2472_v16 = vrot.slane %v2464_v30, %v6799_v24  ;;  %v1867_v28 = vrot.slane %v1716_v58, %v6799_v24 }
 0x1ff   : > { %v1675_v54 = vsel %vm797_vm2, %v6416_v10, %v1367_v43  ;;  %v2489_v55 = vrot.slane %v2481_v26, %v6799_v24  ;;  %v7653_v10 = vrot.slane %v6787_v41, 2  ;;  %v2499_v26 = vcombine.low %v1840_v37, %v1842_v36 }
 0x200   : > { %v2479_v44 = vrot.slane %v2465_v19, %v6799_v24  ;;  %v2496_v50 = vrot.slane %v2482_v22, %v6799_v24  ;;  %v1715_v52 = vsel %vm838_vm3, %v1675_v54, %v1559_v45  ;;  %1618 = vrot.lane.b32.xlu1 %v1542_v56, %s5805_s15  ;;  %v1860_v46 = vcombine.high %v1716_v58, %v1716_v58 }
 0x201   : > { %v1843_v61 = vcombine.high %v1715_v52, %v1715_v52  ;;  %v1850_v48 = vrot.slane %v1715_v52, %v6799_v24  ;;  %1426 = vrot.lane.b32.xlu0 %v1350_v9, %s5804_s14  ;;  %v1545_v11 = vsel %vm588_vm1, %v7653_v10, %v1544_v32  ;;  %v1875_v6 = vcombine.high %v1867_v28, %v1867_v28 }
 0x202   : > { %v2480_v35 = vcombine.low %v2472_v16, %v2479_v44  ;;  %v2497_v39 = vcombine.low %v2489_v55, %v2496_v50  ;;  %v1563_v45 = vpop.permute.xlu1 %1562  ;;  %v1371_v30 = vpop.permute.xlu0 %1370  ;;  %v1352_v43 = vrot.slane %v6826_v17, 1  ;;  %v2498_v9 = vcombine.low %v1833_v3, %v1841_v2 }
 0x203   : > { %v1857_v56 = vrot.slane %v1843_v61, %v6799_v24  ;;  %v1858_v19 = vcombine.high %v1850_v48, %v1850_v48  ;;  %v1677_v22 = vsel %vm797_vm2, %v6470_v38, %v1371_v30  ;;  %v1205_v36 = vadd.f32 %v6655_v7, %v6398_v0 }
 0x204   : > { %v3148_v54 = vpack.c.bf16 %v2497_v39, %v2480_v35  ;;  %v6871_v52 = vsel %vm838_vm3, %v1677_v22, %v1563_v45  ;;  %1622 = vrot.lane.b32.xlu1 %v1545_v11, %s5805_s15  ;;  %v1546_v37 = vrot.slane %v6843_v42, 2  ;;  %v2513_v38 = vrot.slane %v2499_v26, %v6799_v24 }
 0x205   : > { %v1859_v58 = vcombine.high %v1857_v56, %v1857_v56  ;;  %v2515_v16 = vcombine.low %v1850_v48, %v1858_v19  ;;  %1374 = vrot.lane.b32.xlu0 %v6806_v15, %s5804_s14  ;;  %v1874_v3 = vrot.slane %v1860_v46, %v6799_v24  ;;  %v6883_v2 = vrot.slane %v6871_v52, %v6799_v24 }
 0x206   : > { %v1381_v44 = vpop.permute.xlu1 %1380  ;;  %5385 = vmatmul.mubr.msk.bf16.vlgmr.msra.gmra.mrb[40].mxu0 %vm954_vm4, %v3148_v54  ;;  %v1379_v55 = vpop.permute.xlu0 %1378  ;;  %v2532_v0 = vcombine.low %v1867_v28, %v1875_v6  ;;  %v1355_v50 = vsel %vm379_vm0, %v1352_v43, %v1354_v53  ;;  %v7654_v61 = vmov 0.0   ;;  %v1548_v15 = vrot.slane %v6835_v25, 2 }
 0x207   : > { %v2516_v7 = vcombine.low %v1857_v56, %v1859_v58  ;;  %5388 = vmatprep.mubr.msk.bf16.mxu0 %vm5807_vm5, %v7654_v61  ;;  %v2506_v48 = vrot.slane %v2498_v9, %v6799_v24  ;;  %v2533_v10 = vcombine.low %v1874_v3, %v6883_v2  ;;  %v7655_v11 = vrot.slane %v6787_v41, 1 }
 0x208   : > { %1432 = vrot.lane.b32.xlu1 %v1355_v50, %s5804_s14  ;;  %v6898_v26 = vmax.f32 %v1205_v36, 0.0  ;;  %v2523_v35 = vrot.slane %v2515_v16, %v6799_v24  ;;  %v1547_v46 = vsel %vm588_vm1, %v1544_v32, %v1546_v37  ;;  %v1682_v30 = vsel %vm797_vm2, %v6488_v33, %v1381_v44 }
 0x209   : > { %v1353_v28 = vsel %vm379_vm0, %v7655_v11, %v1352_v43  ;;  %v2530_v39 = vrot.slane %v2516_v7, %v6799_v24  ;;  %v2547_v45 = vrot.slane %v2533_v10, %v6799_v24  ;;  %v1681_v6 = vsel %vm797_vm2, %v6500_v20, %v1379_v55 }
 0x20a   : > { %1430 = vrot.lane.b32.xlu0 %v1353_v28, %s5804_s14  ;;  %v1573_v56 = vpop.permute.xlu1 %1572  ;;  %v1571_v19 = vpop.permute.xlu0 %1570  ;;  %v2514_v22 = vcombine.low %v2506_v48, %v2513_v38  ;;  %v2540_v43 = vrot.slane %v2532_v0, %v6799_v24  ;;  %v1356_v32 = vrot.slane %v6835_v25, 1  ;;  %v7656_v33 = vrot.slane %v6519_v8, 2 }
 0x20b   : > { %v2531_v9 = vcombine.low %v2523_v35, %v2530_v39  ;;  %v1722_v54 = vsel %vm838_vm3, %v1682_v30, %v1573_v56  ;;  %v1721_v36 = vsel %vm838_vm3, %v1681_v6, %v1571_v19  ;;  %v7657_v20 = vrot.slane %v6753_v13, 2 }
 0x20c   : > { %v1967_v58 = vrot.slane %v1722_v54, %v6799_v24  ;;  %v1944_v16 = vcombine.high %v1721_v36, %v1721_v36  ;;  %1624 = vrot.lane.b32.xlu1 %v1547_v46, %s5805_s15  ;;  %v1951_v3 = vrot.slane %v1721_v36, %v6799_v24  ;;  %v6924_v55 = vcombine.low %v2540_v43, %v2547_v45 }
 0x20d   : > { %v1495_v38 = vsel %vm588_vm1, %v7657_v20, %v7656_v33  ;;  %v3149_v44 = vpack.c.bf16 %v2531_v9, %v2514_v22  ;;  %v1550_v0 = vrot.slane %v6898_v26, 2  ;;  %v1549_v48 = vsel %vm588_vm1, %v1546_v37, %v1548_v15 }
 0x20e   : > { %1566 = vrot.lane.b32.xlu0 %v1495_v38, %s5805_s15  ;;  %v1569_v7 = vpop.permute.xlu1 %1568  ;;  %v1377_v50 = vpop.permute.xlu0 %1376  ;;  %v1975_v10 = vcombine.high %v1967_v58, %v1967_v58  ;;  %v1958_v11 = vrot.slane %v1944_v16, %v6799_v24  ;;  %v1959_v28 = vcombine.high %v1951_v3, %v1951_v3  ;;  %v1358_v39 = vrot.slane %v6898_v26, 1 }
 0x20f   : > { %v1680_v35 = vsel %vm797_vm2, %v6519_v8, %v1377_v50  ;;  %5389 = vmatmul.mubr.msk.bf16.gmra.mrb[44].mxu0 %vm954_vm4, %v3149_v44  ;;  %v1357_v45 = vsel %vm379_vm0, %v1354_v53, %v1356_v32  ;;  %v1551_v56 = vsel %vm588_vm1, %v1548_v15, %v1550_v0  ;;  %v1960_v36 = vcombine.high %v1722_v54, %v1722_v54 }
 0x210   : > { %v1720_v46 = vsel %vm838_vm3, %v1680_v35, %v1569_v7  ;;  %1626 = vrot.lane.b32.xlu1 %v1549_v48, %s5805_s15  ;;  %5392 = vmatprep.mubr.msk.bf16.mxu0 %vm5807_vm5, %v7654_v61  ;;  %v2618_v19 = vcombine.low %v1967_v58, %v1975_v10  ;;  %v2617_v22 = vcombine.low %v1959_v28, %v1958_v11 }
 0x211   : > { %v1927_v37 = vcombine.high %v1720_v46, %v1720_v46  ;;  %v6941_v30 = vrot.slane %v1720_v46, %v6799_v24  ;;  %v1359_v9 = vsel %vm379_vm0, %v1356_v32, %v1358_v39  ;;  %v1974_v54 = vrot.slane %v1960_v36, %v6799_v24 }
 0x212   : > { %1434 = vrot.lane.b32.xlu0 %v1357_v45, %s5804_s14  ;;  %v1581_v8 = vpop.permute.xlu1 %1580  ;;  %v1389_v6 = vpop.permute.xlu0 %1388  ;;  %v2632_v15 = vrot.slane %v2618_v19, %v6799_v24  ;;  %v2625_v58 = vrot.slane %v2617_v22, %v6799_v24 }
 0x213   : > { %v1941_v43 = vrot.slane %v1927_v37, %v6799_v24  ;;  %v1942_v53 = vcombine.high %v6941_v30, %v6941_v30  ;;  %v1686_v7 = vsel %vm797_vm2, %v6529_v14, %v1389_v6  ;;  %v1976_v6 = vcombine.high %v1974_v54, %v1974_v54 }
 0x214   : > { %1628 = vrot.lane.b32.xlu1 %v1551_v56, %s5805_s15  ;;  %v6965_v35 = vsel %vm838_vm3, %v1686_v7, %v1581_v8  ;;  %v2633_v46 = vcombine.low %v2625_v58, %v2632_v15 }
 0x215   : > { %v1943_v16 = vcombine.high %v1941_v43, %v1941_v43  ;;  %v2600_v33 = vcombine.low %v1942_v53, %v1941_v43  ;;  %v2035_v43 = vrot.slane %v6965_v35, %v6799_v24  ;;  %v2634_v15 = vcombine.low %v1974_v54, %v1976_v6 }
 0x216   : > { %1436 = vrot.lane.b32.xlu0 %v1359_v9, %s5804_s14  ;;  %v1575_v20 = vpop.permute.xlu1 %1574  ;;  %v1383_v38 = vpop.permute.xlu0 %1382 }
 0x217   : > { %v2601_v44 = vcombine.low %v1943_v16, %v1951_v3  ;;  %v1683_v50 = vsel %vm797_vm2, %v6490_v1, %v1383_v38  ;;  %v2608_v32 = vrot.slane %v2600_v33, %v6799_v24 }
 0x218   : > { %1630 = vrot.lane.b32.xlu1 %v1550_v0, %s5805_s15  ;;  %v1723_v48 = vsel %vm838_vm3, %v1683_v50, %v1575_v20  ;;  %v2043_v50 = vcombine.high %v2035_v43, %v2035_v43 }
 0x219   : > { %v2615_v10 = vrot.slane %v2601_v44, %v6799_v24  ;;  %v1977_v11 = vcombine.high %v1723_v48, %v1723_v48  ;;  %v1984_v3 = vrot.slane %v1723_v48, %v6799_v24 }
 0x21a   : > { %1438 = vrot.lane.b32.xlu0 %v1358_v39, %s5804_s14  ;;  %v1577_v28 = vpop.permute.xlu1 %1576  ;;  %v1385_v14 = vpop.permute.xlu0 %1384  ;;  %v2686_v6 = vcombine.low %v2035_v43, %v2043_v50  ;;  %v2028_v43 = vcombine.high %v6965_v35, %v6965_v35  ;;  %s5139_s14 = sshll.u32 %s274_s19, 4  ;;  %s7591_s14 = int_to_ptr.vmem [resolvable:$true] %s5139_s14 }
 0x21b   : > { %v1684_v1 = vsel %vm797_vm2, %v6534_v27, %v1385_v14  ;;  %v2616_v0 = vcombine.low %v2608_v32, %v2615_v10  ;;  %v1991_v45 = vrot.slane %v1977_v11, %v6799_v24  ;;  %v1992_v37 = vcombine.high %v1984_v3, %v1984_v3  ;;  %s5740_s28 = scalar_lea.vmem %s7591_s14, 128  ;;  %p5747_p0 = scmp.lt.s32.totalorder %s7591_s14, %s5745_s29 }
 0x21c   : > { %v1724_v39 = vsel %vm838_vm3, %v1684_v1, %v1577_v28  ;;  %v2642_v1 = vrot.slane %v2634_v15, %v6799_v24  ;;  %p5741_p11 = scmp.ne.s32.totalorder %s7591_s14, %s5740_s28  ;;  %p5748_p1 = scmp.lt.s32.totalorder %s5746_s8, %s5740_s28 }
 0x21d   : > { %v1994_v56 = vcombine.high %v1724_v39, %v1724_v39  ;;  %v2001_v19 = vrot.slane %v1724_v39, %v6799_v24  ;;  %v3152_v22 = vpack.c.bf16 %v2633_v46, %v2616_v0  ;;  %v1993_v8 = vcombine.high %v1991_v45, %v1991_v45 }
 0x21e   : > { %v1579_v53 = vpop.permute.xlu1 %1578  ;;  %v1387_v9 = vpop.permute.xlu0 %1386  ;;  %v2635_v36 = vcombine.low %v1984_v3, %v1992_v37  ;;  %p5742_p12 = pnand %p5741_p11, %p5888_p5  ;;  %p5749_p2 = por %p5748_p1, %p5747_p0 }
 0x21f   : > { %v2009_v27 = vcombine.high %v2001_v19, %v2001_v19  ;;  %v1685_v16 = vsel %vm797_vm2, %v6550_v5, %v1387_v9  ;;  %5401 = vmatmul.mubr.msk.bf16.vlgmr.msra.gmra.mrb[0].mxu1 %vm954_vm4, %v3152_v22  ;;  %v2651_v33 = vcombine.low %v1991_v45, %v1993_v8  ;;  %v2008_v20 = vrot.slane %v1994_v56, %v6799_v24 }
 0x220   : > { %v1725_v38 = vsel %vm838_vm3, %v1685_v16, %v1579_v53  ;;  %5404 = vmatprep.mubr.msk.bf16.mxu1 %vm5807_vm5, %v7654_v61  ;;  %v2649_v5 = vrot.slane %v2635_v36, %v6799_v24  ;;  %p5743_p13 = pneg %p5742_p12 }
 0x221   : > { %v2652_v58 = vcombine.low %v2001_v19, %v2009_v27  ;;  %v2011_v44 = vcombine.high %v1725_v38, %v1725_v38  ;;  %v2018_v7 = vrot.slane %v1725_v38, %v6799_v24  ;;  %v2659_v28 = vrot.slane %v2651_v33, %v6799_v24 }
 0x222   : > { %v1583_v32 = vpop.permute.xlu1 %1582  ;;  %v1391_v48 = vpop.permute.xlu0 %1390  ;;  %v2010_v14 = vcombine.high %v2008_v20, %v2008_v20  ;;  %v2650_v22 = vcombine.low %v2642_v1, %v2649_v5  ;;  %v2700_v33 = vrot.slane %v2686_v6, %v6799_v24  ;;  %p5750_p3 = pnand %p5749_p2, %p5743_p13 }
 0x223   : > { %v2666_v10 = vrot.slane %v2652_v58, %v6799_v24  ;;  %v2025_v11 = vrot.slane %v2011_v44, %v6799_v24  ;;  %v2026_v3 = vcombine.high %v2018_v7, %v2018_v7  ;;  %v1687_v54 = vsel %vm797_vm2, %v6574_v34, %v1391_v48 }
 0x224   : > { %v1727_v46 = vsel %vm838_vm3, %v1687_v54, %v1583_v32  ;;  %v2668_v8 = vcombine.low %v2008_v20, %v2010_v14 }
 0x225   : > { %v2027_v0 = vcombine.high %v2025_v11, %v2025_v11  ;;  %v2667_v39 = vcombine.low %v2659_v28, %v2666_v10  ;;  %v2669_v56 = vcombine.low %v2018_v7, %v2026_v3  ;;  %v2044_v9 = vcombine.high %v1727_v46, %v1727_v46 }
 0x226   : > { %v1591_v45 = vpop.permute.xlu1 %1590  ;;  %v1399_v37 = vpop.permute.xlu0 %1398  ;;  %v2051_v36 = vrot.slane %v1727_v46, %v6799_v24  ;;  %v2676_v15 = vrot.slane %v2668_v8, %v6799_v24  ;;  %v2042_v10 = vrot.slane %v2028_v43, %v6799_v24 }
 0x227   : > { %v2685_v19 = vcombine.low %v2025_v11, %v2027_v0  ;;  %v3153_v27 = vpack.c.bf16 %v2667_v39, %v2650_v22  ;;  %v2683_v38 = vrot.slane %v2669_v56, %v6799_v24  ;;  %v2058_v58 = vrot.slane %v2044_v9, %v6799_v24 }
 0x228   : > { %v2059_v44 = vcombine.high %v2051_v36, %v2051_v36  ;;  %v2702_v54 = vcombine.low %v2042_v10, %v2051_v36  ;;  %v1691_v1 = vsel %vm797_vm2, %v6602_v18, %v1399_v37 }
 0x229   : > { %v2693_v53 = vrot.slane %v2685_v19, %v6799_v24  ;;  %5405 = vmatmul.mubr.msk.bf16.gmra.mrb[4].mxu1 %vm954_vm4, %v3153_v27  ;;  %v2684_v35 = vcombine.low %v2676_v15, %v2683_v38  ;;  %v2060_v46 = vcombine.high %v2058_v58, %v2058_v58  ;;  %v1731_v37 = vsel %vm838_vm3, %v1691_v1, %v1591_v45 }
 0x22a   : > { %v1589_v34 = vpop.permute.xlu1 %1588  ;;  %v1397_v16 = vpop.permute.xlu0 %1396  ;;  %5408 = vmatprep.mubr.msk.bf16.mxu1 %vm5807_vm5, %v7654_v61  ;;  %v2703_v11 = vcombine.low %v2059_v44, %v2058_v58  ;;  %v2710_v36 = vrot.slane %v2702_v54, %v6799_v24  ;;  %v2112_v58 = vcombine.high %v1731_v37, %v1731_v37  ;;  %v2119_v45 = vrot.slane %v1731_v37, %v6799_v24 }
 0x22b   : > { %v1690_v20 = vsel %vm797_vm2, %v6600_v12, %v1397_v16  ;;  %v2701_v7 = vcombine.low %v2693_v53, %v2700_v33 }
 0x22c   : > { %v1730_v48 = vsel %vm838_vm3, %v1690_v20, %v1589_v34  ;;  %v2717_v18 = vrot.slane %v2703_v11, %v6799_v24  ;;  %v2126_v54 = vrot.slane %v2112_v58, %v6799_v24  ;;  %v2127_v1 = vcombine.high %v2119_v45, %v2119_v45 }
 0x22d   : > { %v3154_v14 = vpack.c.bf16 %v2701_v7, %v2684_v35  ;;  %v2095_v0 = vcombine.high %v1730_v48, %v1730_v48 }
 0x22e   : > { %v1585_v50 = vpop.permute.xlu1 %1584  ;;  %v1393_v32 = vpop.permute.xlu0 %1392 }
 0x22f   : > { %v1688_v5 = vsel %vm797_vm2, %v6576_v59, %v1393_v32  ;;  %v2102_v59 = vrot.slane %v1730_v48, %v6799_v24  ;;  %v2109_v27 = vrot.slane %v2095_v0, %v6799_v24 }
 0x230   : > { %v1728_v12 = vsel %vm838_vm3, %v1688_v5, %v1585_v50  ;;  %v2718_v50 = vcombine.low %v2710_v36, %v2717_v18 }
 0x231   : > { %v2061_v3 = vcombine.high %v1728_v12, %v1728_v12  ;;  %v2068_v28 = vrot.slane %v1728_v12, %v6799_v24  ;;  %5409 = vmatmul.mubr.msk.bf16.gmra.mrb[8].mxu1 %vm954_vm4, %v3154_v14 }
 0x232   : > { %v1587_v39 = vpop.permute.xlu1 %1586  ;;  %v1395_v6 = vpop.permute.xlu0 %1394  ;;  %5412 = vmatprep.mubr.msk.bf16.mxu1 %vm5807_vm5, %v7654_v61 }
 0x233   : > { %v2075_v56 = vrot.slane %v2061_v3, %v6799_v24  ;;  %v2076_v19 = vcombine.high %v2068_v28, %v2068_v28  ;;  %v2719_v22 = vcombine.low %v2060_v46, %v2068_v28  ;;  %v1689_v8 = vsel %vm797_vm2, %v6610_v31, %v1395_v6 }
 0x234   : > { %v1729_v9 = vsel %vm838_vm3, %v1689_v8, %v1587_v39  ;;  %v2110_v31 = vcombine.high %v2102_v59, %v2102_v59  ;;  %v2111_v46 = vcombine.high %v2109_v27, %v2109_v27 }
 0x235   : > { %v2720_v53 = vcombine.low %v2076_v19, %v2075_v56  ;;  %v2078_v34 = vcombine.high %v1729_v9, %v1729_v9  ;;  %v2085_v16 = vrot.slane %v1729_v9, %v6799_v24  ;;  %v2727_v43 = vrot.slane %v2719_v22, %v6799_v24 }
 0x236   : > { %v1405_v33 = vpop.permute.xlu1 %1404  ;;  %v1401_v38 = vpop.permute.xlu0 %1400  ;;  %v2077_v15 = vcombine.high %v2075_v56, %v2075_v56  ;;  %v2754_v11 = vcombine.low %v2110_v31, %v2109_v27 }
 0x237   : > { %v2734_v20 = vrot.slane %v2720_v53, %v6799_v24  ;;  %v2092_v44 = vrot.slane %v2078_v34, %v6799_v24  ;;  %v2093_v7 = vcombine.high %v2085_v16, %v2085_v16  ;;  %v1694_v35 = vsel %vm797_vm2, %v6643_v62, %v1405_v33 }
 0x238   : > { %v2736_v3 = vcombine.low %v2077_v15, %v2085_v16  ;;  %v1692_v6 = vsel %vm797_vm2, %v6645_v4, %v1401_v38  ;;  %v2771_v4 = vcombine.low %v2127_v1, %v2126_v54 }
 0x239   : > { %v2735_v32 = vcombine.low %v2727_v43, %v2734_v20  ;;  %v2094_v48 = vcombine.high %v2092_v44, %v2092_v44  ;;  %v2737_v5 = vcombine.low %v2093_v7, %v2092_v44 }
 0x23a   : > { %v1597_v10 = vpop.permute.xlu1 %1596  ;;  %v1403_v12 = vpop.permute.xlu0 %1402  ;;  %v2744_v18 = vrot.slane %v2736_v3, %v6799_v24 }
 0x23b   : > { %v1734_v28 = vsel %vm838_vm3, %v1694_v35, %v1597_v10  ;;  %v3155_v14 = vpack.c.bf16 %v2735_v32, %v2718_v50  ;;  %v2753_v0 = vcombine.low %v2094_v48, %v2102_v59  ;;  %v2751_v39 = vrot.slane %v2737_v5, %v6799_v24 }
 0x23c   : > { %v2162_v62 = vcombine.high %v1734_v28, %v1734_v28  ;;  %v1693_v56 = vsel %vm797_vm2, %v6649_v63, %v1403_v12  ;;  %v2768_v59 = vrot.slane %v2754_v11, %v6799_v24  ;;  %v2770_v63 = vcombine.low %v2111_v46, %v2119_v45 }
 0x23d   : > { %5413 = vmatmul.mubr.msk.bf16.gmra.mrb[12].mxu1 %vm954_vm4, %v3155_v14  ;;  %v2761_v8 = vrot.slane %v2753_v0, %v6799_v24  ;;  %v2752_v34 = vcombine.low %v2744_v18, %v2751_v39  ;;  %v2169_v58 = vrot.slane %v1734_v28, %v6799_v24 }
 0x23e   : > { %v1593_v19 = vpop.permute.xlu1 %1592  ;;  %v1595_v22 = vpop.permute.xlu0 %1594  ;;  %5416 = vmatprep.mubr.msk.bf16.mxu1 %vm5807_vm5, %v7654_v61  ;;  %v2176_v33 = vrot.slane %v2162_v62, %v6799_v24  ;;  %v2778_v35 = vrot.slane %v2770_v63, %v6799_v24 }
 0x23f   : > { %v1732_v37 = vsel %vm838_vm3, %v1692_v6, %v1593_v19  ;;  %v1733_v53 = vsel %vm838_vm3, %v1693_v56, %v1595_v22  ;;  %v2769_v16 = vcombine.low %v2761_v8, %v2768_v59  ;;  %v2177_v14 = vcombine.high %v2169_v58, %v2169_v58 }
 0x240   : > { %v2128_v9 = vcombine.high %v1732_v37, %v1732_v37  ;;  %v2135_v36 = vrot.slane %v1732_v37, %v6799_v24  ;;  %v2145_v27 = vcombine.high %v1733_v53, %v1733_v53  ;;  %v2152_v43 = vrot.slane %v1733_v53, %v6799_v24 }
 0x241   : > { %v3156_v45 = vpack.c.bf16 %v2769_v16, %v2752_v34  ;;  %v2178_v10 = vcombine.high %v2176_v33, %v2176_v33  ;;  %v2821_v37 = vcombine.low %v2169_v58, %v2177_v14 }
 0x242   : > { %v2142_v38 = vrot.slane %v2128_v9, %v6799_v24  ;;  %v2143_v31 = vcombine.high %v2135_v36, %v2135_v36  ;;  %v1601_v20 = vpop.permute.xlu1 %1600  ;;  %v1409_v15 = vpop.permute.xlu0 %1408  ;;  %v2159_v44 = vrot.slane %v2145_v27, %v6799_v24  ;;  %v2160_v11 = vcombine.high %v2152_v43, %v2152_v43 }
 0x243   : > { %v1696_v7 = vsel %vm797_vm2, %v6683_v60, %v1409_v15  ;;  %v2785_v60 = vrot.slane %v2771_v4, %v6799_v24  ;;  %v2822_v56 = vcombine.low %v2176_v33, %v2178_v10 }
 0x244   : > { %v2144_v50 = vcombine.high %v2142_v38, %v2142_v38  ;;  %v2787_v32 = vcombine.low %v2135_v36, %v2143_v31  ;;  %v1736_v48 = vsel %vm838_vm3, %v1696_v7, %v1601_v20  ;;  %v2161_v5 = vcombine.high %v2159_v44, %v2159_v44 }
 0x245   : > { %5417 = vmatmul.mubr.msk.bf16.gmra.mrb[16].mxu1 %vm954_vm4, %v3156_v45  ;;  %v2203_v1 = vrot.slane %v1736_v48, %v6799_v24  ;;  %v2786_v62 = vcombine.low %v2778_v35, %v2785_v60  ;;  %v2804_v22 = vcombine.low %v2152_v43, %v2160_v11  ;;  %v2196_v34 = vcombine.high %v1736_v48, %v1736_v48 }
 0x246   : > { %v2788_v12 = vcombine.low %v2142_v38, %v2144_v50  ;;  %v1599_v3 = vpop.permute.xlu1 %1598  ;;  %v1407_v28 = vpop.permute.xlu0 %1406  ;;  %5420 = vmatprep.mubr.msk.bf16.mxu1 %vm5807_vm5, %v7654_v61  ;;  %v2805_v54 = vcombine.low %v2159_v44, %v2161_v5  ;;  %v2795_v0 = vrot.slane %v2787_v32, %v6799_v24  ;;  %v2836_v16 = vrot.slane %v2822_v56, %v6799_v24 }
 0x247   : > { %v1695_v39 = vsel %vm797_vm2, %v6647_v23, %v1407_v28  ;;  %v2211_v4 = vcombine.high %v2203_v1, %v2203_v1  ;;  %v2812_v33 = vrot.slane %v2804_v22, %v6799_v24  ;;  %v2210_v50 = vrot.slane %v2196_v34, %v6799_v24 }
 0x248   : > { %v2802_v46 = vrot.slane %v2788_v12, %v6799_v24  ;;  %v1735_v6 = vsel %vm838_vm3, %v1695_v39, %v1599_v3  ;;  %v2819_v53 = vrot.slane %v2805_v54, %v6799_v24 }
 0x249   : > { %v2179_v8 = vcombine.high %v1735_v6, %v1735_v6  ;;  %v2186_v36 = vrot.slane %v1735_v6, %v6799_v24  ;;  %v2855_v44 = vcombine.low %v2203_v1, %v2211_v4 }
 0x24a   : > { %v2803_v19 = vcombine.low %v2795_v0, %v2802_v46  ;;  %v1605_v59 = vpop.permute.xlu1 %1604  ;;  %v1413_v18 = vpop.permute.xlu0 %1412  ;;  %v2820_v58 = vcombine.low %v2812_v33, %v2819_v53 }
 0x24b   : > { %v1698_v9 = vsel %vm797_vm2, %v6691_v21, %v1413_v18  ;;  %v2193_v23 = vrot.slane %v2179_v8, %v6799_v24  ;;  %v2829_v21 = vrot.slane %v2821_v37, %v6799_v24  ;;  %v2194_v7 = vcombine.high %v2186_v36, %v2186_v36 }
 0x24c   : > { %v1738_v63 = vsel %vm838_vm3, %v1698_v9, %v1605_v59  ;;  %v3157_v27 = vpack.c.bf16 %v2803_v19, %v2786_v62  ;;  %v2863_v60 = vrot.slane %v2855_v44, %v6799_v24 }
 0x24d   : > { %v2195_v38 = vcombine.high %v2193_v23, %v2193_v23  ;;  %v2229_v31 = vcombine.high %v1738_v63, %v1738_v63  ;;  %v2236_v32 = vrot.slane %v1738_v63, %v6799_v24  ;;  %v2837_v35 = vcombine.low %v2829_v21, %v2836_v16 }
 0x24e   : > { %v1603_v43 = vpop.permute.xlu1 %1602  ;;  %5421 = vmatmul.mubr.msk.bf16.gmra.mrb[20].mxu1 %vm954_vm4, %v3157_v27  ;;  %v1411_v20 = vpop.permute.xlu0 %1410  ;;  %v2838_v14 = vcombine.low %v2186_v36, %v2194_v7 }
 0x24f   : > { %v1697_v15 = vsel %vm797_vm2, %v6704_v49, %v1411_v20  ;;  %5424 = vmatprep.mubr.msk.bf16.mxu1 %vm5807_vm5, %v7654_v61  ;;  %v2839_v10 = vcombine.low %v2193_v23, %v2195_v38  ;;  %v2243_v12 = vrot.slane %v2229_v31, %v6799_v24  ;;  %v3158_v1 = vpack.c.bf16 %v2837_v35, %v2820_v58 }
 0x250   : > { %v1737_v45 = vsel %vm838_vm3, %v1697_v15, %v1603_v43  ;;  %v2244_v0 = vcombine.high %v2236_v32, %v2236_v32  ;;  %v1876_v38 = vcombine.high %v6871_v52, %v6871_v52 }
 0x251   : > { %v2212_v48 = vcombine.high %v1737_v45, %v1737_v45  ;;  %v2219_v5 = vrot.slane %v1737_v45, %v6799_v24  ;;  %v2853_v62 = vrot.slane %v2839_v10, %v6799_v24  ;;  %v2245_v19 = vcombine.high %v2243_v12, %v2243_v12 }
 0x252   : > { %v1607_v49 = vpop.permute.xlu1 %1606  ;;  %v1415_v11 = vpop.permute.xlu0 %1414  ;;  %v2889_v4 = vcombine.low %v2244_v0, %v2243_v12  ;;  %v1890_v35 = vrot.slane %v1876_v38, %v6799_v24  ;;  %v1891_v10 = vcombine.high %v6883_v2, %v6883_v2 }
 0x253   : > { %v2226_v3 = vrot.slane %v2212_v48, %v6799_v24  ;;  %v2856_v28 = vcombine.low %v2210_v50, %v2219_v5  ;;  %v1699_v54 = vsel %vm797_vm2, %v6693_v47, %v1415_v11  ;;  %v2227_v56 = vcombine.high %v2219_v5, %v2219_v5 }
 0x254   : > { %v1739_v6 = vsel %vm838_vm3, %v1699_v54, %v1607_v49  ;;  %v2846_v47 = vrot.slane %v2838_v14, %v6799_v24  ;;  %v2897_v43 = vrot.slane %v2889_v4, %v6799_v24 }
 0x255   : > { %v2228_v46 = vcombine.high %v2226_v3, %v2226_v3  ;;  %v2870_v39 = vrot.slane %v2856_v28, %v6799_v24  ;;  %v2253_v22 = vrot.slane %v1739_v6, %v6799_v24  ;;  %v2872_v9 = vcombine.low %v2227_v56, %v2226_v3 }
 0x256   : > { %v1611_v8 = vpop.permute.xlu1 %1610  ;;  %5425 = vmatmul.mubr.msk.bf16.gmra.mrb[24].mxu1 %vm954_vm4, %v3158_v1  ;;  %v1419_v59 = vpop.permute.xlu0 %1418  ;;  %v2246_v36 = vcombine.high %v1739_v6, %v1739_v6  ;;  %v2854_v27 = vcombine.low %v2846_v47, %v2853_v62  ;;  %v2549_v62 = vcombine.low %v1891_v10, %v1890_v35  ;;  %v1892_v56 = vcombine.high %v1890_v35, %v1890_v35 }
 0x257   : > { %5428 = vmatprep.mubr.msk.bf16.mxu1 %vm5807_vm5, %v7654_v61  ;;  %v2873_v18 = vcombine.low %v2228_v46, %v2236_v32  ;;  %v2890_v37 = vcombine.low %v2245_v19, %v2253_v22  ;;  %v2871_v53 = vcombine.low %v2863_v60, %v2870_v39  ;;  %v1701_v31 = vsel %vm797_vm2, %v6733_v29, %v1419_v59 }
 0x258   : > { %v2880_v20 = vrot.slane %v2872_v9, %v6799_v24  ;;  %v2260_v21 = vrot.slane %v2246_v36, %v6799_v24  ;;  %v2261_v7 = vcombine.high %v2253_v22, %v2253_v22  ;;  %v1741_v29 = vsel %vm838_vm3, %v1701_v31, %v1611_v8 }
 0x259   : > { %v2904_v34 = vrot.slane %v2890_v37, %v6799_v24  ;;  %v3159_v16 = vpack.c.bf16 %v2871_v53, %v2854_v27  ;;  %v2887_v33 = vrot.slane %v2873_v18, %v6799_v24  ;;  %v2287_v3 = vrot.slane %v1741_v29, %v6799_v24 }
 0x25a   : > { %v1613_v23 = vpop.permute.xlu1 %1612  ;;  %v1421_v63 = vpop.permute.xlu0 %1420  ;;  %v2906_v11 = vcombine.low %v2261_v7, %v2260_v21  ;;  %v2280_v59 = vcombine.high %v1741_v29, %v1741_v29 }
 0x25b   : > { %v1702_v15 = vsel %vm797_vm2, %v6735_v57, %v1421_v63  ;;  %v2888_v50 = vcombine.low %v2880_v20, %v2887_v33  ;;  %v2905_v32 = vcombine.low %v2897_v43, %v2904_v34  ;;  %v7658_v43 = vld [vmem:[#allocation6_spill] sm:$0xff] }
 0x25c   : > { %v1742_v48 = vsel %vm838_vm3, %v1702_v15, %v1613_v23  ;;  %v2914_v18 = vrot.slane %v2906_v11, %v6799_v24  ;;  %v2557_v23 = vrot.slane %v2549_v62, %v6799_v24  ;;  %v2294_v34 = vrot.slane %v2280_v59, %v6799_v24  ;;  %v7661_v59 = vld [vmem:[#allocation8_spill] sm:$0xff] }
 0x25d   : > { %v2296_v14 = vcombine.high %v1742_v48, %v1742_v48  ;;  %v3160_v0 = vpack.c.bf16 %v2905_v32, %v2888_v50  ;;  %v2303_v46 = vrot.slane %v1742_v48, %v6799_v24 }
 0x25e   : > { %v1609_v58 = vpop.permute.xlu1 %1608  ;;  %5429 = vmatmul.mubr.msk.bf16.gmra.mrb[28].mxu1 %vm954_vm4, %v3159_v16  ;;  %v1417_v44 = vpop.permute.xlu0 %1416  ;;  %v2295_v16 = vcombine.high %v2287_v3, %v2287_v3 }
 0x25f   : > { %v1700_v52 = vsel %vm797_vm2, %v6715_v40, %v1417_v44  ;;  %5432 = vmatprep.mubr.msk.bf16.mxu1 %vm5807_vm5, %v7654_v61  ;;  %v2262_v40 = vcombine.high %v2260_v21, %v2260_v21  ;;  %v2310_v53 = vrot.slane %v2296_v14, %v6799_v24  ;;  %v2311_v4 = vcombine.high %v2303_v46, %v2303_v46  ;;  %v7659_v21 = vld [vmem:[#allocation5_spill] sm:$0xff] }
 0x260   : > { %v1740_v45 = vsel %vm838_vm3, %v1700_v52, %v1609_v58 }
 0x261   : > { %v2263_v57 = vcombine.high %v1740_v45, %v1740_v45  ;;  %v2270_v5 = vrot.slane %v1740_v45, %v6799_v24  ;;  %v2312_v44 = vcombine.high %v2310_v53, %v2310_v53  ;;  %v2941_v7 = vcombine.low %v2303_v46, %v2311_v4 }
 0x262   : > { %v1565_v12 = vpop.permute.xlu1 %1564  ;;  %v1373_v49 = vpop.permute.xlu0 %1372 }
 0x263   : > { %v2277_v28 = vrot.slane %v2263_v57, %v6799_v24  ;;  %v2278_v60 = vcombine.high %v2270_v5, %v2270_v5  ;;  %v2907_v54 = vcombine.low %v2262_v40, %v2270_v5  ;;  %v1678_v1 = vsel %vm797_vm2, %v6468_v51, %v1373_v49 }
 0x264   : > { %v7125_v2 = vsel %vm838_vm3, %v1678_v1, %v1565_v12  ;;  %v2940_v57 = vcombine.low %v2295_v16, %v2294_v34  ;;  %v7660_v12 = vld [vmem:[#allocation7_spill] sm:$0xff]  ;;  %v2955_v11 = vrot.slane %v2941_v7, %v6799_v24 }
 0x265   : > { %v2279_v39 = vcombine.high %v2277_v28, %v2277_v28  ;;  %v2923_v6 = vcombine.low %v2278_v60, %v2277_v28  ;;  %v7129_v19 = vrot.slane %v7125_v2, %v6799_v24  ;;  %v2921_v51 = vrot.slane %v2907_v54, %v6799_v24 }
 0x266   : > { %v1429_v22 = vpop.permute.xlu1 %1428  ;;  %5433 = vmatmul.mubr.msk.bf16.gmra.mrb[32].mxu1 %vm954_vm4, %v3160_v0  ;;  %v1621_v8 = vpop.permute.xlu0 %1620  ;;  %v1893_v28 = vcombine.high %v7125_v2, %v7125_v2  ;;  %v2948_v0 = vrot.slane %v2940_v57, %v6799_v24 }
 0x267   : > { %v2924_v47 = vcombine.low %v2279_v39, %v2287_v3  ;;  %5436 = vmatprep.mubr.msk.bf16.mxu1 %vm5807_vm5, %v7654_v61  ;;  %v2550_v37 = vcombine.low %v1892_v56, %v7129_v19  ;;  %v2931_v9 = vrot.slane %v2923_v6, %v6799_v24  ;;  %v2922_v38 = vcombine.low %v2914_v18, %v2921_v51 }
 0x268   : > { %v1706_v20 = vsel %vm797_vm2, %v7658_v43, %v1429_v22  ;;  %v7173_v51 = vrot.slane %v1893_v28, %v6799_v24 }
 0x269   : > { %v2938_v36 = vrot.slane %v2924_v47, %v6799_v24  ;;  %v2564_v63 = vrot.slane %v2550_v37, %v6799_v24  ;;  %v1746_v5 = vsel %vm838_vm3, %v1706_v20, %v1621_v8 }
 0x26a   : > { %v1615_v27 = vpop.permute.xlu1 %1614  ;;  %v2371_v46 = vrot.slane %v1746_v5, %v6799_v24  ;;  %v2364_v34 = vcombine.high %v1746_v5, %v1746_v5 }
 0x26b   : > { %v1423_v33 = vpop.permute.xlu0 %1422  ;;  %v2939_v31 = vcombine.low %v2931_v9, %v2938_v36  ;;  %v2565_v58 = vcombine.low %v2557_v23, %v2564_v63 }
 0x26c   : > { %v1703_v15 = vsel %vm797_vm2, %v7659_v21, %v1423_v33  ;;  %v2379_v16 = vcombine.high %v2371_v46, %v2371_v46 }
 0x26d   : > { %v1743_v52 = vsel %vm838_vm3, %v1703_v15, %v1615_v27  ;;  %v3161_v29 = vpack.c.bf16 %v2939_v31, %v2922_v38  ;;  %v3150_v48 = vpack.c.bf16 %v2565_v58, %v6924_v55  ;;  %v2957_v55 = vcombine.low %v2310_v53, %v2312_v44 }
 0x26e   : > { %v2313_v45 = vcombine.high %v1743_v52, %v1743_v52  ;;  %v2320_v50 = vrot.slane %v1743_v52, %v6799_v24  ;;  %v1617_v32 = vpop.permute.xlu1 %1616  ;;  %v2956_v53 = vcombine.low %v2948_v0, %v2955_v11  ;;  %v1908_v27 = vcombine.high %v7129_v19, %v7129_v19 }
 0x26f   : > { %v1425_v35 = vpop.permute.xlu0 %1424  ;;  %5437 = vmatmul.mubr.msk.bf16.gmra.mrb[36].mxu1 %vm954_vm4, %v3161_v29  ;;  %5393 = vmatmul.mubr.msk.bf16.gmra.mrb[48].mxu0 %vm954_vm4, %v3150_v48  ;;  %v2965_v8 = vrot.slane %v2957_v55, %v6799_v24  ;;  %v2378_v19 = vrot.slane %v2364_v34, %v6799_v24  ;;  %v3009_v29 = vcombine.low %v2371_v46, %v2379_v16 }
 0x270   : > { %v2327_v10 = vrot.slane %v2313_v45, %v6799_v24  ;;  %v2328_v40 = vcombine.high %v2320_v50, %v2320_v50  ;;  %v1704_v49 = vsel %vm797_vm2, %v7660_v12, %v1425_v35  ;;  %5440 = vmatprep.mubr.msk.bf16.mxu1 %vm5807_vm5, %v7654_v61  ;;  %5396 = vmatprep.mubr.msk.bf16.mxu0 %vm5807_vm5, %v7654_v61 }
 0x271   : > { %v1744_v3 = vsel %vm838_vm3, %v1704_v49, %v1617_v32  ;;  %v7183_v52 = vcombine.low %v1908_v27, %v7173_v51 }
 0x272   : > { %v2958_v60 = vcombine.low %v2320_v50, %v2328_v40  ;;  %v2330_v14 = vcombine.high %v1744_v3, %v1744_v3  ;;  %v2337_v54 = vrot.slane %v1744_v3, %v6799_v24  ;;  %v1619_v1 = vpop.permute.xlu1 %1618  ;;  %v2329_v6 = vcombine.high %v2327_v10, %v2327_v10 }
 0x273   : > { %v1427_v39 = vpop.permute.xlu0 %1426 }
 0x274   : > { %v2972_v62 = vrot.slane %v2958_v60, %v6799_v24  ;;  %v2344_v56 = vrot.slane %v2330_v14, %v6799_v24  ;;  %v2345_v22 = vcombine.high %v2337_v54, %v2337_v54  ;;  %v1705_v2 = vsel %vm797_vm2, %v7661_v59, %v1427_v39 }
 0x275   : > { %v1745_v18 = vsel %vm838_vm3, %v1705_v2, %v1619_v1  ;;  %v2974_v33 = vcombine.low %v2327_v10, %v2329_v6 }
 0x276   : > { %v2346_v47 = vcombine.high %v2344_v56, %v2344_v56  ;;  %v1623_v37 = vpop.permute.xlu1 %1622  ;;  %v2975_v4 = vcombine.low %v2337_v54, %v2345_v22  ;;  %v2347_v9 = vcombine.high %v1745_v18, %v1745_v18  ;;  %v2354_v36 = vrot.slane %v1745_v18, %v6799_v24 }
 0x277   : > { %v1375_v23 = vpop.permute.xlu0 %1374  ;;  %v2973_v63 = vcombine.low %v2965_v8, %v2972_v62  ;;  %v2982_v50 = vrot.slane %v2974_v33, %v6799_v24  ;;  %v3023_v22 = vrot.slane %v3009_v29, %v6799_v24 }
 0x278   : > { %v2991_v38 = vcombine.low %v2344_v56, %v2346_v47  ;;  %v2361_v31 = vrot.slane %v2347_v9, %v6799_v24  ;;  %v2362_v43 = vcombine.high %v2354_v36, %v2354_v36  ;;  %v2989_v15 = vrot.slane %v2975_v4, %v6799_v24 }
 0x279   : > { %v3162_v20 = vpack.c.bf16 %v2973_v63, %v2956_v53 }
 0x27a   : > { %v1433_v21 = vpop.permute.xlu1 %1432  ;;  %v2363_v58 = vcombine.high %v2361_v31, %v2361_v31  ;;  %v2992_v44 = vcombine.low %v2354_v36, %v2362_v43  ;;  %v2999_v32 = vrot.slane %v2991_v38, %v6799_v24  ;;  %v2990_v55 = vcombine.low %v2982_v50, %v2989_v15 }
 0x27b   : > { %5441 = vmatmul.mubr.msk.bf16.gmra.mrb[40].mxu1 %vm954_vm4, %v3162_v20  ;;  %v1708_v35 = vsel %vm797_vm2, %v6826_v17, %v1433_v21  ;;  %v1909_v17 = vcombine.high %v7173_v51, %v7173_v51 }
 0x27c   : > { %v1431_v7 = vpop.permute.xlu0 %1430  ;;  %5444 = vmatprep.mubr.msk.bf16.mxu1 %vm5807_vm5, %v7654_v61  ;;  %v3006_v48 = vrot.slane %v2992_v44, %v6799_v24  ;;  %v3008_v5 = vcombine.low %v2361_v31, %v2363_v58 }
 0x27d   : > { %v1707_v45 = vsel %vm797_vm2, %v6787_v41, %v1431_v7  ;;  %v1679_v41 = vsel %vm797_vm2, %v6753_v13, %v1375_v23 }
 0x27e   : > { %v1747_v57 = vsel %vm838_vm3, %v1707_v45, %v1623_v37  ;;  %v1625_v12 = vpop.permute.xlu1 %1624  ;;  %v3007_v3 = vcombine.low %v2999_v32, %v3006_v48  ;;  %v3016_v13 = vrot.slane %v3008_v5, %v6799_v24 }
 0x27f   : > { %v2380_v10 = vcombine.high %v1747_v57, %v1747_v57  ;;  %v2387_v40 = vrot.slane %v1747_v57, %v6799_v24  ;;  %v1748_v49 = vsel %vm838_vm3, %v1708_v35, %v1625_v12 }
 0x280   : > { %v1567_v11 = vpop.permute.xlu0 %1566  ;;  %v2397_v54 = vcombine.high %v1748_v49, %v1748_v49  ;;  %v2404_v1 = vrot.slane %v1748_v49, %v6799_v24  ;;  %v3163_v46 = vpack.c.bf16 %v3007_v3, %v2990_v55  ;;  %v3024_v16 = vcombine.low %v3016_v13, %v3023_v22 }
 0x281   : > { %v2394_v28 = vrot.slane %v2380_v10, %v6799_v24  ;;  %v2395_v60 = vcombine.high %v2387_v40, %v2387_v40  ;;  %v3025_v14 = vcombine.low %v2378_v19, %v2387_v40  ;;  %v1719_v0 = vsel %vm838_vm3, %v1679_v41, %v1567_v11 }
 0x282   : > { %v2411_v62 = vrot.slane %v2397_v54, %v6799_v24  ;;  %v1627_v56 = vpop.permute.xlu1 %1626  ;;  %v2412_v8 = vcombine.high %v2404_v1, %v2404_v1  ;;  %v1910_v59 = vcombine.high %v1719_v0, %v1719_v0  ;;  %v1917_v2 = vrot.slane %v1719_v0, %v6799_v24 }
 0x283   : > { %v3026_v39 = vcombine.low %v2395_v60, %v2394_v28  ;;  %v2396_v6 = vcombine.high %v2394_v28, %v2394_v28  ;;  %5445 = vmatmul.mubr.msk.bf16.gmra.mrb[44].mxu1 %vm954_vm4, %v3163_v46  ;;  %v3033_v51 = vrot.slane %v3025_v14, %v6799_v24  ;;  %v2574_v19 = vrot.slane %v7183_v52, %v6799_v24 }
 0x284   : > { %v1435_v47 = vpop.permute.xlu0 %1434  ;;  %5448 = vmatprep.mubr.msk.bf16.mxu1 %vm5807_vm5, %v7654_v61  ;;  %v3043_v4 = vcombine.low %v2412_v8, %v2411_v62  ;;  %v1924_v9 = vrot.slane %v1910_v59, %v6799_v24  ;;  %v1925_v36 = vcombine.high %v1917_v2, %v1917_v2  ;;  %v2567_v23 = vcombine.low %v1909_v17, %v1917_v2 }
 0x285   : > { %v3040_v18 = vrot.slane %v3026_v39, %v6799_v24  ;;  %v3042_v37 = vcombine.low %v2396_v6, %v2404_v1  ;;  %v1709_v53 = vsel %vm797_vm2, %v6843_v42, %v1435_v47  ;;  %v2413_v63 = vcombine.high %v2411_v62, %v2411_v62 }
 0x286   : > { %v1749_v27 = vsel %vm838_vm3, %v1709_v53, %v1627_v56  ;;  %v1629_v34 = vpop.permute.xlu1 %1628  ;;  %v1926_v38 = vcombine.high %v1924_v9, %v1924_v9  ;;  %v2581_v31 = vrot.slane %v2567_v23, %v6799_v24  ;;  %v2583_v43 = vcombine.low %v1925_v36, %v1924_v9  ;;  %v7257_v53 = vld [vmem:[%s7635_s4] ss:$0 sm:$0xff] }
 0x287   : > { %v3041_v33 = vcombine.low %v3033_v51, %v3040_v18  ;;  %v2414_v42 = vcombine.high %v1749_v27, %v1749_v27  ;;  %v2421_v21 = vrot.slane %v1749_v27, %v6799_v24  ;;  %v3050_v44 = vrot.slane %v3042_v37, %v6799_v24 }
 0x288   : > { %v1437_v20 = vpop.permute.xlu0 %1436  ;;  %v3057_v7 = vrot.slane %v3043_v4, %v6799_v24  ;;  %v2584_v29 = vcombine.low %v1926_v38, %v6941_v30  ;;  %v2591_v5 = vrot.slane %v2583_v43, %v6799_v24  ;;  %v2582_v52 = vcombine.low %v2574_v19, %v2581_v31 }
 0x289   : > { %v1710_v15 = vsel %vm797_vm2, %v6835_v25, %v1437_v20  ;;  %v3164_v58 = vpack.c.bf16 %v3041_v33, %v3024_v16  ;;  %v2428_v45 = vrot.slane %v2414_v42, %v6799_v24  ;;  %v2429_v50 = vcombine.high %v2421_v21, %v2421_v21 }
 0x28a   : > { %v3059_v32 = vcombine.low %v2413_v63, %v2421_v21  ;;  %v1750_v48 = vsel %vm838_vm3, %v1710_v15, %v1629_v34  ;;  %v1631_v57 = vpop.permute.xlu1 %1630  ;;  %v2598_v25 = vrot.slane %v2584_v29, %v6799_v24  ;;  %v3058_v1 = vcombine.low %v3050_v44, %v3057_v7 }
 0x28b   : > { %v2431_v35 = vcombine.high %v1750_v48, %v1750_v48  ;;  %v2438_v10 = vrot.slane %v1750_v48, %v6799_v24  ;;  %5449 = vmatmul.mubr.msk.bf16.gmra.mrb[48].mxu1 %vm954_vm4, %v3164_v58  ;;  %v3060_v12 = vcombine.low %v2429_v50, %v2428_v45  ;;  %v2430_v30 = vcombine.high %v2428_v45, %v2428_v45 }
 0x28c   : > { %v1439_v40 = vpop.permute.xlu0 %1438  ;;  %5452 = vmatprep.mubr.msk.bf16.mxu1 %vm5807_vm5, %v7654_v61  ;;  %v2599_v3 = vcombine.low %v2591_v5, %v2598_v25  ;;  %v3067_v28 = vrot.slane %v3059_v32, %v6799_v24 }
 0x28d   : > { %v1711_v41 = vsel %vm797_vm2, %v6898_v26, %v1439_v40  ;;  %v2445_v49 = vrot.slane %v2431_v35, %v6799_v24  ;;  %v2446_v11 = vcombine.high %v2438_v10, %v2438_v10  ;;  %v3074_v60 = vrot.slane %v3060_v12, %v6799_v24 }
 0x28e   : > { %v1751_v55 = vsel %vm838_vm3, %v1711_v41, %v1631_v57  ;;  %v3151_v26 = vpack.c.bf16 %v2599_v3, %v2582_v52  ;;  %v3076_v46 = vcombine.low %v2430_v30, %v2438_v10 }
 0x28f   : > { %v2448_v14 = vcombine.high %v1751_v55, %v1751_v55  ;;  %v2455_v54 = vrot.slane %v1751_v55, %v6799_v24  ;;  %v3077_v17 = vcombine.low %v2446_v11, %v2445_v49  ;;  %v2447_v0 = vcombine.high %v2445_v49, %v2445_v49 }
 0x290   : > { %v3075_v6 = vcombine.low %v3067_v28, %v3074_v60  ;;  %5397 = vmatmul.mubr.msk.bf16.gmra.mrb[52].mxu0 %vm954_vm4, %v3151_v26  ;;  %v3084_v59 = vrot.slane %v3076_v46, %v6799_v24 }
 0x291   : > { %v2462_v13 = vrot.slane %v2448_v14, %v6799_v24  ;;  %v2463_v39 = vcombine.high %v2455_v54, %v2455_v54  ;;  %v3093_v62 = vcombine.low %v2447_v0, %v2455_v54  ;;  %v3091_v56 = vrot.slane %v3077_v17, %v6799_v24  ;;  %5464 = vmatprep.mubr.msk.bf16.mxu0 %vm5807_vm5, %v7654_v61 }
 0x292   : > { %v3165_v8 = vpack.c.bf16 %v3075_v6, %v3058_v1 }
 0x293   : > { %v3094_v22 = vcombine.low %v2463_v39, %v2462_v13  ;;  %v3101_v2 = vrot.slane %v3093_v62, %v6799_v24  ;;  %v3092_v51 = vcombine.low %v3084_v59, %v3091_v56 }
 0x294   : > { %5453 = vmatmul.mubr.msk.bf16.gmra.mrb[52].mxu1 %vm954_vm4, %v3165_v8 }
 0x295   : > { %v3108_v47 = vrot.slane %v3094_v22, %v6799_v24  ;;  %5456 = vmatprep.mubr.msk.bf16.mxu1 %vm5807_vm5, %v7654_v61 }
 0x297   : > { %v3109_v18 = vcombine.low %v3101_v2, %v3108_v47 }
 0x299   : > { %v3166_v37 = vpack.c.bf16 %v3109_v18, %v3092_v51 }
 0x29c   : > { %5457 = vmatmul.mubr.msk.bf16.gmra.mrb[56].mxu1 %vm954_vm4, %v3166_v37 }
 0x2d9   : > { %v3313_v4 = vpop.f32.mrb[40].mxu0 }
 0x2da   : > { %v3314_v9 = vadd.f32 %v7257_v53, %v3313_v4  ;;  %v5386_v36 = vpop.f32.mrb[41].mxu0 }
 0x2db   : > { %v3316_v23 = vpop.f32.mrb[42].mxu0 }
 0x2dc   : > { %v3464_v63 = vmax.f32 %v3314_v9, 0.0  ;;  %v3317_v27 = vadd.f32 %v7257_v53, %v3316_v23  ;;  %v5387_v34 = vpop.f32.mrb[43].mxu0 }
 0x2de   : > { %v3540_v16 = vcombine.high %v3464_v63, %v3464_v63  ;;  %v3547_v33 = vrot.slane %v3464_v63, %v6799_v24  ;;  %v3465_v38 = vmax.f32 %v3317_v27, 0.0 }
 0x2e0   : > { %v3554_v31 = vrot.slane %v3540_v16, %v6799_v24  ;;  %v3555_v43 = vcombine.high %v3547_v33, %v3547_v33  ;;  %v3557_v20 = vcombine.high %v3465_v38, %v3465_v38  ;;  %v3564_v42 = vrot.slane %v3465_v38, %v6799_v24 }
 0x2e2   : > { %v3556_v21 = vcombine.high %v3554_v31, %v3554_v31  ;;  %v4186_v15 = vcombine.low %v3547_v33, %v3555_v43  ;;  %v3571_v58 = vrot.slane %v3557_v20, %v6799_v24  ;;  %v3572_v44 = vcombine.high %v3564_v42, %v3564_v42  ;;  %v3321_v7 = vpop.f32.mrb[44].mxu0 }
 0x2e3   : > { %v3322_v19 = vadd.f32 %v7257_v53, %v3321_v7  ;;  %v5390_v29 = vpop.f32.mrb[45].mxu0 }
 0x2e4   : > { %v4187_v45 = vcombine.low %v3554_v31, %v3556_v21  ;;  %v3573_v50 = vcombine.high %v3571_v58, %v3571_v58  ;;  %v4203_v32 = vcombine.low %v3564_v42, %v3572_v44  ;;  %v3324_v48 = vpop.f32.mrb[46].mxu0  ;;  %v4194_v35 = vrot.slane %v4186_v15, %v6799_v24 }
 0x2e5   : > { %v3466_v57 = vmax.f32 %v3322_v19, 0.0  ;;  %v3325_v5 = vadd.f32 %v7257_v53, %v3324_v48  ;;  %v5391_v25 = vpop.f32.mrb[47].mxu0 }
 0x2e6   : > { %v4201_v10 = vrot.slane %v4187_v45, %v6799_v24  ;;  %v4204_v40 = vcombine.low %v3571_v58, %v3573_v50  ;;  %v4211_v49 = vrot.slane %v4203_v32, %v6799_v24 }
 0x2e7   : > { %v3574_v52 = vcombine.high %v3466_v57, %v3466_v57  ;;  %v3581_v12 = vrot.slane %v3466_v57, %v6799_v24  ;;  %v3467_v30 = vmax.f32 %v3325_v5, 0.0 }
 0x2e8   : > { %v4202_v41 = vcombine.low %v4194_v35, %v4201_v10  ;;  %v4218_v11 = vrot.slane %v4204_v40, %v6799_v24 }
 0x2e9   : > { %v3588_v55 = vrot.slane %v3574_v52, %v6799_v24  ;;  %v3589_v3 = vcombine.high %v3581_v12, %v3581_v12  ;;  %v3591_v28 = vcombine.high %v3467_v30, %v3467_v30  ;;  %v3598_v60 = vrot.slane %v3467_v30, %v6799_v24 }
 0x2ea   : > { %v4219_v14 = vcombine.low %v4211_v49, %v4218_v11  ;;  %v4898_v26 = vsel %vm797_vm2, %v4202_v41, 0.0 }
 0x2eb   : > { %v3590_v54 = vcombine.high %v3588_v55, %v3588_v55  ;;  %v4220_v1 = vcombine.low %v3581_v12, %v3589_v3  ;;  %v3605_v17 = vrot.slane %v3591_v28, %v6799_v24  ;;  %v3606_v0 = vcombine.high %v3598_v60, %v3598_v60 }
 0x2ec   : > { %v4899_v46 = vsel %vm797_vm2, %v4219_v14, 0.0 }
 0x2ed   : > { %v4900_v13 = vadd.f32 %v4899_v46, %v4898_v26  ;;  %v4221_v39 = vcombine.low %v3588_v55, %v3590_v54  ;;  %v3607_v6 = vcombine.high %v3605_v17, %v3605_v17  ;;  %v4237_v62 = vcombine.low %v3598_v60, %v3606_v0 }
 0x2ee   : > { %v4228_v56 = vrot.slane %v4220_v1, %v6799_v24 }
 0x2ef   : > { %v4235_v22 = vrot.slane %v4221_v39, %v6799_v24  ;;  %v4238_v8 = vcombine.low %v3605_v17, %v3607_v6  ;;  %v4245_v2 = vrot.slane %v4237_v62, %v6799_v24 }
 0x2f1   : > { %v4236_v59 = vcombine.low %v4228_v56, %v4235_v22  ;;  %v4252_v47 = vrot.slane %v4238_v8, %v6799_v24 }
 0x2f2   : > { %v3345_v51 = vpop.f32.mrb[0].mxu1 }
 0x2f3   : > { %v4901_v18 = vsel %vm797_vm2, %v4236_v59, 0.0  ;;  %v4253_v37 = vcombine.low %v4245_v2, %v4252_v47  ;;  %v3346_v4 = vadd.f32 %v7257_v53, %v3345_v51  ;;  %v5402_v9 = vpop.f32.mrb[1].mxu1 }
 0x2f4   : > { %v4902_v36 = vadd.f32 %v4901_v18, %v4900_v13  ;;  %v3348_v23 = vpop.f32.mrb[2].mxu1 }
 0x2f5   : > { %v4903_v63 = vsel %vm797_vm2, %v4253_v37, 0.0  ;;  %v7284_v27 = vmax.f32 %v3346_v4, 0.0  ;;  %v3349_v34 = vadd.f32 %v7257_v53, %v3348_v23  ;;  %v5403_v16 = vpop.f32.mrb[3].mxu1 }
 0x2f6   : > { %v7287_v33 = vadd.f32 %v4903_v63, %v4902_v36 }
 0x2f7   : > { %v3676_v38 = vcombine.high %v7284_v27, %v7284_v27  ;;  %v3473_v31 = vmax.f32 %v3349_v34, 0.0 }
 0x2f9   : > { %v7292_v43 = vrot.slane %v3676_v38, %v6799_v24  ;;  %v3693_v20 = vcombine.high %v3473_v31, %v3473_v31  ;;  %v3700_v42 = vrot.slane %v3473_v31, %v6799_v24 }
 0x2fb   : > { %v3692_v21 = vcombine.high %v7292_v43, %v7292_v43  ;;  %v3708_v15 = vcombine.high %v3700_v42, %v3700_v42  ;;  %v3707_v58 = vrot.slane %v3693_v20, %v6799_v24 }
 0x2fc   : > { %v3353_v7 = vpop.f32.mrb[4].mxu1 }
 0x2fd   : > { %v4338_v44 = vcombine.low %v3692_v21, %v3700_v42  ;;  %v4352_v29 = vrot.slane %v3708_v15, %v6799_v24  ;;  %v3354_v45 = vadd.f32 %v7257_v53, %v3353_v7  ;;  %v5406_v50 = vpop.f32.mrb[5].mxu1  ;;  %v3709_v32 = vcombine.high %v3707_v58, %v3707_v58 }
 0x2fe   : > { %v3356_v48 = vpop.f32.mrb[6].mxu1 }
 0x2ff   : > { %v4345_v19 = vrot.slane %v4338_v44, %v6799_v24  ;;  %v3474_v5 = vmax.f32 %v3354_v45, 0.0  ;;  %v3357_v25 = vadd.f32 %v7257_v53, %v3356_v48  ;;  %v5407_v35 = vpop.f32.mrb[7].mxu1  ;;  %v4354_v12 = vcombine.low %v3707_v58, %v3709_v32 }
 0x301   : > { %v7301_v57 = vcombine.low %v4345_v19, %v4352_v29  ;;  %v3710_v10 = vcombine.high %v3474_v5, %v3474_v5  ;;  %v3717_v40 = vrot.slane %v3474_v5, %v6799_v24  ;;  %v3475_v52 = vmax.f32 %v3357_v25, 0.0 }
 0x302   : > { %v4362_v1 = vrot.slane %v4354_v12, %v6799_v24 }
 0x303   : > { %v3724_v30 = vrot.slane %v3710_v10, %v6799_v24  ;;  %v3725_v41 = vcombine.high %v3717_v40, %v3717_v40  ;;  %v3727_v49 = vcombine.high %v3475_v52, %v3475_v52  ;;  %v3734_v11 = vrot.slane %v3475_v52, %v6799_v24 }
 0x304   : > { %v3361_v55 = vpop.f32.mrb[8].mxu1 }
 0x305   : > { %v3726_v3 = vcombine.high %v3724_v30, %v3724_v30  ;;  %v4355_v28 = vcombine.low %v3717_v40, %v3725_v41  ;;  %v3741_v60 = vrot.slane %v3727_v49, %v6799_v24  ;;  %v3742_v14 = vcombine.high %v3734_v11, %v3734_v11  ;;  %v5410_v54 = vpop.f32.mrb[9].mxu1 }
 0x306   : > { %v3362_v17 = vadd.f32 %v7257_v53, %v3361_v55  ;;  %v3364_v0 = vpop.f32.mrb[10].mxu1 }
 0x307   : > { %v4369_v26 = vrot.slane %v4355_v28, %v6799_v24  ;;  %v4371_v46 = vcombine.low %v3724_v30, %v3726_v3  ;;  %v3743_v13 = vcombine.high %v3741_v60, %v3741_v60  ;;  %v4372_v39 = vcombine.low %v3734_v11, %v3742_v14  ;;  %v5411_v6 = vpop.f32.mrb[11].mxu1 }
 0x308   : > { %v3476_v62 = vmax.f32 %v3362_v17, 0.0  ;;  %v3365_v56 = vadd.f32 %v7257_v53, %v3364_v0 }
 0x309   : > { %v4370_v22 = vcombine.low %v4362_v1, %v4369_v26  ;;  %v4379_v8 = vrot.slane %v4371_v46, %v6799_v24  ;;  %v4386_v59 = vrot.slane %v4372_v39, %v6799_v24  ;;  %v4388_v37 = vcombine.low %v3741_v60, %v3743_v13 }
 0x30a   : > { %v3744_v2 = vcombine.high %v3476_v62, %v3476_v62  ;;  %v3751_v47 = vrot.slane %v3476_v62, %v6799_v24  ;;  %v3477_v51 = vmax.f32 %v3365_v56, 0.0 }
 0x30b   : > { %v4387_v18 = vcombine.low %v4379_v8, %v4386_v59  ;;  %v4929_v63 = vsel %vm797_vm2, %v4370_v22, 0.0  ;;  %v4396_v44 = vrot.slane %v4388_v37, %v6799_v24 }
 0x30c   : > { %v3758_v4 = vrot.slane %v3744_v2, %v6799_v24  ;;  %v3759_v9 = vcombine.high %v3751_v47, %v3751_v47  ;;  %v3761_v36 = vcombine.high %v3477_v51, %v3477_v51  ;;  %v3768_v23 = vrot.slane %v3477_v51, %v6799_v24 }
 0x30d   : > { %v4930_v34 = vsel %vm797_vm2, %v4387_v18, 0.0 }
 0x30e   : > { %v4931_v16 = vadd.f32 %v4930_v34, %v4929_v63  ;;  %v3760_v38 = vcombine.high %v3758_v4, %v3758_v4  ;;  %v4389_v31 = vcombine.low %v3751_v47, %v3759_v9  ;;  %v3775_v20 = vrot.slane %v3761_v36, %v6799_v24 }
 0x30f   : > { %v3776_v21 = vcombine.high %v3768_v23, %v3768_v23 }
 0x310   : > { %v3369_v42 = vpop.f32.mrb[12].mxu1  ;;  %v4403_v7 = vrot.slane %v4389_v31, %v6799_v24  ;;  %v4405_v19 = vcombine.low %v3758_v4, %v3760_v38  ;;  %v3777_v29 = vcombine.high %v3775_v20, %v3775_v20 }
 0x311   : > { %v3370_v15 = vadd.f32 %v7257_v53, %v3369_v42  ;;  %v5414_v58 = vpop.f32.mrb[13].mxu1  ;;  %v4406_v50 = vcombine.low %v3768_v23, %v3776_v21 }
 0x312   : > { %v3372_v45 = vpop.f32.mrb[14].mxu1  ;;  %v4404_v25 = vcombine.low %v4396_v44, %v4403_v7  ;;  %v4413_v35 = vrot.slane %v4405_v19, %v6799_v24  ;;  %v4422_v10 = vcombine.low %v3775_v20, %v3777_v29  ;;  %v5738_v58 = vld [vmem:[%s7636_s5 + $0x8] sm:$0xff]  }
 0x313   : > { %v3478_v32 = vmax.f32 %v3370_v15, 0.0  ;;  %v3373_v48 = vadd.f32 %v7257_v53, %v3372_v45  ;;  %v5415_v5 = vpop.f32.mrb[15].mxu1  ;;  %v4420_v40 = vrot.slane %v4406_v50, %v6799_v24 }
 0x314   : > { %v4932_v41 = vsel %vm797_vm2, %v4404_v25, 0.0  ;;  %v4429_v28 = vrot.slane %v4422_v10, %v6799_v24 }
 0x315   : > { %v3778_v52 = vcombine.high %v3478_v32, %v3478_v32  ;;  %v3785_v12 = vrot.slane %v3478_v32, %v6799_v24  ;;  %v3479_v30 = vmax.f32 %v3373_v48, 0.0  ;;  %v4933_v49 = vadd.f32 %v4932_v41, %v4931_v16  ;;  %v5737_v16 = vld [vmem:[%s7636_s5] sm:$0xff]  }
 0x316   : > { %v4421_v11 = vcombine.low %v4413_v35, %v4420_v40  ;;  %5461 = vmatpush3.bf16.msra.mxu0 %v5737_v16 }
 0x317   : > { %v3792_v55 = vrot.slane %v3778_v52, %v6799_v24  ;;  %v3793_v3 = vcombine.high %v3785_v12, %v3785_v12  ;;  %v4436_v60 = vrot.slane %v3785_v12, %v6799_v24  ;;  %v3795_v14 = vcombine.high %v3479_v30, %v3479_v30  ;;  %5462 = vmatprep.subr.bf16.mxu0 %v7654_v61 }
 0x318   : > { %v3802_v54 = vrot.slane %v3479_v30, %v6799_v24  ;;  %v3377_v1 = vpop.f32.mrb[16].mxu1  ;;  %v4934_v17 = vsel %vm797_vm2, %v4421_v11, 0.0 }
 0x319   : > { %v4438_v0 = vcombine.low %v3793_v3, %v3792_v55  ;;  %v3794_v26 = vcombine.high %v3792_v55, %v3792_v55  ;;  %v3378_v46 = vadd.f32 %v7257_v53, %v3377_v1  ;;  %v5418_v13 = vpop.f32.mrb[17].mxu1  ;;  %v4437_v39 = vcombine.low %v4429_v28, %v4436_v60 }
 0x31a   : > { %v4935_v6 = vadd.f32 %v4934_v17, %v4933_v49  ;;  %v3809_v62 = vrot.slane %v3795_v14, %v6799_v24  ;;  %v3810_v56 = vcombine.high %v3802_v54, %v3802_v54  ;;  %v3380_v22 = vpop.f32.mrb[18].mxu1  ;;  %5463 = vmatpush3.bf16.msra.mxu0 %v5738_v58 }
 0x31b   : > { %v4439_v8 = vcombine.low %v3794_v26, %v3802_v54  ;;  %v3480_v59 = vmax.f32 %v3378_v46, 0.0  ;;  %v3381_v2 = vadd.f32 %v7257_v53, %v3380_v22  ;;  %v5419_v47 = vpop.f32.mrb[19].mxu1  ;;  %v4446_v51 = vrot.slane %v4438_v0, %v6799_v24 }
 0x31c   : > { %v4936_v18 = vsel %vm4905_vm6, %v4437_v39, 0.0  ;;  %v4455_v37 = vcombine.low %v3810_v56, %v3809_v62  ;;  %v3811_v63 = vcombine.high %v3809_v62, %v3809_v62 }
 0x31d   : > { %v7338_v4 = vadd.f32 %v4936_v18, %v4935_v6  ;;  %v4453_v9 = vrot.slane %v4439_v8, %v6799_v24  ;;  %v3812_v36 = vcombine.high %v3480_v59, %v3480_v59  ;;  %v3819_v23 = vrot.slane %v3480_v59, %v6799_v24 }
 0x31e   : > { %v3481_v34 = vmax.f32 %v3381_v2, 0.0  ;;  %v4463_v44 = vrot.slane %v4455_v37, %v6799_v24 }
 0x31f   : > { %v4454_v38 = vcombine.low %v4446_v51, %v4453_v9  ;;  %v3826_v31 = vrot.slane %v3812_v36, %v6799_v24  ;;  %v3827_v20 = vcombine.high %v3819_v23, %v3819_v23  ;;  %v4456_v42 = vcombine.low %v3811_v63, %v3819_v23 }
 0x320   : > { %v3829_v21 = vcombine.high %v3481_v34, %v3481_v34  ;;  %v3836_v15 = vrot.slane %v3481_v34, %v6799_v24 }
 0x321   : > { %v4472_v7 = vcombine.low %v3827_v20, %v3826_v31  ;;  %v3828_v19 = vcombine.high %v3826_v31, %v3826_v31  ;;  %v3385_v29 = vpop.f32.mrb[20].mxu1  ;;  %v4470_v45 = vrot.slane %v4456_v42, %v6799_v24  ;;  %v4944_v10 = vsel %vm797_vm2, %v4454_v38, 0.0 }
 0x322   : > { %v3843_v50 = vrot.slane %v3829_v21, %v6799_v24  ;;  %v3844_v32 = vcombine.high %v3836_v15, %v3836_v15  ;;  %v3386_v48 = vadd.f32 %v7257_v53, %v3385_v29  ;;  %v5422_v5 = vpop.f32.mrb[21].mxu1 }
 0x323   : > { %v4473_v25 = vcombine.low %v3828_v19, %v3836_v15  ;;  %v3388_v35 = vpop.f32.mrb[22].mxu1  ;;  %v4471_v40 = vcombine.low %v4463_v44, %v4470_v45  ;;  %v4480_v30 = vrot.slane %v4472_v7, %v6799_v24 }
 0x324   : > { %v3482_v52 = vmax.f32 %v3386_v48, 0.0  ;;  %v5423_v12 = vpop.f32.mrb[23].mxu1  ;;  %v4489_v41 = vcombine.low %v3844_v32, %v3843_v50  ;;  %v3389_v49 = vadd.f32 %v7257_v53, %v3388_v35  ;;  %v3845_v55 = vcombine.high %v3843_v50, %v3843_v50 }
 0x325   : > { %v4487_v61 = vrot.slane %v4473_v25, %v6799_v24  ;;  %v4945_v11 = vsel %vm797_vm2, %v4471_v40, 0.0 }
 0x326   : > { %v3846_v3 = vcombine.high %v3482_v52, %v3482_v52  ;;  %v3853_v28 = vrot.slane %v3482_v52, %v6799_v24  ;;  %v4946_v60 = vadd.f32 %v4945_v11, %v4944_v10  ;;  %v3483_v54 = vmax.f32 %v3389_v49, 0.0 }
 0x327   : > { %v4488_v14 = vcombine.low %v4480_v30, %v4487_v61  ;;  %v4497_v26 = vrot.slane %v4489_v41, %v6799_v24 }
 0x328   : > { %v3860_v1 = vrot.slane %v3846_v3, %v6799_v24  ;;  %v3861_v17 = vcombine.high %v3853_v28, %v3853_v28  ;;  %v4490_v0 = vcombine.low %v3845_v55, %v3853_v28  ;;  %v3863_v13 = vcombine.high %v3483_v54, %v3483_v54 }
 0x329   : > { %v4947_v46 = vsel %vm797_vm2, %v4488_v14, 0.0  ;;  %v3870_v39 = vrot.slane %v3483_v54, %v6799_v24  ;;  %v3393_v6 = vpop.f32.mrb[24].mxu1 }
 0x32a   : > { %v4948_v62 = vadd.f32 %v4947_v46, %v4946_v60  ;;  %v3862_v56 = vcombine.high %v3860_v1, %v3860_v1  ;;  %v4504_v22 = vrot.slane %v4490_v0, %v6799_v24  ;;  %v4506_v8 = vcombine.low %v3861_v17, %v3860_v1  ;;  %v5426_v59 = vpop.f32.mrb[25].mxu1 }
 0x32b   : > { %v3877_v2 = vrot.slane %v3863_v13, %v6799_v24  ;;  %v3878_v47 = vcombine.high %v3870_v39, %v3870_v39  ;;  %v3394_v51 = vadd.f32 %v7257_v53, %v3393_v6  ;;  %v3396_v18 = vpop.f32.mrb[26].mxu1 }
 0x32c   : > { %v4505_v37 = vcombine.low %v4497_v26, %v4504_v22  ;;  %v4513_v9 = vrot.slane %v4506_v8, %v6799_v24  ;;  %v4520_v36 = vrot.slane %v3862_v56, %v6799_v24  ;;  %v3397_v23 = vadd.f32 %v7257_v53, %v3396_v18  ;;  %v5427_v63 = vpop.f32.mrb[27].mxu1 }
 0x32d   : > { %v3879_v34 = vcombine.high %v3877_v2, %v3877_v2  ;;  %v3484_v16 = vmax.f32 %v3394_v51, 0.0  ;;  %v4522_v21 = vcombine.low %v3870_v39, %v3878_v47 }
 0x32e   : > { %v4521_v38 = vcombine.low %v4513_v9, %v4520_v36  ;;  %v4949_v31 = vsel %vm797_vm2, %v4505_v37, 0.0  ;;  %v3485_v20 = vmax.f32 %v3397_v23, 0.0 }
 0x32f   : > { %v4950_v42 = vadd.f32 %v4949_v31, %v4948_v62  ;;  %v4523_v15 = vcombine.low %v3877_v2, %v3879_v34  ;;  %v3880_v58 = vcombine.high %v3484_v16, %v3484_v16  ;;  %v3887_v7 = vrot.slane %v3484_v16, %v6799_v24 }
 0x330   : > { %v4951_v44 = vsel %vm4905_vm6, %v4521_v38, 0.0  ;;  %v3897_v19 = vcombine.high %v3485_v20, %v3485_v20  ;;  %v3904_v29 = vrot.slane %v3485_v20, %v6799_v24  ;;  %v4530_v52 = vrot.slane %v4522_v21, %v6799_v24 }
 0x331   : > { %v7375_v45 = vadd.f32 %v4951_v44, %v4950_v42  ;;  %v4537_v50 = vrot.slane %v4523_v15, %v6799_v24  ;;  %v3894_v32 = vrot.slane %v3880_v58, %v6799_v24  ;;  %v3401_v48 = vpop.f32.mrb[28].mxu1  ;;  %v3895_v5 = vcombine.high %v3887_v7, %v3887_v7 }
 0x332   : > { %v3911_v25 = vrot.slane %v3897_v19, %v6799_v24  ;;  %v3912_v35 = vcombine.high %v3904_v29, %v3904_v29  ;;  %v3402_v10 = vadd.f32 %v7257_v53, %v3401_v48  ;;  %v5430_v40 = vpop.f32.mrb[29].mxu1  ;;  %v7397_v20 = vrot.slane %v7284_v27, %v6799_v24 }
 0x333   : > { %v3896_v12 = vcombine.high %v3894_v32, %v3894_v32  ;;  %v3404_v30 = vpop.f32.mrb[30].mxu1  ;;  %v4539_v61 = vcombine.low %v3887_v7, %v3895_v5  ;;  %v4538_v60 = vcombine.low %v4530_v52, %v4537_v50 }
 0x334   : > { %v3913_v41 = vcombine.high %v3911_v25, %v3911_v25  ;;  %v4556_v49 = vcombine.low %v3904_v29, %v3912_v35  ;;  %v3486_v11 = vmax.f32 %v3402_v10, 0.0  ;;  %v5431_v55 = vpop.f32.mrb[31].mxu1  ;;  %v3405_v28 = vadd.f32 %v7257_v53, %v3404_v30 }
 0x335   : > { %v4540_v3 = vcombine.low %v3894_v32, %v3896_v12  ;;  %v4547_v1 = vrot.slane %v4539_v61, %v6799_v24  ;;  %v4959_v18 = vsel %vm797_vm2, %v4538_v60, 0.0  ;;  %v3691_v10 = vcombine.high %v7397_v20, %v7397_v20 }
 0x336   : > { %v4557_v14 = vcombine.low %v3911_v25, %v3913_v41  ;;  %v3914_v54 = vcombine.high %v3486_v11, %v3486_v11  ;;  %v3921_v0 = vrot.slane %v3486_v11, %v6799_v24  ;;  %v3487_v26 = vmax.f32 %v3405_v28, 0.0 }
 0x337   : > { %v4554_v17 = vrot.slane %v4540_v3, %v6799_v24  ;;  %v4564_v46 = vrot.slane %v4556_v49, %v6799_v24  ;;  %v4938_v61 = vrot.slane %v7338_v4, 4 }
 0x338   : > { %v4571_v13 = vrot.slane %v4557_v14, %v6799_v24  ;;  %v3928_v39 = vrot.slane %v3914_v54, %v6799_v24  ;;  %v3929_v62 = vcombine.high %v3921_v0, %v3921_v0  ;;  %v3931_v56 = vcombine.high %v3487_v26, %v3487_v26 }
 0x339   : > { %v4555_v6 = vcombine.low %v4547_v1, %v4554_v17  ;;  %v3409_v22 = vpop.f32.mrb[32].mxu1  ;;  %v3938_v2 = vrot.slane %v3487_v26, %v6799_v24 }
 0x33a   : > { %v4572_v8 = vcombine.low %v4564_v46, %v4571_v13  ;;  %v3930_v59 = vcombine.high %v3928_v39, %v3928_v39  ;;  %v3410_v47 = vadd.f32 %v7257_v53, %v3409_v22  ;;  %v5434_v51 = vpop.f32.mrb[33].mxu1  ;;  %v4573_v9 = vcombine.low %v3921_v0, %v3929_v62 }
 0x33b   : > { %v4960_v37 = vsel %vm797_vm2, %v4555_v6, 0.0  ;;  %v3945_v36 = vrot.slane %v3931_v56, %v6799_v24  ;;  %v3412_v23 = vpop.f32.mrb[34].mxu1  ;;  %v3946_v38 = vcombine.high %v3938_v2, %v3938_v2 }
 0x33c   : > { %v4961_v63 = vadd.f32 %v4960_v37, %v4959_v18  ;;  %v4962_v34 = vsel %vm797_vm2, %v4572_v8, 0.0  ;;  %v4574_v16 = vcombine.low %v3928_v39, %v3930_v59  ;;  %v5435_v31 = vpop.f32.mrb[35].mxu1  ;;  %v3488_v42 = vmax.f32 %v3410_v47, 0.0 }
 0x33d   : > { %v4581_v15 = vrot.slane %v4573_v9, %v6799_v24  ;;  %v4590_v44 = vcombine.low %v3938_v2, %v3946_v38  ;;  %v3947_v7 = vcombine.high %v3945_v36, %v3945_v36  ;;  %v3413_v50 = vadd.f32 %v7257_v53, %v3412_v23 }
 0x33e   : > { %v4963_v21 = vadd.f32 %v4962_v34, %v4961_v63  ;;  %v4588_v58 = vrot.slane %v4574_v16, %v6799_v24  ;;  %v3948_v19 = vcombine.high %v3488_v42, %v3488_v42  ;;  %v3955_v29 = vrot.slane %v3488_v42, %v6799_v24 }
 0x33f   : > { %v4597_v48 = vrot.slane %v4590_v44, %v6799_v24  ;;  %v4604_v5 = vrot.slane %v3945_v36, %v6799_v24  ;;  %v3489_v12 = vmax.f32 %v3413_v50, 0.0  ;;  %v7424_v63 = vcombine.low %v3691_v10, %v7292_v43 }
 0x340   : > { %v4589_v32 = vcombine.low %v4581_v15, %v4588_v58  ;;  %v3962_v27 = vrot.slane %v3948_v19, %v6799_v24  ;;  %v3963_v25 = vcombine.high %v3955_v29, %v3955_v29  ;;  %v4606_v35 = vcombine.low %v3947_v7, %v3955_v29 }
 0x341   : > { %v4605_v52 = vcombine.low %v4597_v48, %v4604_v5  ;;  %v3965_v60 = vcombine.high %v3489_v12, %v3489_v12  ;;  %v3972_v14 = vrot.slane %v3489_v12, %v6799_v24  ;;  %v4939_v34 = vadd.f32 %v4938_v61, %v7338_v4 }
 0x342   : > { %v4964_v40 = vsel %vm797_vm2, %v4589_v32, 0.0  ;;  %v3417_v30 = vpop.f32.mrb[36].mxu1  ;;  %v4607_v49 = vcombine.low %v3963_v25, %v3962_v27  ;;  %v3964_v11 = vcombine.high %v3962_v27, %v3962_v27  ;;  %v3329_v55 = vpop.f32.mrb[48].mxu0  ;;  %v4614_v26 = vrot.slane %v4606_v35, %v6799_v24 }
 0x343   : > { %v4965_v41 = vadd.f32 %v4964_v40, %v4963_v21  ;;  %v5438_v3 = vpop.f32.mrb[37].mxu1  ;;  %v4966_v28 = vsel %vm4905_vm6, %v4605_v52, 0.0  ;;  %v3330_v54 = vadd.f32 %v7257_v53, %v3329_v55  ;;  %v5394_v1 = vpop.f32.mrb[49].mxu0  ;;  %v3418_v13 = vadd.f32 %v7257_v53, %v3417_v30 }
 0x344   : > { %v3420_v17 = vpop.f32.mrb[38].mxu1  ;;  %v4621_v46 = vrot.slane %v4607_v49, %v6799_v24  ;;  %v3332_v39 = vpop.f32.mrb[50].mxu0  ;;  %v3979_v62 = vrot.slane %v3965_v60, %v6799_v24  ;;  %v3980_v56 = vcombine.high %v3972_v14, %v3972_v14  ;;  %v4623_v22 = vcombine.low %v3964_v11, %v3972_v14 }
 0x345   : > { %v7413_v0 = vadd.f32 %v4966_v28, %v4965_v41  ;;  %v5439_v6 = vpop.f32.mrb[39].mxu1  ;;  %v3468_v8 = vmax.f32 %v3330_v54, 0.0  ;;  %v5395_v59 = vpop.f32.mrb[51].mxu0  ;;  %v3490_v47 = vmax.f32 %v3418_v13, 0.0  ;;  %v3333_v51 = vadd.f32 %v7257_v53, %v3332_v39 }
 0x346   : > { %v4622_v2 = vcombine.low %v4614_v26, %v4621_v46  ;;  %v3421_v18 = vadd.f32 %v7257_v53, %v3420_v17  ;;  %v4624_v37 = vcombine.low %v3980_v56, %v3979_v62  ;;  %v4631_v9 = vrot.slane %v4623_v22, %v6799_v24 }
 0x347   : > { %v3608_v36 = vcombine.high %v3468_v8, %v3468_v8  ;;  %v3615_v23 = vrot.slane %v3468_v8, %v6799_v24  ;;  %v4953_v16 = vrot.slane %v7375_v45, 4  ;;  %v3982_v38 = vcombine.high %v3490_v47, %v3490_v47 }
 0x348   : > { %v4638_v31 = vrot.slane %v4624_v37, %v6799_v24  ;;  %v3989_v15 = vrot.slane %v3490_v47, %v6799_v24  ;;  %v4974_v58 = vsel %vm797_vm2, %v4622_v2, 0.0  ;;  %v3981_v44 = vcombine.high %v3979_v62, %v3979_v62 }
 0x349   : > { %v3622_v42 = vrot.slane %v3608_v36, %v6799_v24  ;;  %v3623_v21 = vcombine.high %v3615_v23, %v3615_v23  ;;  %v3996_v7 = vrot.slane %v3982_v38, %v6799_v24  ;;  %v3469_v19 = vmax.f32 %v3333_v51, 0.0 }
 0x34a   : > { %v4639_v43 = vcombine.low %v4631_v9, %v4638_v31  ;;  %v3997_v50 = vcombine.high %v3989_v15, %v3989_v15  ;;  %v3491_v4 = vmax.f32 %v3421_v18, 0.0  ;;  %v4640_v48 = vcombine.low %v3981_v44, %v3989_v15 }
 0x34b   : > { %v4254_v29 = vcombine.low %v3615_v23, %v3623_v21  ;;  %v4268_v32 = vrot.slane %v3622_v42, %v6799_v24  ;;  %v3624_v5 = vcombine.high %v3622_v42, %v3622_v42  ;;  %v3625_v27 = vcombine.high %v3469_v19, %v3469_v19 }
 0x34c   : > { %v4975_v25 = vsel %vm797_vm2, %v4639_v43, 0.0  ;;  %v4641_v10 = vcombine.low %v3997_v50, %v3996_v7  ;;  %v3632_v40 = vrot.slane %v3469_v19, %v6799_v24  ;;  %v4940_v12 = vrot.slane %v4939_v34, 2 }
 0x34d   : > { %v4261_v35 = vrot.slane %v4254_v29, %v6799_v24  ;;  %v4976_v30 = vadd.f32 %v4975_v25, %v4974_v58  ;;  %v4648_v61 = vrot.slane %v4640_v48, %v6799_v24  ;;  %v7439_v41 = vrot.slane %v3625_v27, %v6799_v24 }
 0x34e   : > { %v3425_v52 = vpop.f32.mrb[40].mxu1  ;;  %v4655_v55 = vrot.slane %v4641_v10, %v6799_v24  ;;  %v3640_v3 = vcombine.high %v3632_v40, %v3632_v40  ;;  %v4270_v28 = vcombine.low %v3624_v5, %v3632_v40  ;;  %v4954_v14 = vadd.f32 %v4953_v16, %v7375_v45 }
 0x34f   : > { %v5442_v49 = vpop.f32.mrb[41].mxu1  ;;  %v4269_v11 = vcombine.low %v4261_v35, %v4268_v32  ;;  %v3998_v54 = vcombine.high %v3996_v7, %v3996_v7  ;;  %v3999_v1 = vcombine.high %v3491_v4, %v3491_v4  ;;  %v4006_v17 = vrot.slane %v3491_v4, %v6799_v24 }
 0x350   : > { %v3428_v60 = vpop.f32.mrb[42].mxu1  ;;  %v4656_v13 = vcombine.low %v4648_v61, %v4655_v55  ;;  %v4271_v39 = vcombine.low %v3640_v3, %v7439_v41  ;;  %v4278_v6 = vrot.slane %v4270_v28, %v6799_v24  ;;  %v7447_v62 = vadd.f32 %v4940_v12, %v4939_v34 }
 0x351   : > { %v5443_v26 = vpop.f32.mrb[43].mxu1  ;;  %v4906_v46 = vsel %vm4905_vm6, %v4269_v11, 0.0  ;;  %v4013_v22 = vrot.slane %v3999_v1, %v6799_v24  ;;  %v4014_v45 = vcombine.high %v4006_v17, %v4006_v17  ;;  %v4657_v2 = vcombine.low %v3998_v54, %v4006_v17 }
 0x352   : > { %v7450_v56 = vadd.f32 %v4906_v46, %v7287_v33  ;;  %v4977_v8 = vsel %vm797_vm2, %v4656_v13, 0.0  ;;  %v4285_v59 = vrot.slane %v4271_v39, %v6799_v24  ;;  %v3426_v47 = vadd.f32 %v7257_v53, %v3425_v52 }
 0x353   : > { %v4336_v51 = vrot.slane %v7424_v63, %v6799_v24  ;;  %v4955_v18 = vrot.slane %v4954_v14, 2  ;;  %v4978_v37 = vadd.f32 %v4977_v8, %v4976_v30  ;;  %v4658_v9 = vcombine.low %v4014_v45, %v4013_v22 }
 0x354   : > { %v7460_v33 = vsel %vm4905_vm6, %v7301_v57, 0.0  ;;  %v7462_v36 = vcombine.low %v4278_v6, %v4285_v59  ;;  %v4665_v23 = vrot.slane %v4657_v2, %v6799_v24  ;;  %v3492_v34 = vmax.f32 %v3426_v47, 0.0 }
 0x355   : > { %v4968_v38 = vrot.slane %v7413_v0, 4  ;;  %v4672_v31 = vrot.slane %v4658_v9, %v6799_v24  ;;  %v3429_v42 = vadd.f32 %v7257_v53, %v3428_v60  ;;  %v4942_v58 = vrot.slane %v7447_v62, 1 }
 0x356   : > { %v3433_v16 = vpop.f32.mrb[44].mxu1  ;;  %v4015_v44 = vcombine.high %v4013_v22, %v4013_v22  ;;  %v4016_v57 = vcombine.high %v3492_v34, %v3492_v34  ;;  %v4023_v7 = vrot.slane %v3492_v34, %v6799_v24  ;;  %v4956_v43 = vadd.f32 %v4955_v18, %v4954_v14 }
 0x357   : > { %v3434_v21 = vadd.f32 %v7257_v53, %v3433_v16  ;;  %v5446_v15 = vpop.f32.mrb[45].mxu1  ;;  %v4673_v29 = vcombine.low %v4665_v23, %v4672_v31  ;;  %v3493_v50 = vmax.f32 %v3429_v42, 0.0  ;;  %v4969_v35 = vadd.f32 %v4968_v38, %v7413_v0 }
 0x358   : > { %v3436_v19 = vpop.f32.mrb[46].mxu1  ;;  %v4030_v48 = vrot.slane %v4016_v57, %v6799_v24  ;;  %v4031_v5 = vcombine.high %v4023_v7, %v4023_v7  ;;  %v4674_v27 = vcombine.low %v4015_v44, %v4023_v7  ;;  %v4908_v11 = vrot.slane %v7450_v56, 4 }
 0x359   : > { %v3494_v4 = vmax.f32 %v3434_v21, 0.0  ;;  %v5447_v32 = vpop.f32.mrb[47].mxu1  ;;  %v3437_v25 = vadd.f32 %v7257_v53, %v3436_v19  ;;  %v4979_v10 = vsel %vm797_vm2, %v4673_v29, 0.0  ;;  %v4033_v40 = vcombine.high %v3493_v50, %v3493_v50 }
 0x35a   : > { %v4040_v52 = vrot.slane %v3493_v50, %v6799_v24  ;;  %v4980_v12 = vadd.f32 %v4979_v10, %v4978_v37  ;;  %v4032_v30 = vcombine.high %v4030_v48, %v4030_v48  ;;  %v4681_v61 = vrot.slane %v4674_v27, %v6799_v24 }
 0x35b   : > { %v4688_v49 = vrot.slane %v4031_v5, %v6799_v24  ;;  %v4047_v55 = vrot.slane %v4033_v40, %v6799_v24  ;;  %v4050_v28 = vcombine.high %v3494_v4, %v3494_v4  ;;  %v4057_v0 = vrot.slane %v3494_v4, %v6799_v24 }
 0x35c   : > { %v4048_v3 = vcombine.high %v4040_v52, %v4040_v52  ;;  %v4690_v14 = vcombine.low %v4030_v48, %v4032_v30  ;;  %v3495_v54 = vmax.f32 %v3437_v25, 0.0  ;;  %v4957_v17 = vrot.slane %v4956_v43, 1 }
 0x35d   : > { %v4689_v60 = vcombine.low %v4681_v61, %v4688_v49  ;;  %v4049_v26 = vcombine.high %v4047_v55, %v4047_v55  ;;  %v4064_v13 = vrot.slane %v4050_v28, %v6799_v24  ;;  %v4065_v45 = vcombine.high %v4057_v0, %v4057_v0 }
 0x35e   : > { %v3441_v1 = vpop.f32.mrb[48].mxu1  ;;  %v4691_v46 = vcombine.low %v4040_v52, %v4048_v3  ;;  %v4698_v6 = vrot.slane %v4690_v14, %v6799_v24  ;;  %v4067_v8 = vcombine.high %v3495_v54, %v3495_v54  ;;  %v4970_v2 = vrot.slane %v4969_v35, 2 }
 0x35f   : > { %v5450_v39 = vpop.f32.mrb[49].mxu1  ;;  %v4981_v22 = vsel %vm4905_vm6, %v4689_v60, 0.0  ;;  %v4707_v37 = vcombine.low %v4047_v55, %v4049_v26  ;;  %v4909_v23 = vadd.f32 %v4908_v11, %v7450_v56  ;;  %v4066_v34 = vcombine.high %v4064_v13, %v4064_v13 }
 0x360   : > { %v3444_v59 = vpop.f32.mrb[50].mxu1  ;;  %v4982_v47 = vadd.f32 %v4981_v22, %v4980_v12  ;;  %v4705_v18 = vrot.slane %v4691_v46, %v6799_v24  ;;  %v4708_v16 = vcombine.low %v4057_v0, %v4065_v45  ;;  %v4074_v38 = vrot.slane %v3495_v54, %v6799_v24 }
 0x361   : > { %v5451_v9 = vpop.f32.mrb[51].mxu1  ;;  %v7488_v31 = vadd.f32 %v4942_v58, %v7447_v62  ;;  %v7490_v42 = vadd.f32 %v4957_v17, %v4956_v43  ;;  %v4081_v15 = vrot.slane %v4067_v8, %v6799_v24  ;;  %v4715_v44 = vrot.slane %v4707_v37, %v6799_v24 }
 0x362   : > { %v4706_v21 = vcombine.low %v4698_v6, %v4705_v18  ;;  %v4722_v57 = vrot.slane %v4708_v16, %v6799_v24  ;;  %v4724_v7 = vcombine.low %v4064_v13, %v4066_v34  ;;  %v4082_v19 = vcombine.high %v4074_v38, %v4074_v38 }
 0x363   : > { %v3337_v29 = vpop.f32.mrb[52].mxu0  ;;  %v7495_v56 = vadd.f32 %v4970_v2, %v4969_v35  ;;  %v7499_v50 = vsel %vm797_vm2, %v7462_v36, 0.0  ;;  %v3442_v62 = vadd.f32 %v7257_v53, %v3441_v1  ;;  %v3445_v58 = vadd.f32 %v7257_v53, %v3444_v59 }
 0x364   : > { %v5398_v43 = vpop.f32.mrb[53].mxu0  ;;  %v4910_v4 = vrot.slane %v4909_v23, 2  ;;  %v4723_v32 = vcombine.low %v4715_v44, %v4722_v57  ;;  %v4732_v48 = vrot.slane %v4724_v7, %v6799_v24  ;;  %v4725_v5 = vcombine.low %v4074_v38, %v4082_v19 }
 0x365   : > { %v3340_v27 = vpop.f32.mrb[54].mxu0  ;;  %v4083_v25 = vcombine.high %v4081_v15, %v4081_v15  ;;  %v3496_v10 = vmax.f32 %v3442_v62, 0.0  ;;  %v3497_v40 = vmax.f32 %v3445_v58, 0.0  ;;  %v3338_v35 = vadd.f32 %v7257_v53, %v3337_v29 }
 0x366   : > { %v5399_v52 = vpop.f32.mrb[55].mxu0  ;;  %v4989_v36 = vsel %vm797_vm2, %v4706_v21, 0.0  ;;  %v4990_v30 = vsel %vm797_vm2, %v4723_v32, 0.0  ;;  %v4739_v61 = vrot.slane %v4725_v5, %v6799_v24  ;;  %v3341_v49 = vadd.f32 %v7257_v53, %v3340_v27 }
 0x367   : > { %v3449_v12 = vpop.f32.mrb[52].mxu1  ;;  %v4983_v55 = vrot.slane %v4982_v47, 4  ;;  %v4991_v3 = vadd.f32 %v4990_v30, %v4989_v36  ;;  %v4084_v28 = vcombine.high %v3496_v10, %v3496_v10  ;;  %v4091_v60 = vrot.slane %v3496_v10, %v6799_v24  ;;  %v5739_v36 = vld [vmem:[%s7635_s4] ss:$0 sm:$0xff] }
 0x368   : > { %v5454_v11 = vpop.f32.mrb[53].mxu1  ;;  %v4740_v0 = vcombine.low %v4732_v48, %v4739_v61  ;;  %v4101_v54 = vcombine.high %v3497_v40, %v3497_v40  ;;  %v4108_v1 = vrot.slane %v3497_v40, %v6799_v24  ;;  %v3470_v17 = vmax.f32 %v3338_v35, 0.0 }
 0x369   : > { %v3452_v14 = vpop.f32.mrb[54].mxu1  ;;  %v4741_v46 = vcombine.low %v4081_v15, %v4083_v25  ;;  %v4098_v13 = vrot.slane %v4084_v28, %v6799_v24  ;;  %v4099_v39 = vcombine.high %v4091_v60, %v4091_v60  ;;  %v3471_v6 = vmax.f32 %v3341_v49, 0.0 }
 0x36a   : > { %v5455_v26 = vpop.f32.mrb[55].mxu1  ;;  %v7512_v22 = vadd.f32 %v4910_v4, %v4909_v23  ;;  %v4992_v53 = vsel %vm797_vm2, %v4740_v0, 0.0  ;;  %v4115_v45 = vrot.slane %v4101_v54, %v6799_v24  ;;  %v3641_v8 = vcombine.high %v7439_v41, %v7439_v41 }
 0x36b   : > { %v4993_v59 = vadd.f32 %v4992_v53, %v4991_v3  ;;  %v4100_v2 = vcombine.high %v4098_v13, %v4098_v13  ;;  %v4742_v18 = vcombine.low %v4091_v60, %v4099_v39  ;;  %v4116_v37 = vcombine.high %v4108_v1, %v4108_v1 }
 0x36c   : > { %v7518_v9 = vadd.f32 %v4983_v55, %v4982_v47  ;;  %v3642_v34 = vcombine.high %v3470_v17, %v3470_v17  ;;  %v3649_v16 = vrot.slane %v3470_v17, %v6799_v24  ;;  %v3659_v38 = vcombine.high %v3471_v6, %v3471_v6 }
 0x36d   : > { %v4749_v23 = vrot.slane %v4741_v46, %v6799_v24  ;;  %v4756_v21 = vrot.slane %v4742_v18, %v6799_v24  ;;  %v4758_v15 = vcombine.low %v4098_v13, %v4100_v2  ;;  %v3666_v44 = vrot.slane %v3471_v6, %v6799_v24 }
 0x36e   : > { %v4772_v41 = vrot.slane %v4108_v1, %v6799_v24  ;;  %v3656_v7 = vrot.slane %v3642_v34, %v6799_v24  ;;  %v3657_v19 = vcombine.high %v3649_v16, %v3649_v16  ;;  %v4287_v29 = vcombine.low %v3641_v8, %v3649_v16 }
 0x36f   : > { %v3457_v57 = vpop.f32.mrb[56].mxu1  ;;  %v4757_v62 = vcombine.low %v4749_v23, %v4756_v21  ;;  %v4765_v58 = vrot.slane %v4758_v15, %v6799_v24  ;;  %v4774_v43 = vcombine.low %v4116_v37, %v4115_v45  ;;  %v3673_v4 = vrot.slane %v3659_v38, %v6799_v24 }
 0x370   : > { %v5458_v47 = vpop.f32.mrb[57].mxu1  ;;  %v4288_v48 = vcombine.low %v3657_v19, %v3656_v7  ;;  %v4295_v5 = vrot.slane %v4287_v29, %v6799_v24  ;;  %v3658_v27 = vcombine.high %v3656_v7, %v3656_v7  ;;  %v3674_v25 = vcombine.high %v3666_v44, %v3666_v44 }
 0x371   : > { %v3460_v32 = vpop.f32.mrb[58].mxu1  ;;  %v4994_v40 = vsel %vm797_vm2, %v4757_v62, 0.0  ;;  %v4773_v35 = vcombine.low %v4765_v58, %v4772_v41  ;;  %v3675_v52 = vcombine.high %v3673_v4, %v3673_v4  ;;  %v3450_v30 = vadd.f32 %v5739_v36, %v3449_v12 }
 0x372   : > { %v5459_v10 = vpop.f32.mrb[59].mxu1  ;;  %v4995_v61 = vadd.f32 %v4994_v40, %v4993_v59  ;;  %v4302_v49 = vrot.slane %v4288_v48, %v6799_v24  ;;  %v4304_v11 = vcombine.low %v3658_v27, %v3666_v44  ;;  %v4305_v55 = vcombine.low %v3674_v25, %v3673_v4 }
 0x373   : > { %v4996_v3 = vsel %vm4905_vm6, %v4773_v35, 0.0  ;;  %v4321_v28 = vcombine.low %v3675_v52, %v7397_v20  ;;  %v3498_v60 = vmax.f32 %v3450_v30, 0.0  ;;  %v4117_v0 = vcombine.high %v4115_v45, %v4115_v45 }
 0x374   : > { %v4997_v54 = vadd.f32 %v4996_v3, %v4995_v61  ;;  %v4303_v1 = vcombine.low %v4295_v5, %v4302_v49  ;;  %v4312_v17 = vrot.slane %v4304_v11, %v6799_v24  ;;  %v4319_v26 = vrot.slane %v4305_v55, %v6799_v24 }
 0x375   : > { %v4329_v46 = vrot.slane %v4321_v28, %v6799_v24  ;;  %v4118_v12 = vcombine.high %v3498_v60, %v3498_v60  ;;  %v4125_v13 = vrot.slane %v3498_v60, %v6799_v24  ;;  %v3453_v39 = vadd.f32 %v5739_v36, %v3452_v14 }
 0x376   : > { %v4998_v6 = vrot.slane %v4997_v54, 4  ;;  %v4915_v53 = vsel %vm797_vm2, %v4303_v1, 0.0  ;;  %v4320_v8 = vcombine.low %v4312_v17, %v4319_v26  ;;  %v3458_v59 = vadd.f32 %v5739_v36, %v3457_v57 }
 0x377   : > { %v4916_v20 = vadd.f32 %v4915_v53, %v7499_v50  ;;  %v4337_v45 = vcombine.low %v4329_v46, %v4336_v51  ;;  %v4132_v2 = vrot.slane %v4118_v12, %v6799_v24  ;;  %v4133_v18 = vcombine.high %v4125_v13, %v4125_v13 }
 0x378   : > { %v4999_v37 = vadd.f32 %v4998_v6, %v4997_v54  ;;  %v4917_v34 = vsel %vm797_vm2, %v4320_v8, 0.0  ;;  %v4775_v16 = vcombine.low %v4117_v0, %v4125_v13  ;;  %v3499_v38 = vmax.f32 %v3453_v39, 0.0 }
 0x379   : > { %v4782_v14 = vrot.slane %v4774_v43, %v6799_v24  ;;  %v4918_v23 = vadd.f32 %v4917_v34, %v4916_v20  ;;  %v4919_v21 = vsel %vm797_vm2, %v4337_v45, 0.0  ;;  %v4134_v15 = vcombine.high %v4132_v2, %v4132_v2 }
 0x37a   : > { %v4789_v50 = vrot.slane %v4775_v16, %v6799_v24  ;;  %v4791_v44 = vcombine.low %v4133_v18, %v4132_v2  ;;  %v4135_v57 = vcombine.high %v3499_v38, %v3499_v38  ;;  %v4142_v63 = vrot.slane %v3499_v38, %v6799_v24 }
 0x37b   : > { %v4985_v51 = vrot.slane %v7518_v9, 2  ;;  %v5000_v41 = vrot.slane %v4999_v37, 2  ;;  %v4920_v7 = vadd.f32 %v4919_v21, %v4918_v23  ;;  %v3500_v19 = vmax.f32 %v3458_v59, 0.0 }
 0x37c   : > { %v4790_v29 = vcombine.low %v4782_v14, %v4789_v50  ;;  %v4149_v47 = vrot.slane %v4135_v57, %v6799_v24  ;;  %v4150_v62 = vcombine.high %v4142_v63, %v4142_v63  ;;  %v3461_v58 = vadd.f32 %v5739_v36, %v3460_v32 }
 0x37d   : > { %v4922_v43 = vadd.f32 %v7460_v33, %v4920_v7  ;;  %v4792_v4 = vcombine.low %v4134_v15, %v4142_v63  ;;  %v4152_v48 = vcombine.high %v3500_v19, %v3500_v19  ;;  %v4159_v5 = vrot.slane %v3500_v19, %v6799_v24 }
 0x37e   : > { %v4912_v27 = vrot.slane %v7512_v22, 1  ;;  %v4799_v25 = vrot.slane %v4791_v44, %v6799_v24  ;;  %v4808_v10 = vcombine.low %v4150_v62, %v4149_v47  ;;  %v4151_v40 = vcombine.high %v4149_v47, %v4149_v47 }
 0x37f   : > { %v4923_v35 = vrot.slane %v4922_v43, 4  ;;  %v4806_v52 = vrot.slane %v4792_v4, %v6799_v24  ;;  %v4166_v30 = vrot.slane %v4152_v48, %v6799_v24  ;;  %v4167_v61 = vcombine.high %v4159_v5, %v4159_v5 }
 0x380   : > { %v4986_v32 = vadd.f32 %v4985_v51, %v7518_v9  ;;  %v5001_v36 = vadd.f32 %v5000_v41, %v4999_v37  ;;  %v4809_v33 = vcombine.low %v4151_v40, %v4159_v5  ;;  %v3501_v49 = vmax.f32 %v3461_v58, 0.0 }
 0x381   : > { %v4924_v11 = vadd.f32 %v4923_v35, %v4922_v43  ;;  %v4807_v55 = vcombine.low %v4799_v25, %v4806_v52  ;;  %v4816_v3 = vrot.slane %v4808_v10, %v6799_v24  ;;  %v4168_v28 = vcombine.high %v4166_v30, %v4166_v30 }
 0x382   : > { %v4823_v60 = vrot.slane %v4809_v33, %v6799_v24  ;;  %v4825_v0 = vcombine.low %v4167_v61, %v4166_v30  ;;  %v4169_v54 = vcombine.high %v3501_v49, %v3501_v49  ;;  %v4176_v1 = vrot.slane %v3501_v49, %v6799_v24 }
 0x383   : > { %v4972_v17 = vrot.slane %v7495_v56, 1  ;;  %v4925_v26 = vrot.slane %v4924_v11, 2  ;;  %v5004_v46 = vsel %vm797_vm2, %v4790_v29, 0.0  ;;  %v5005_v9 = vsel %vm797_vm2, %v4807_v55, 0.0 }
 0x384   : > { %v4913_v12 = vadd.f32 %v4912_v27, %v7512_v22  ;;  %v5006_v13 = vadd.f32 %v5005_v9, %v5004_v46  ;;  %v4824_v39 = vcombine.low %v4816_v3, %v4823_v60  ;;  %v4183_v6 = vrot.slane %v4169_v54, %v6799_v24  ;;  %v5258_v54 = vld [vmem:[%s7637_s6] ss:$0 sm:$0xff] }
 0x385   : > { %v4987_v53 = vrot.slane %v4986_v32, 1  ;;  %v4926_v8 = vadd.f32 %v4925_v26, %v4924_v11  ;;  %v4184_v59 = vcombine.high %v4176_v1, %v4176_v1  ;;  %v4826_v20 = vcombine.low %v4168_v28, %v4176_v1 }
 0x386   : > { %v5002_v45 = vrot.slane %v5001_v36, 1  ;;  %v4833_v2 = vrot.slane %v4825_v0, %v6799_v24  ;;  %v5007_v18 = vsel %vm797_vm2, %v4824_v39, 0.0  ;;  %v4185_v37 = vcombine.high %v4183_v6, %v4183_v6 }
 0x387   : > { %v4927_v34 = vrot.slane %v4926_v8, 1  ;;  %v5008_v16 = vadd.f32 %v5007_v18, %v5006_v13  ;;  %v4840_v38 = vrot.slane %v4826_v20, %v6799_v24  ;;  %v4842_v14 = vcombine.low %v4184_v59, %v4183_v6 }
 0x388   : > { %v4973_v22 = vadd.f32 %v4972_v17, %v7495_v56  ;;  %v5019_v23 = vpack.c.bf16 %v4913_v12, %v4913_v12  ;;  %v4856_v21 = vrot.slane %v4185_v37, %v6799_v24  ;;  %v4988_v15 = vadd.f32 %v4987_v53, %v4986_v32 }
 0x389   : > { %v4928_v50 = vadd.f32 %v4927_v34, %v4926_v8  ;;  %v4841_v44 = vcombine.low %v4833_v2, %v4840_v38  ;;  %v4849_v57 = vrot.slane %v4842_v14, %v6799_v24  ;;  %v5021_v63 = vpack.c.bf16 %v7488_v31, %v7488_v31 }
 0x38a   : > { %v5003_v51 = vadd.f32 %v5002_v45, %v5001_v36  ;;  %v5022_v41 = vpack.c.bf16 %v7490_v42, %v7490_v42  ;;  %v5023_v56 = vpack.c.bf16 %v4973_v22, %v4973_v22  ;;  %v5046_v62 = vunpack.c.l.b16 %v5019_v23 }
 0x38b   : > { %v5020_v7 = vpack.c.bf16 %v4928_v50, %v4928_v50  ;;  %v4857_v19 = vcombine.low %v4849_v57, %v4856_v21  ;;  %v5009_v29 = vsel %vm797_vm2, %v4841_v44, 0.0  ;;  %v5024_v58 = vpack.c.bf16 %v4988_v15, %v4988_v15 }
 0x38c   : > { %v5010_v47 = vadd.f32 %v5009_v29, %v5008_v16  ;;  %v5048_v4 = vunpack.c.l.b16 %v5021_v63  ;;  %v5025_v48 = vpack.c.bf16 %v5003_v51, %v5003_v51  ;;  %v5049_v5 = vunpack.c.l.b16 %v5022_v41 }
 0x38d   : > { %v5047_v43 = vunpack.c.l.b16 %v5020_v7  ;;  %v5011_v24 = vsel %vm4905_vm6, %v4857_v19, 0.0  ;;  %v5050_v42 = vunpack.c.l.b16 %v5023_v56  ;;  %v5051_v40 = vunpack.c.l.b16 %v5024_v58 }
 0x38e   : > { %v5012_v31 = vadd.f32 %v5011_v24, %v5010_v47  ;;  %v5052_v52 = vunpack.c.l.b16 %v5025_v48 }
 0x38f   : > { %v5055_v27 = vsel %vm5054_vm7, %v5047_v43, %v5046_v62 }
 0x390   : > { %v5013_v25 = vrot.slane %v5012_v31, 4  ;;  %v5057_v10 = vsel %vm5056_vm8, %v5048_v4, %v5055_v27 }
 0x391   : > { %v5059_v35 = vsel %vm5058_vm9, %v5049_v5, %v5057_v10 }
 0x392   : > { %v5014_v30 = vadd.f32 %v5013_v25, %v5012_v31  ;;  %v5061_v61 = vsel %vm5060_vm10, %v5050_v42, %v5059_v35 }
 0x393   : > { %v5063_v32 = vsel %vm5062_vm11, %v5051_v40, %v5061_v61 }
 0x394   : > { %v5015_v36 = vrot.slane %v5014_v30, 2  ;;  %v5065_v33 = vsel %vm5064_vm12, %v5052_v52, %v5063_v32 }
 0x396   : > { %v5016_v49 = vadd.f32 %v5015_v36, %v5014_v30 }
 0x398   : > { %v5017_v11 = vrot.slane %v5016_v49, 1 }
 0x39a   : > { %v5018_v55 = vadd.f32 %v5017_v11, %v5016_v49 }
 0x39c   : > { %v5026_v3 = vpack.c.bf16 %v5018_v55, %v5018_v55 }
 0x39e   : > { %v5053_v28 = vunpack.c.l.b16 %v5026_v3 }
 0x3a0   : > { %v5067_v60 = vsel %vm5066_vm13, %v5053_v28, %v5065_v33 }
 0x3a1   : > { %v5068_v0 = vpack.c.b16 %v5067_v60, %v5067_v60 }
 0x3a3   : > { %5465 = vmatmul.mubr.msk.bf16.vlgmr.msra.gmra.mrb[56].mxu0 %vm797_vm2, %v5068_v0 }
 0x476   : > { %v5118_v1 = vpop.f32.mrb[56].mxu0 }
 0x477   : > { %v5119_v17 = vadd.f32 %v5258_v54, %v5118_v1  ;;  %v5466_v26 = vpop.f32.mrb[57].mxu0 }
 0x478   : > { %v5121_v46 = vpop.f32.mrb[58].mxu0 }
 0x479   : > { %5124 = vst [vmem:[%s274_s19] sm:$0xff] %v5119_v17  ;;  %v5467_v9 = vpop.f32.mrb[59].mxu0 }
 0x47a   : > { %5753 = shalt.err (!%p5750_p3)
}
 0x47b   : > { %s5754_s9 = scalar_lea.hbm %s7589_s21, 128  ;;  %s5758_s17 = scalar_lea.hbm %s7638_s7, 256 }
 0x47c   : > { %p5755_p4 = scmp.ne.s32.totalorder %s7589_s21, %s5754_s9  ;;  %p5759_p9 = scmp.lt.u32.totalorder %s7589_s21, %s7638_s7 }
 0x47d   : > { %p5760_p10 = scmp.lt.u32.totalorder %s5758_s17, %s5754_s9  ;;  %p5762_p12 = scmp.lt.u32.totalorder %s5754_s9, %s7589_s21 }
 0x47e   : > { %p5756_p7 = pnand %p5755_p4, %p5888_p5 }
 0x47f   : > { %p5761_p11 = por %p5760_p10, %p5759_p9 }
 0x480   : > { %p5757_p8 = pneg %p5756_p7 }
 0x481   : > { %p5763_p13 = por %p5762_p12, %p5761_p11 }
 0x483   : > { %p5764_p0 = pnand %p5763_p13, %p5757_p8 }
 0x485   : > { %5767 = shalt.err (!%p5764_p0)
}
 0x486   : > { %5481 = dma.vmem_to_hbm [thread:$0]  (%p5888_p5), %s7591_s14, 128, %s7589_s21, %s5126_s22  }
 0x487 PF: > { %p5487_p1 = scmp.ge.s32.totalorder %s5802_s27, 2  ;;  %s5151_s15 = sand.u32 1, %s5790_s24  }
 0x488   : > { %s5152_s20 = scalar_lea.sflag [#allocation3], %s5151_s15 }
 0x489   : > { %p5484_p2 = pnand %p5487_p1, %p5892_p6 }
 0x48b   : > { %5785 = dma.done.wait (!%p5484_p2), %s5152_s20, 128  }
 0x48c   : > { %5787 = vsyncadd (!%p5484_p2), %s5152_s20, 4294967168  ;;  %p17_p3 = scmp.ge.s32.totalorder %s5875_s30, 4   ;;  %s7662_s24 = smov %s5794_s25 }
 0x48d   : > { %s7663_s25 = smov %s5798_s26  ;;  %s7664_s26 = smov %s5886_s10 }
 0x48e   : > { %s7665_s27 = smov %s5875_s30  ;;  %19 = sbr.rel (!%p17_p3) target bundleno = 3 (0x3), region = 83 }
 0x495   :  { %5157 = vsyncpa [#allocation3], 1 }
 0x496   :  { %5159 = vsyncpa [#allocation3 + $0x1], 1 }

</bundles_post_ra>
